<compile_context>
chip_gen: v7x
topology: tpu7x:2x2x1
jax: 0.10.0
libtpu: 0.0.40
codegen_flags: <defaults>
</compile_context>

<pallas_src>
import functools

import jax
import jax.numpy as jnp
from jax.experimental import pallas as pl
from jax.experimental.pallas import tpu as pltpu

EPS = 1e-5
LANE = 128
_VMEM_LIMIT = 48 * 1024 * 1024  # above 32 MiB default, below v7x 64 MiB physical


def _round_up(x, m):
    return (x + m - 1) // m * m


def _pick_tile_h(H, W, cin_p, cout_p, budget_bytes=8 * 1024 * 1024):
    """Largest divisor of H whose streaming working set fits a VMEM budget."""
    per_row = W * (cin_p * 2 + cout_p * 2 + cout_p * 4)  # in bf16 + out bf16 + f32 acc
    cap = max(1, budget_bytes // max(per_row, 1))
    best = 1
    for d in range(1, H + 1):
        if H % d == 0 and d <= cap:
            best = d
    return best


# ----------------------------- Pallas kernels ------------------------------ #

def _conv_bn_stats_kernel(body_ref, top_ref, bot_ref, s_ref, t_ref, w_ref,
                          y_ref, stats_ref, *, apply_input_act):
    """3x3 same-conv on one (tile_h, W) row tile.

    body_ref: (1, tile_h, W, Cin_p) bf16   rows of this tile
    top_ref/bot_ref: (1, 1, W, Cin_p)      halo rows (clamped at border, masked here)
    s_ref/t_ref: (1, Cin_p) f32            BN scale/shift of the *input* activation
    w_ref: (9, Cin_p, Cout_p) bf16         3x3 weights, tap-major
    y_ref: (1, tile_h, W, Cout_p) bf16     raw conv output (pre-BN)
    stats_ref: (1, 1, 2, Cout_p) f32       per-tile [sum, sum-of-squares] for BN
    """
    i = pl.program_id(1)
    last = pl.num_programs(1) - 1
    s = s_ref[...]
    t = t_ref[...]

    def prep(v):
        # optional fused BN+ReLU of the previous layer (applied to halo rows too)
        if apply_input_act:
            v = jnp.maximum(v.astype(jnp.float32) * s + t, 0.0)
        return v.astype(jnp.bfloat16)

    body = prep(body_ref[0])                                        # (th, W, Cin_p)
    # image-border halo rows must be the conv's zero padding -> mask after act
    top = prep(top_ref[0]) * (i > 0).astype(jnp.bfloat16)           # (1, W, Cin_p)
    bot = prep(bot_ref[0]) * (i < last).astype(jnp.bfloat16)        # (1, W, Cin_p)

    rows = jnp.concatenate([top, body, bot], axis=0)                # (th+2, W, Cin_p)
    padded = jnp.pad(rows, ((0, 0), (1, 1), (0, 0)))                # (th+2, W+2, Cin_p)

    th, w, cin_p = body.shape
    cout_p = w_ref.shape[-1]

    acc = jnp.zeros((th * w, cout_p), jnp.float32)
    k = 0
    for dy in range(3):
        for dx in range(3):
            win = padded[dy:dy + th, dx:dx + w, :].reshape(th * w, cin_p)
            acc = acc + jnp.dot(win, w_ref[k], preferred_element_type=jnp.float32)
            k += 1

    y_ref[0] = acc.reshape(th, w, cout_p).astype(y_ref.dtype)

    ssum = jnp.sum(acc, axis=0, keepdims=True)                      # (1, Cout_p)
    ssq = jnp.sum(acc * acc, axis=0, keepdims=True)                 # (1, Cout_p)
    stats_ref[0, 0] = jnp.concatenate([ssum, ssq], axis=0)          # (2, Cout_p)


def _bn_relu_kernel(y_ref, s_ref, t_ref, o_ref):
    y = y_ref[0].astype(jnp.float32)
    o_ref[0] = jnp.maximum(y * s_ref[...] + t_ref[...], 0.0).astype(o_ref.dtype)


# ------------------------------ wrappers ----------------------------------- #

def _conv3x3_fused(x, w9, scale_in, shift_in, *, apply_input_act, tile_h):
    """x: (N, H, W, Cin_p) bf16; w9: (9, Cin_p, Cout_p) bf16."""
    N, H, W, cin_p = x.shape
    cout_p = w9.shape[-1]
    n_tiles = H // tile_h

    kernel = functools.partial(_conv_bn_stats_kernel,
                               apply_input_act=apply_input_act)

    body_spec = pl.BlockSpec((1, tile_h, W, cin_p), lambda n, i: (n, i, 0, 0))
    top_spec = pl.BlockSpec(
        (1, 1, W, cin_p),
        lambda n, i: (n, jnp.maximum(i * tile_h - 1, 0), 0, 0))
    bot_spec = pl.BlockSpec(
        (1, 1, W, cin_p),
        lambda n, i: (n, jnp.minimum((i + 1) * tile_h, H - 1), 0, 0))
    vec_spec = pl.BlockSpec((1, cin_p), lambda n, i: (0, 0))
    w_spec = pl.BlockSpec((9, cin_p, cout_p), lambda n, i: (0, 0, 0))

    y, stats = pl.pallas_call(
        kernel,
        out_shape=(jax.ShapeDtypeStruct((N, H, W, cout_p), jnp.bfloat16),
                   jax.ShapeDtypeStruct((N, n_tiles, 2, cout_p), jnp.float32)),
        grid_spec=pltpu.PrefetchScalarGridSpec(
            num_scalar_prefetch=0,
            grid=(N, n_tiles),
            in_specs=[body_spec, top_spec, bot_spec, vec_spec, vec_spec, w_spec],
            out_specs=(pl.BlockSpec((1, tile_h, W, cout_p), lambda n, i: (n, i, 0, 0)),
                       pl.BlockSpec((1, 1, 2, cout_p), lambda n, i: (n, i, 0, 0))),
        ),
        compiler_params=pltpu.CompilerParams(
            dimension_semantics=("parallel", "parallel"),
            vmem_limit_bytes=_VMEM_LIMIT),
    )(x, x, x, scale_in, shift_in, w9)
    return y, stats


def _bn_relu_apply(y, scale, shift, *, tile_h):
    N, H, W, cp = y.shape
    n_tiles = H // tile_h
    return pl.pallas_call(
        _bn_relu_kernel,
        out_shape=jax.ShapeDtypeStruct((N, H, W, cp), jnp.float32),
        grid_spec=pltpu.PrefetchScalarGridSpec(
            num_scalar_prefetch=0,
            grid=(N, n_tiles),
            in_specs=[pl.BlockSpec((1, tile_h, W, cp), lambda n, i: (n, i, 0, 0)),
                      pl.BlockSpec((1, cp), lambda n, i: (0, 0)),
                      pl.BlockSpec((1, cp), lambda n, i: (0, 0))],
            out_specs=pl.BlockSpec((1, tile_h, W, cp), lambda n, i: (n, i, 0, 0)),
        ),
        compiler_params=pltpu.CompilerParams(
            dimension_semantics=("parallel", "parallel"),
            vmem_limit_bytes=_VMEM_LIMIT),
    )(y, scale, shift)


def _bn_scale_shift(stats, gamma_p, beta_p, count):
    """Finalize training-mode BN scale/shift from fused per-tile statistics."""
    sums = jnp.sum(stats, axis=(0, 1))                    # (2, Cp)
    mean = sums[0] / count
    var = jnp.maximum(sums[1] / count - mean * mean, 0.0)  # biased variance
    scale = gamma_p / jnp.sqrt(var + EPS)
    shift = beta_p - mean * scale
    return (scale.reshape(1, -1).astype(jnp.float32),
            shift.reshape(1, -1).astype(jnp.float32))


def _prep_weight(w, cin_p, cout_p):
    kh, kw, cin, cout = w.shape
    w = jnp.pad(w, ((0, 0), (0, 0), (0, cin_p - cin), (0, cout_p - cout)))
    return w.reshape(kh * kw, cin_p, cout_p).astype(jnp.bfloat16)


@functools.partial(jax.jit, static_argnames=("tile_h",))
def double_conv(x_nchw, params, tile_h=None):
    """Forward of DoubleConv.  x_nchw: (N, Cin, H, W) f32 -> (N, Cout, H, W) f32."""
    w1, b1, g1, be1, w2, b2, g2, be2 = params
    del b1, b2  # conv bias is exactly cancelled by training-mode BN mean subtraction

    N, Cin, H, W = x_nchw.shape
    C1 = w1.shape[-1]
    C2 = w2.shape[-1]
    cin_p = _round_up(Cin, LANE)
    c1_p = _round_up(C1, LANE)
    c2_p = _round_up(C2, LANE)
    if tile_h is None:
        tile_h = _pick_tile_h(H, W, max(cin_p, c1_p), max(c1_p, c2_p))
    assert H % tile_h == 0

    # NCHW f32 -> NHWC bf16, channels padded to lane-dense multiple of 128.
    x = jnp.transpose(x_nchw, (0, 2, 3, 1)).astype(jnp.bfloat16)
    x = jnp.pad(x, ((0, 0), (0, 0), (0, 0), (0, cin_p - Cin)))

    w1p = _prep_weight(w1, cin_p, c1_p)
    w2p = _prep_weight(w2, c1_p, c2_p)
    g1p = jnp.pad(g1.astype(jnp.float32), (0, c1_p - C1))
    be1p = jnp.pad(be1.astype(jnp.float32), (0, c1_p - C1))
    g2p = jnp.pad(g2.astype(jnp.float32), (0, c2_p - C2))
    be2p = jnp.pad(be2.astype(jnp.float32), (0, c2_p - C2))

    count = float(N * H * W)

    # conv1 (+ fused per-tile BN1 statistics); input path is identity.
    ident_s = jnp.ones((1, cin_p), jnp.float32)
    ident_t = jnp.zeros((1, cin_p), jnp.float32)
    y1, st1 = _conv3x3_fused(x, w1p, ident_s, ident_t,
                             apply_input_act=False, tile_h=tile_h)
    s1, t1 = _bn_scale_shift(st1, g1p, be1p, count)

    # conv2 with BN1+ReLU fused into its input path (+ fused BN2 statistics).
    y2, st2 = _conv3x3_fused(y1, w2p, s1, t1,
                             apply_input_act=True, tile_h=tile_h)
    s2, t2 = _bn_scale_shift(st2, g2p, be2p, count)

    out = _bn_relu_apply(y2, s2, t2, tile_h=tile_h)       # (N, H, W, c2_p) f32
    out = out[..., :C2]
    return jnp.transpose(out, (0, 3, 1, 2))               # back to NCHW


def init_params(key, in_channels, out_channels):
    k1, k2, k3, k4 = jax.random.split(key, 4)
    w1 = 0.1 * jax.random.normal(k1, (3, 3, in_channels, out_channels), jnp.float32)
    b1 = 0.1 * jax.random.normal(k2, (out_channels,), jnp.float32)
    g1 = jnp.ones((out_channels,), jnp.float32)      # BatchNorm2d default weight
    be1 = jnp.zeros((out_channels,), jnp.float32)    # BatchNorm2d default bias
    w2 = 0.1 * jax.random.normal(k3, (3, 3, out_channels, out_channels), jnp.float32)
    b2 = 0.1 * jax.random.normal(k4, (out_channels,), jnp.float32)
    g2 = jnp.ones((out_channels,), jnp.float32)
    be2 = jnp.zeros((out_channels,), jnp.float32)
    return (w1, b1, g1, be1, w2, b2, g2, be2)


if __name__ == "__main__":
    key = jax.random.PRNGKey(0)
    k_x, k_p = jax.random.split(key)

    N, Cin, Cout, H, W = 2, 4, 8, 16, 16
    x = jax.random.normal(k_x, (N, Cin, H, W), jnp.float32)   # NCHW like PyTorch
    params = init_params(k_p, Cin, Cout)

    out = double_conv(x, params, tile_h=8)   # tile_h=8 -> exercises the H tiling
    jax.block_until_ready(out)
    assert out.shape == (N, Cout, H, W)
    assert bool(jnp.all(jnp.isfinite(out)))
    print("KERNEL_OK")
</pallas_src>

<mosaic_0001>
module attributes {stable_mosaic.version = 11 : i64} {
  func.func @_conv_bn_stats_kernel(%arg0: i32, %arg1: i32, %arg2: memref<1x8x16x128xbf16, #tpu.memory_space<vmem>>, %arg3: memref<1x1x16x128xbf16, #tpu.memory_space<vmem>>, %arg4: memref<1x1x16x128xbf16, #tpu.memory_space<vmem>>, %arg5: memref<1x128xf32, #tpu.memory_space<vmem>>, %arg6: memref<1x128xf32, #tpu.memory_space<vmem>>, %arg7: memref<9x128x128xbf16, #tpu.memory_space<vmem>>, %arg8: memref<1x8x16x128xbf16, #tpu.memory_space<vmem>>, %arg9: memref<1x1x2x128xf32, #tpu.memory_space<vmem>>) attributes {dimension_semantics = [#tpu.dimension_semantics<parallel>, #tpu.dimension_semantics<parallel>], iteration_bounds = array<i64: 2, 2>, scalar_prefetch = 0 : i64, scratch_operands = 0 : i64, tpu.core_type = #tpu.core_type<tc>, window_params = [{transform_indices = @transform_0, window_bounds = array<i64: 1, 8, 16, 128>}, {transform_indices = @transform_1, window_bounds = array<i64: 1, 1, 16, 128>}, {transform_indices = @transform_2, window_bounds = array<i64: 1, 1, 16, 128>}, {pipeline_mode = #tpu.pipeline_mode<synchronous>, transform_indices = @transform_3, window_bounds = array<i64: 1, 128>}, {pipeline_mode = #tpu.pipeline_mode<synchronous>, transform_indices = @transform_4, window_bounds = array<i64: 1, 128>}, {pipeline_mode = #tpu.pipeline_mode<synchronous>, transform_indices = @transform_5, window_bounds = array<i64: 9, 128, 128>}, {transform_indices = @transform_6, window_bounds = array<i64: 1, 8, 16, 128>}, {transform_indices = @transform_7, window_bounds = array<i64: 1, 1, 2, 128>}]} {
    %c0 = arith.constant 0 : index
    %c0_0 = arith.constant 0 : index
    %c0_1 = arith.constant 0 : index
    %c0_2 = arith.constant 0 : index
    %0 = vector.load %arg2[%c0, %c0_0, %c0_1, %c0_2] : memref<1x8x16x128xbf16, #tpu.memory_space<vmem>>, vector<1x8x16x128xbf16>
    %1 = vector.shape_cast %0 : vector<1x8x16x128xbf16> to vector<8x16x128xbf16>
    %c0_3 = arith.constant 0 : index
    %c0_4 = arith.constant 0 : index
    %c0_5 = arith.constant 0 : index
    %c0_6 = arith.constant 0 : index
    %2 = vector.load %arg3[%c0_3, %c0_4, %c0_5, %c0_6] : memref<1x1x16x128xbf16, #tpu.memory_space<vmem>>, vector<1x1x16x128xbf16>
    %3 = vector.shape_cast %2 : vector<1x1x16x128xbf16> to vector<1x16x128xbf16>
    %c0_i32 = arith.constant 0 : i32
    %4 = arith.cmpi sgt, %arg1, %c0_i32 : i32
    %5 = arith.extui %4 : i1 to i32
    %6 = arith.sitofp %5 : i32 to f32
    %7 = arith.truncf %6 : f32 to bf16
    %8 = vector.broadcast %7 : bf16 to vector<1x16x128xbf16>
    %9 = arith.mulf %3, %8 : vector<1x16x128xbf16>
    %c0_7 = arith.constant 0 : index
    %c0_8 = arith.constant 0 : index
    %c0_9 = arith.constant 0 : index
    %c0_10 = arith.constant 0 : index
    %10 = vector.load %arg4[%c0_7, %c0_8, %c0_9, %c0_10] : memref<1x1x16x128xbf16, #tpu.memory_space<vmem>>, vector<1x1x16x128xbf16>
    %11 = vector.shape_cast %10 : vector<1x1x16x128xbf16> to vector<1x16x128xbf16>
    %c1_i32 = arith.constant 1 : i32
    %12 = arith.cmpi slt, %arg1, %c1_i32 : i32
    %13 = arith.extui %12 : i1 to i32
    %14 = arith.sitofp %13 : i32 to f32
    %15 = arith.truncf %14 : f32 to bf16
    %16 = vector.broadcast %15 : bf16 to vector<1x16x128xbf16>
    %17 = arith.mulf %11, %16 : vector<1x16x128xbf16>
    %18 = tpu.concatenate %9, %1, %17 in 0 : vector<1x16x128xbf16>, vector<8x16x128xbf16>, vector<1x16x128xbf16> -> vector<10x16x128xbf16>
    %c0_i32_11 = arith.constant 0 : i32
    %19 = arith.sitofp %c0_i32_11 : i32 to bf16
    %20 = vector.broadcast %19 : bf16 to vector<10x1x128xbf16>
    %21 = tpu.concatenate %20, %18 in 1 : vector<10x1x128xbf16>, vector<10x16x128xbf16> -> vector<10x17x128xbf16>
    %22 = vector.broadcast %19 : bf16 to vector<10x1x128xbf16>
    %23 = tpu.concatenate %21, %22 in 1 : vector<10x17x128xbf16>, vector<10x1x128xbf16> -> vector<10x18x128xbf16>
    %cst = arith.constant 0.000000e+00 : f32
    %24 = vector.broadcast %cst : f32 to vector<128x128xf32>
    %25 = vector.extract_strided_slice %23 {offsets = [0, 0, 0], sizes = [8, 16, 128], strides = [1, 1, 1]} : vector<10x18x128xbf16> to vector<8x16x128xbf16>
    %26 = vector.shape_cast %25 : vector<8x16x128xbf16> to vector<128x128xbf16>
    %c0_12 = arith.constant 0 : index
    %c0_13 = arith.constant 0 : index
    %c0_14 = arith.constant 0 : index
    %27 = vector.load %arg7[%c0_12, %c0_13, %c0_14] : memref<9x128x128xbf16, #tpu.memory_space<vmem>>, vector<1x128x128xbf16>
    %28 = vector.shape_cast %27 : vector<1x128x128xbf16> to vector<128x128xbf16>
    %cst_15 = arith.constant dense<0.000000e+00> : vector<128x128xf32>
    %29 = tpu.matmul %26, %28, %cst_15 {dimension_numbers = #tpu.dot_dimension_numbers<[1], [0], [0], [1], [0, 0, 1, 1], [], []>} : vector<128x128xbf16>, vector<128x128xbf16>, vector<128x128xf32> -> vector<128x128xf32>
    %30 = arith.addf %24, %29 : vector<128x128xf32>
    %31 = vector.extract_strided_slice %23 {offsets = [0, 1, 0], sizes = [8, 16, 128], strides = [1, 1, 1]} : vector<10x18x128xbf16> to vector<8x16x128xbf16>
    %32 = vector.shape_cast %31 : vector<8x16x128xbf16> to vector<128x128xbf16>
    %c1 = arith.constant 1 : index
    %c0_16 = arith.constant 0 : index
    %c0_17 = arith.constant 0 : index
    %33 = vector.load %arg7[%c1, %c0_16, %c0_17] : memref<9x128x128xbf16, #tpu.memory_space<vmem>>, vector<1x128x128xbf16>
    %34 = vector.shape_cast %33 : vector<1x128x128xbf16> to vector<128x128xbf16>
    %cst_18 = arith.constant dense<0.000000e+00> : vector<128x128xf32>
    %35 = tpu.matmul %32, %34, %cst_18 {dimension_numbers = #tpu.dot_dimension_numbers<[1], [0], [0], [1], [0, 0, 1, 1], [], []>} : vector<128x128xbf16>, vector<128x128xbf16>, vector<128x128xf32> -> vector<128x128xf32>
    %36 = arith.addf %30, %35 : vector<128x128xf32>
    %37 = vector.extract_strided_slice %23 {offsets = [0, 2, 0], sizes = [8, 16, 128], strides = [1, 1, 1]} : vector<10x18x128xbf16> to vector<8x16x128xbf16>
    %38 = vector.shape_cast %37 : vector<8x16x128xbf16> to vector<128x128xbf16>
    %c2 = arith.constant 2 : index
    %c0_19 = arith.constant 0 : index
    %c0_20 = arith.constant 0 : index
    %39 = vector.load %arg7[%c2, %c0_19, %c0_20] : memref<9x128x128xbf16, #tpu.memory_space<vmem>>, vector<1x128x128xbf16>
    %40 = vector.shape_cast %39 : vector<1x128x128xbf16> to vector<128x128xbf16>
    %cst_21 = arith.constant dense<0.000000e+00> : vector<128x128xf32>
    %41 = tpu.matmul %38, %40, %cst_21 {dimension_numbers = #tpu.dot_dimension_numbers<[1], [0], [0], [1], [0, 0, 1, 1], [], []>} : vector<128x128xbf16>, vector<128x128xbf16>, vector<128x128xf32> -> vector<128x128xf32>
    %42 = arith.addf %36, %41 : vector<128x128xf32>
    %43 = vector.extract_strided_slice %23 {offsets = [1, 0, 0], sizes = [8, 16, 128], strides = [1, 1, 1]} : vector<10x18x128xbf16> to vector<8x16x128xbf16>
    %44 = vector.shape_cast %43 : vector<8x16x128xbf16> to vector<128x128xbf16>
    %c3 = arith.constant 3 : index
    %c0_22 = arith.constant 0 : index
    %c0_23 = arith.constant 0 : index
    %45 = vector.load %arg7[%c3, %c0_22, %c0_23] : memref<9x128x128xbf16, #tpu.memory_space<vmem>>, vector<1x128x128xbf16>
    %46 = vector.shape_cast %45 : vector<1x128x128xbf16> to vector<128x128xbf16>
    %cst_24 = arith.constant dense<0.000000e+00> : vector<128x128xf32>
    %47 = tpu.matmul %44, %46, %cst_24 {dimension_numbers = #tpu.dot_dimension_numbers<[1], [0], [0], [1], [0, 0, 1, 1], [], []>} : vector<128x128xbf16>, vector<128x128xbf16>, vector<128x128xf32> -> vector<128x128xf32>
    %48 = arith.addf %42, %47 : vector<128x128xf32>
    %49 = vector.extract_strided_slice %23 {offsets = [1, 1, 0], sizes = [8, 16, 128], strides = [1, 1, 1]} : vector<10x18x128xbf16> to vector<8x16x128xbf16>
    %50 = vector.shape_cast %49 : vector<8x16x128xbf16> to vector<128x128xbf16>
    %c4 = arith.constant 4 : index
    %c0_25 = arith.constant 0 : index
    %c0_26 = arith.constant 0 : index
    %51 = vector.load %arg7[%c4, %c0_25, %c0_26] : memref<9x128x128xbf16, #tpu.memory_space<vmem>>, vector<1x128x128xbf16>
    %52 = vector.shape_cast %51 : vector<1x128x128xbf16> to vector<128x128xbf16>
    %cst_27 = arith.constant dense<0.000000e+00> : vector<128x128xf32>
    %53 = tpu.matmul %50, %52, %cst_27 {dimension_numbers = #tpu.dot_dimension_numbers<[1], [0], [0], [1], [0, 0, 1, 1], [], []>} : vector<128x128xbf16>, vector<128x128xbf16>, vector<128x128xf32> -> vector<128x128xf32>
    %54 = arith.addf %48, %53 : vector<128x128xf32>
    %55 = vector.extract_strided_slice %23 {offsets = [1, 2, 0], sizes = [8, 16, 128], strides = [1, 1, 1]} : vector<10x18x128xbf16> to vector<8x16x128xbf16>
    %56 = vector.shape_cast %55 : vector<8x16x128xbf16> to vector<128x128xbf16>
    %c5 = arith.constant 5 : index
    %c0_28 = arith.constant 0 : index
    %c0_29 = arith.constant 0 : index
    %57 = vector.load %arg7[%c5, %c0_28, %c0_29] : memref<9x128x128xbf16, #tpu.memory_space<vmem>>, vector<1x128x128xbf16>
    %58 = vector.shape_cast %57 : vector<1x128x128xbf16> to vector<128x128xbf16>
    %cst_30 = arith.constant dense<0.000000e+00> : vector<128x128xf32>
    %59 = tpu.matmul %56, %58, %cst_30 {dimension_numbers = #tpu.dot_dimension_numbers<[1], [0], [0], [1], [0, 0, 1, 1], [], []>} : vector<128x128xbf16>, vector<128x128xbf16>, vector<128x128xf32> -> vector<128x128xf32>
    %60 = arith.addf %54, %59 : vector<128x128xf32>
    %61 = vector.extract_strided_slice %23 {offsets = [2, 0, 0], sizes = [8, 16, 128], strides = [1, 1, 1]} : vector<10x18x128xbf16> to vector<8x16x128xbf16>
    %62 = vector.shape_cast %61 : vector<8x16x128xbf16> to vector<128x128xbf16>
    %c6 = arith.constant 6 : index
    %c0_31 = arith.constant 0 : index
    %c0_32 = arith.constant 0 : index
    %63 = vector.load %arg7[%c6, %c0_31, %c0_32] : memref<9x128x128xbf16, #tpu.memory_space<vmem>>, vector<1x128x128xbf16>
    %64 = vector.shape_cast %63 : vector<1x128x128xbf16> to vector<128x128xbf16>
    %cst_33 = arith.constant dense<0.000000e+00> : vector<128x128xf32>
    %65 = tpu.matmul %62, %64, %cst_33 {dimension_numbers = #tpu.dot_dimension_numbers<[1], [0], [0], [1], [0, 0, 1, 1], [], []>} : vector<128x128xbf16>, vector<128x128xbf16>, vector<128x128xf32> -> vector<128x128xf32>
    %66 = arith.addf %60, %65 : vector<128x128xf32>
    %67 = vector.extract_strided_slice %23 {offsets = [2, 1, 0], sizes = [8, 16, 128], strides = [1, 1, 1]} : vector<10x18x128xbf16> to vector<8x16x128xbf16>
    %68 = vector.shape_cast %67 : vector<8x16x128xbf16> to vector<128x128xbf16>
    %c7 = arith.constant 7 : index
    %c0_34 = arith.constant 0 : index
    %c0_35 = arith.constant 0 : index
    %69 = vector.load %arg7[%c7, %c0_34, %c0_35] : memref<9x128x128xbf16, #tpu.memory_space<vmem>>, vector<1x128x128xbf16>
    %70 = vector.shape_cast %69 : vector<1x128x128xbf16> to vector<128x128xbf16>
    %cst_36 = arith.constant dense<0.000000e+00> : vector<128x128xf32>
    %71 = tpu.matmul %68, %70, %cst_36 {dimension_numbers = #tpu.dot_dimension_numbers<[1], [0], [0], [1], [0, 0, 1, 1], [], []>} : vector<128x128xbf16>, vector<128x128xbf16>, vector<128x128xf32> -> vector<128x128xf32>
    %72 = arith.addf %66, %71 : vector<128x128xf32>
    %73 = vector.extract_strided_slice %23 {offsets = [2, 2, 0], sizes = [8, 16, 128], strides = [1, 1, 1]} : vector<10x18x128xbf16> to vector<8x16x128xbf16>
    %74 = vector.shape_cast %73 : vector<8x16x128xbf16> to vector<128x128xbf16>
    %c8 = arith.constant 8 : index
    %c0_37 = arith.constant 0 : index
    %c0_38 = arith.constant 0 : index
    %75 = vector.load %arg7[%c8, %c0_37, %c0_38] : memref<9x128x128xbf16, #tpu.memory_space<vmem>>, vector<1x128x128xbf16>
    %76 = vector.shape_cast %75 : vector<1x128x128xbf16> to vector<128x128xbf16>
    %cst_39 = arith.constant dense<0.000000e+00> : vector<128x128xf32>
    %77 = tpu.matmul %74, %76, %cst_39 {dimension_numbers = #tpu.dot_dimension_numbers<[1], [0], [0], [1], [0, 0, 1, 1], [], []>} : vector<128x128xbf16>, vector<128x128xbf16>, vector<128x128xf32> -> vector<128x128xf32>
    %78 = arith.addf %72, %77 : vector<128x128xf32>
    %79 = vector.shape_cast %78 : vector<128x128xf32> to vector<8x16x128xf32>
    %80 = arith.truncf %79 : vector<8x16x128xf32> to vector<8x16x128xbf16>
    %c0_40 = arith.constant 0 : index
    %c0_41 = arith.constant 0 : index
    %c0_42 = arith.constant 0 : index
    %c0_43 = arith.constant 0 : index
    %81 = vector.load %arg8[%c0_40, %c0_41, %c0_42, %c0_43] : memref<1x8x16x128xbf16, #tpu.memory_space<vmem>>, vector<1x8x16x128xbf16>
    %82 = vector.shape_cast %81 : vector<1x8x16x128xbf16> to vector<8x16x128xbf16>
    %83 = vector.shape_cast %80 : vector<8x16x128xbf16> to vector<1x8x16x128xbf16>
    tpu.vector_store %arg8[%c0_40, %c0_41, %c0_42, %c0_43], %83 {strides = array<i32>} : memref<1x8x16x128xbf16, #tpu.memory_space<vmem>>, vector<1x8x16x128xbf16>,
    %cst_44 = arith.constant dense<0.000000e+00> : vector<128xf32>
    %84 = vector.multi_reduction <add>, %78, %cst_44 [0] : vector<128x128xf32> to vector<128xf32>
    %85 = vector.shape_cast %84 : vector<128xf32> to vector<1x128xf32>
    %86 = arith.mulf %78, %78 : vector<128x128xf32>
    %cst_45 = arith.constant dense<0.000000e+00> : vector<128xf32>
    %87 = vector.multi_reduction <add>, %86, %cst_45 [0] : vector<128x128xf32> to vector<128xf32>
    %88 = vector.shape_cast %87 : vector<128xf32> to vector<1x128xf32>
    %89 = tpu.concatenate %85, %88 in 0 : vector<1x128xf32>, vector<1x128xf32> -> vector<2x128xf32>
    %c0_46 = arith.constant 0 : index
    %c0_47 = arith.constant 0 : index
    %c0_48 = arith.constant 0 : index
    %c0_49 = arith.constant 0 : index
    %90 = vector.load %arg9[%c0_46, %c0_47, %c0_48, %c0_49] : memref<1x1x2x128xf32, #tpu.memory_space<vmem>>, vector<1x1x2x128xf32>
    %91 = vector.shape_cast %90 : vector<1x1x2x128xf32> to vector<2x128xf32>
    %92 = vector.shape_cast %89 : vector<2x128xf32> to vector<1x1x2x128xf32>
    tpu.vector_store %arg9[%c0_46, %c0_47, %c0_48, %c0_49], %92 {strides = array<i32>} : memref<1x1x2x128xf32, #tpu.memory_space<vmem>>, vector<1x1x2x128xf32>,
    return
  }
  func.func @transform_0(%arg0: i32, %arg1: i32) -> (i32, i32, i32, i32) {
    %c0_i32 = arith.constant 0 : i32
    %c0_i32_0 = arith.constant 0 : i32
    %c0_i32_1 = arith.constant 0 : i32
    return %arg0, %arg1, %c0_i32, %c0_i32_0 : i32, i32, i32, i32
  }
  func.func @transform_1(%arg0: i32, %arg1: i32) -> (i32, i32, i32, i32) {
    %c8_i32 = arith.constant 8 : i32
    %0 = arith.muli %arg1, %c8_i32 : i32
    %c1_i32 = arith.constant 1 : i32
    %1 = arith.subi %0, %c1_i32 : i32
    %c0_i32 = arith.constant 0 : i32
    %2 = arith.maxsi %1, %c0_i32 : i32
    %c0_i32_0 = arith.constant 0 : i32
    %c0_i32_1 = arith.constant 0 : i32
    %c0_i32_2 = arith.constant 0 : i32
    return %arg0, %2, %c0_i32_0, %c0_i32_1 : i32, i32, i32, i32
  }
  func.func @transform_2(%arg0: i32, %arg1: i32) -> (i32, i32, i32, i32) {
    %c1_i32 = arith.constant 1 : i32
    %0 = arith.addi %arg1, %c1_i32 : i32
    %c8_i32 = arith.constant 8 : i32
    %1 = arith.muli %0, %c8_i32 : i32
    %c15_i32 = arith.constant 15 : i32
    %2 = arith.minsi %1, %c15_i32 : i32
    %c0_i32 = arith.constant 0 : i32
    %c0_i32_0 = arith.constant 0 : i32
    %c0_i32_1 = arith.constant 0 : i32
    return %arg0, %2, %c0_i32, %c0_i32_0 : i32, i32, i32, i32
  }
  func.func @transform_3(%arg0: i32, %arg1: i32) -> (i32, i32) {
    %c0_i32 = arith.constant 0 : i32
    %c0_i32_0 = arith.constant 0 : i32
    %c0_i32_1 = arith.constant 0 : i32
    return %c0_i32, %c0_i32_0 : i32, i32
  }
  func.func @transform_4(%arg0: i32, %arg1: i32) -> (i32, i32) {
    %c0_i32 = arith.constant 0 : i32
    %c0_i32_0 = arith.constant 0 : i32
    %c0_i32_1 = arith.constant 0 : i32
    return %c0_i32, %c0_i32_0 : i32, i32
  }
  func.func @transform_5(%arg0: i32, %arg1: i32) -> (i32, i32, i32) {
    %c0_i32 = arith.constant 0 : i32
    %c0_i32_0 = arith.constant 0 : i32
    %c0_i32_1 = arith.constant 0 : i32
    %c0_i32_2 = arith.constant 0 : i32
    return %c0_i32, %c0_i32_0, %c0_i32_1 : i32, i32, i32
  }
  func.func @transform_6(%arg0: i32, %arg1: i32) -> (i32, i32, i32, i32) {
    %c0_i32 = arith.constant 0 : i32
    %c0_i32_0 = arith.constant 0 : i32
    %c0_i32_1 = arith.constant 0 : i32
    return %arg0, %arg1, %c0_i32, %c0_i32_0 : i32, i32, i32, i32
  }
  func.func @transform_7(%arg0: i32, %arg1: i32) -> (i32, i32, i32, i32) {
    %c0_i32 = arith.constant 0 : i32
    %c0_i32_0 = arith.constant 0 : i32
    %c0_i32_1 = arith.constant 0 : i32
    return %arg0, %arg1, %c0_i32, %c0_i32_0 : i32, i32, i32, i32
  }
}

module attributes {stable_mosaic.version = 11 : i64} {
  func.func @_bn_relu_kernel(%arg0: i32, %arg1: i32, %arg2: memref<1x8x16x128xbf16, #tpu.memory_space<vmem>>, %arg3: memref<1x128xf32, #tpu.memory_space<vmem>>, %arg4: memref<1x128xf32, #tpu.memory_space<vmem>>, %arg5: memref<1x8x16x128xf32, #tpu.memory_space<vmem>>) attributes {dimension_semantics = [#tpu.dimension_semantics<parallel>, #tpu.dimension_semantics<parallel>], iteration_bounds = array<i64: 2, 2>, scalar_prefetch = 0 : i64, scratch_operands = 0 : i64, tpu.core_type = #tpu.core_type<tc>, window_params = [{transform_indices = @transform_0, window_bounds = array<i64: 1, 8, 16, 128>}, {pipeline_mode = #tpu.pipeline_mode<synchronous>, transform_indices = @transform_1, window_bounds = array<i64: 1, 128>}, {pipeline_mode = #tpu.pipeline_mode<synchronous>, transform_indices = @transform_2, window_bounds = array<i64: 1, 128>}, {transform_indices = @transform_3, window_bounds = array<i64: 1, 8, 16, 128>}]} {
    %c0 = arith.constant 0 : index
    %c0_0 = arith.constant 0 : index
    %c0_1 = arith.constant 0 : index
    %c0_2 = arith.constant 0 : index
    %0 = vector.load %arg2[%c0, %c0_0, %c0_1, %c0_2] : memref<1x8x16x128xbf16, #tpu.memory_space<vmem>>, vector<1x8x16x128xbf16>
    %1 = vector.shape_cast %0 : vector<1x8x16x128xbf16> to vector<8x16x128xbf16>
    %2 = arith.extf %1 : vector<8x16x128xbf16> to vector<8x16x128xf32>
    %c0_3 = arith.constant 0 : index
    %c0_4 = arith.constant 0 : index
    %3 = vector.load %arg3[%c0_3, %c0_4] : memref<1x128xf32, #tpu.memory_space<vmem>>, vector<1x128xf32>
    %4 = vector.shape_cast %3 : vector<1x128xf32> to vector<1x1x128xf32>
    %5 = vector.broadcast %4 : vector<1x1x128xf32> to vector<8x16x128xf32>
    %6 = arith.mulf %2, %5 : vector<8x16x128xf32>
    %c0_5 = arith.constant 0 : index
    %c0_6 = arith.constant 0 : index
    %7 = vector.load %arg4[%c0_5, %c0_6] : memref<1x128xf32, #tpu.memory_space<vmem>>, vector<1x128xf32>
    %8 = vector.shape_cast %7 : vector<1x128xf32> to vector<1x1x128xf32>
    %9 = vector.broadcast %8 : vector<1x1x128xf32> to vector<8x16x128xf32>
    %10 = arith.addf %6, %9 : vector<8x16x128xf32>
    %cst = arith.constant 0.000000e+00 : f32
    %11 = vector.broadcast %cst : f32 to vector<8x16x128xf32>
    %12 = arith.maximumf %10, %11 : vector<8x16x128xf32>
    %c0_7 = arith.constant 0 : index
    %c0_8 = arith.constant 0 : index
    %c0_9 = arith.constant 0 : index
    %c0_10 = arith.constant 0 : index
    %13 = vector.load %arg5[%c0_7, %c0_8, %c0_9, %c0_10] : memref<1x8x16x128xf32, #tpu.memory_space<vmem>>, vector<1x8x16x128xf32>
    %14 = vector.shape_cast %13 : vector<1x8x16x128xf32> to vector<8x16x128xf32>
    %15 = vector.shape_cast %12 : vector<8x16x128xf32> to vector<1x8x16x128xf32>
    tpu.vector_store %arg5[%c0_7, %c0_8, %c0_9, %c0_10], %15 {strides = array<i32>} : memref<1x8x16x128xf32, #tpu.memory_space<vmem>>, vector<1x8x16x128xf32>,
    return
  }
  func.func @transform_0(%arg0: i32, %arg1: i32) -> (i32, i32, i32, i32) {
    %c0_i32 = arith.constant 0 : i32
    %c0_i32_0 = arith.constant 0 : i32
    %c0_i32_1 = arith.constant 0 : i32
    return %arg0, %arg1, %c0_i32, %c0_i32_0 : i32, i32, i32, i32
  }
  func.func @transform_1(%arg0: i32, %arg1: i32) -> (i32, i32) {
    %c0_i32 = arith.constant 0 : i32
    %c0_i32_0 = arith.constant 0 : i32
    %c0_i32_1 = arith.constant 0 : i32
    return %c0_i32, %c0_i32_0 : i32, i32
  }
  func.func @transform_2(%arg0: i32, %arg1: i32) -> (i32, i32) {
    %c0_i32 = arith.constant 0 : i32
    %c0_i32_0 = arith.constant 0 : i32
    %c0_i32_1 = arith.constant 0 : i32
    return %c0_i32, %c0_i32_0 : i32, i32
  }
  func.func @transform_3(%arg0: i32, %arg1: i32) -> (i32, i32, i32, i32) {
    %c0_i32 = arith.constant 0 : i32
    %c0_i32_0 = arith.constant 0 : i32
    %c0_i32_1 = arith.constant 0 : i32
    return %arg0, %arg1, %c0_i32, %c0_i32_0 : i32, i32, i32, i32
  }
}

module attributes {stable_mosaic.version = 11 : i64} {
  func.func @_conv_bn_stats_kernel(%arg0: i32, %arg1: i32, %arg2: memref<1x8x16x128xbf16, #tpu.memory_space<vmem>>, %arg3: memref<1x1x16x128xbf16, #tpu.memory_space<vmem>>, %arg4: memref<1x1x16x128xbf16, #tpu.memory_space<vmem>>, %arg5: memref<1x128xf32, #tpu.memory_space<vmem>>, %arg6: memref<1x128xf32, #tpu.memory_space<vmem>>, %arg7: memref<9x128x128xbf16, #tpu.memory_space<vmem>>, %arg8: memref<1x8x16x128xbf16, #tpu.memory_space<vmem>>, %arg9: memref<1x1x2x128xf32, #tpu.memory_space<vmem>>) attributes {dimension_semantics = [#tpu.dimension_semantics<parallel>, #tpu.dimension_semantics<parallel>], iteration_bounds = array<i64: 2, 2>, scalar_prefetch = 0 : i64, scratch_operands = 0 : i64, tpu.core_type = #tpu.core_type<tc>, window_params = [{transform_indices = @transform_0, window_bounds = array<i64: 1, 8, 16, 128>}, {transform_indices = @transform_1, window_bounds = array<i64: 1, 1, 16, 128>}, {transform_indices = @transform_2, window_bounds = array<i64: 1, 1, 16, 128>}, {pipeline_mode = #tpu.pipeline_mode<synchronous>, transform_indices = @transform_3, window_bounds = array<i64: 1, 128>}, {pipeline_mode = #tpu.pipeline_mode<synchronous>, transform_indices = @transform_4, window_bounds = array<i64: 1, 128>}, {pipeline_mode = #tpu.pipeline_mode<synchronous>, transform_indices = @transform_5, window_bounds = array<i64: 9, 128, 128>}, {transform_indices = @transform_6, window_bounds = array<i64: 1, 8, 16, 128>}, {transform_indices = @transform_7, window_bounds = array<i64: 1, 1, 2, 128>}]} {
    %c0 = arith.constant 0 : index
    %c0_0 = arith.constant 0 : index
    %0 = vector.load %arg5[%c0, %c0_0] : memref<1x128xf32, #tpu.memory_space<vmem>>, vector<1x128xf32>
    %c0_1 = arith.constant 0 : index
    %c0_2 = arith.constant 0 : index
    %1 = vector.load %arg6[%c0_1, %c0_2] : memref<1x128xf32, #tpu.memory_space<vmem>>, vector<1x128xf32>
    %c0_3 = arith.constant 0 : index
    %c0_4 = arith.constant 0 : index
    %c0_5 = arith.constant 0 : index
    %c0_6 = arith.constant 0 : index
    %2 = vector.load %arg2[%c0_3, %c0_4, %c0_5, %c0_6] : memref<1x8x16x128xbf16, #tpu.memory_space<vmem>>, vector<1x8x16x128xbf16>
    %3 = vector.shape_cast %2 : vector<1x8x16x128xbf16> to vector<8x16x128xbf16>
    %4 = arith.extf %3 : vector<8x16x128xbf16> to vector<8x16x128xf32>
    %5 = vector.shape_cast %0 : vector<1x128xf32> to vector<1x1x128xf32>
    %6 = vector.broadcast %5 : vector<1x1x128xf32> to vector<8x16x128xf32>
    %7 = arith.mulf %4, %6 : vector<8x16x128xf32>
    %8 = vector.shape_cast %1 : vector<1x128xf32> to vector<1x1x128xf32>
    %9 = vector.broadcast %8 : vector<1x1x128xf32> to vector<8x16x128xf32>
    %10 = arith.addf %7, %9 : vector<8x16x128xf32>
    %cst = arith.constant 0.000000e+00 : f32
    %11 = vector.broadcast %cst : f32 to vector<8x16x128xf32>
    %12 = arith.maximumf %10, %11 : vector<8x16x128xf32>
    %13 = arith.truncf %12 : vector<8x16x128xf32> to vector<8x16x128xbf16>
    %c0_7 = arith.constant 0 : index
    %c0_8 = arith.constant 0 : index
    %c0_9 = arith.constant 0 : index
    %c0_10 = arith.constant 0 : index
    %14 = vector.load %arg3[%c0_7, %c0_8, %c0_9, %c0_10] : memref<1x1x16x128xbf16, #tpu.memory_space<vmem>>, vector<1x1x16x128xbf16>
    %15 = vector.shape_cast %14 : vector<1x1x16x128xbf16> to vector<1x16x128xbf16>
    %16 = arith.extf %15 : vector<1x16x128xbf16> to vector<1x16x128xf32>
    %17 = vector.shape_cast %0 : vector<1x128xf32> to vector<1x1x128xf32>
    %18 = vector.broadcast %17 : vector<1x1x128xf32> to vector<1x16x128xf32>
    %19 = arith.mulf %16, %18 : vector<1x16x128xf32>
    %20 = vector.shape_cast %1 : vector<1x128xf32> to vector<1x1x128xf32>
    %21 = vector.broadcast %20 : vector<1x1x128xf32> to vector<1x16x128xf32>
    %22 = arith.addf %19, %21 : vector<1x16x128xf32>
    %cst_11 = arith.constant 0.000000e+00 : f32
    %23 = vector.broadcast %cst_11 : f32 to vector<1x16x128xf32>
    %24 = arith.maximumf %22, %23 : vector<1x16x128xf32>
    %25 = arith.truncf %24 : vector<1x16x128xf32> to vector<1x16x128xbf16>
    %c0_i32 = arith.constant 0 : i32
    %26 = arith.cmpi sgt, %arg1, %c0_i32 : i32
    %27 = arith.extui %26 : i1 to i32
    %28 = arith.sitofp %27 : i32 to f32
    %29 = arith.truncf %28 : f32 to bf16
    %30 = vector.broadcast %29 : bf16 to vector<1x16x128xbf16>
    %31 = arith.mulf %25, %30 : vector<1x16x128xbf16>
    %c0_12 = arith.constant 0 : index
    %c0_13 = arith.constant 0 : index
    %c0_14 = arith.constant 0 : index
    %c0_15 = arith.constant 0 : index
    %32 = vector.load %arg4[%c0_12, %c0_13, %c0_14, %c0_15] : memref<1x1x16x128xbf16, #tpu.memory_space<vmem>>, vector<1x1x16x128xbf16>
    %33 = vector.shape_cast %32 : vector<1x1x16x128xbf16> to vector<1x16x128xbf16>
    %34 = arith.extf %33 : vector<1x16x128xbf16> to vector<1x16x128xf32>
    %35 = vector.shape_cast %0 : vector<1x128xf32> to vector<1x1x128xf32>
    %36 = vector.broadcast %35 : vector<1x1x128xf32> to vector<1x16x128xf32>
    %37 = arith.mulf %34, %36 : vector<1x16x128xf32>
    %38 = vector.shape_cast %1 : vector<1x128xf32> to vector<1x1x128xf32>
    %39 = vector.broadcast %38 : vector<1x1x128xf32> to vector<1x16x128xf32>
    %40 = arith.addf %37, %39 : vector<1x16x128xf32>
    %cst_16 = arith.constant 0.000000e+00 : f32
    %41 = vector.broadcast %cst_16 : f32 to vector<1x16x128xf32>
    %42 = arith.maximumf %40, %41 : vector<1x16x128xf32>
    %43 = arith.truncf %42 : vector<1x16x128xf32> to vector<1x16x128xbf16>
    %c1_i32 = arith.constant 1 : i32
    %44 = arith.cmpi slt, %arg1, %c1_i32 : i32
    %45 = arith.extui %44 : i1 to i32
    %46 = arith.sitofp %45 : i32 to f32
    %47 = arith.truncf %46 : f32 to bf16
    %48 = vector.broadcast %47 : bf16 to vector<1x16x128xbf16>
    %49 = arith.mulf %43, %48 : vector<1x16x128xbf16>
    %50 = tpu.concatenate %31, %13, %49 in 0 : vector<1x16x128xbf16>, vector<8x16x128xbf16>, vector<1x16x128xbf16> -> vector<10x16x128xbf16>
    %c0_i32_17 = arith.constant 0 : i32
    %51 = arith.sitofp %c0_i32_17 : i32 to bf16
    %52 = vector.broadcast %51 : bf16 to vector<10x1x128xbf16>
    %53 = tpu.concatenate %52, %50 in 1 : vector<10x1x128xbf16>, vector<10x16x128xbf16> -> vector<10x17x128xbf16>
    %54 = vector.broadcast %51 : bf16 to vector<10x1x128xbf16>
    %55 = tpu.concatenate %53, %54 in 1 : vector<10x17x128xbf16>, vector<10x1x128xbf16> -> vector<10x18x128xbf16>
    %cst_18 = arith.constant 0.000000e+00 : f32
    %56 = vector.broadcast %cst_18 : f32 to vector<128x128xf32>
    %57 = vector.extract_strided_slice %55 {offsets = [0, 0, 0], sizes = [8, 16, 128], strides = [1, 1, 1]} : vector<10x18x128xbf16> to vector<8x16x128xbf16>
    %58 = vector.shape_cast %57 : vector<8x16x128xbf16> to vector<128x128xbf16>
    %c0_19 = arith.constant 0 : index
    %c0_20 = arith.constant 0 : index
    %c0_21 = arith.constant 0 : index
    %59 = vector.load %arg7[%c0_19, %c0_20, %c0_21] : memref<9x128x128xbf16, #tpu.memory_space<vmem>>, vector<1x128x128xbf16>
    %60 = vector.shape_cast %59 : vector<1x128x128xbf16> to vector<128x128xbf16>
    %cst_22 = arith.constant dense<0.000000e+00> : vector<128x128xf32>
    %61 = tpu.matmul %58, %60, %cst_22 {dimension_numbers = #tpu.dot_dimension_numbers<[1], [0], [0], [1], [0, 0, 1, 1], [], []>} : vector<128x128xbf16>, vector<128x128xbf16>, vector<128x128xf32> -> vector<128x128xf32>
    %62 = arith.addf %56, %61 : vector<128x128xf32>
    %63 = vector.extract_strided_slice %55 {offsets = [0, 1, 0], sizes = [8, 16, 128], strides = [1, 1, 1]} : vector<10x18x128xbf16> to vector<8x16x128xbf16>
    %64 = vector.shape_cast %63 : vector<8x16x128xbf16> to vector<128x128xbf16>
    %c1 = arith.constant 1 : index
    %c0_23 = arith.constant 0 : index
    %c0_24 = arith.constant 0 : index
    %65 = vector.load %arg7[%c1, %c0_23, %c0_24] : memref<9x128x128xbf16, #tpu.memory_space<vmem>>, vector<1x128x128xbf16>
    %66 = vector.shape_cast %65 : vector<1x128x128xbf16> to vector<128x128xbf16>
    %cst_25 = arith.constant dense<0.000000e+00> : vector<128x128xf32>
    %67 = tpu.matmul %64, %66, %cst_25 {dimension_numbers = #tpu.dot_dimension_numbers<[1], [0], [0], [1], [0, 0, 1, 1], [], []>} : vector<128x128xbf16>, vector<128x128xbf16>, vector<128x128xf32> -> vector<128x128xf32>
    %68 = arith.addf %62, %67 : vector<128x128xf32>
    %69 = vector.extract_strided_slice %55 {offsets = [0, 2, 0], sizes = [8, 16, 128], strides = [1, 1, 1]} : vector<10x18x128xbf16> to vector<8x16x128xbf16>
    %70 = vector.shape_cast %69 : vector<8x16x128xbf16> to vector<128x128xbf16>
    %c2 = arith.constant 2 : index
    %c0_26 = arith.constant 0 : index
    %c0_27 = arith.constant 0 : index
    %71 = vector.load %arg7[%c2, %c0_26, %c0_27] : memref<9x128x128xbf16, #tpu.memory_space<vmem>>, vector<1x128x128xbf16>
    %72 = vector.shape_cast %71 : vector<1x128x128xbf16> to vector<128x128xbf16>
    %cst_28 = arith.constant dense<0.000000e+00> : vector<128x128xf32>
    %73 = tpu.matmul %70, %72, %cst_28 {dimension_numbers = #tpu.dot_dimension_numbers<[1], [0], [0], [1], [0, 0, 1, 1], [], []>} : vector<128x128xbf16>, vector<128x128xbf16>, vector<128x128xf32> -> vector<128x128xf32>
    %74 = arith.addf %68, %73 : vector<128x128xf32>
    %75 = vector.extract_strided_slice %55 {offsets = [1, 0, 0], sizes = [8, 16, 128], strides = [1, 1, 1]} : vector<10x18x128xbf16> to vector<8x16x128xbf16>
    %76 = vector.shape_cast %75 : vector<8x16x128xbf16> to vector<128x128xbf16>
    %c3 = arith.constant 3 : index
    %c0_29 = arith.constant 0 : index
    %c0_30 = arith.constant 0 : index
    %77 = vector.load %arg7[%c3, %c0_29, %c0_30] : memref<9x128x128xbf16, #tpu.memory_space<vmem>>, vector<1x128x128xbf16>
    %78 = vector.shape_cast %77 : vector<1x128x128xbf16> to vector<128x128xbf16>
    %cst_31 = arith.constant dense<0.000000e+00> : vector<128x128xf32>
    %79 = tpu.matmul %76, %78, %cst_31 {dimension_numbers = #tpu.dot_dimension_numbers<[1], [0], [0], [1], [0, 0, 1, 1], [], []>} : vector<128x128xbf16>, vector<128x128xbf16>, vector<128x128xf32> -> vector<128x128xf32>
    %80 = arith.addf %74, %79 : vector<128x128xf32>
    %81 = vector.extract_strided_slice %55 {offsets = [1, 1, 0], sizes = [8, 16, 128], strides = [1, 1, 1]} : vector<10x18x128xbf16> to vector<8x16x128xbf16>
    %82 = vector.shape_cast %81 : vector<8x16x128xbf16> to vector<128x128xbf16>
    %c4 = arith.constant 4 : index
    %c0_32 = arith.constant 0 : index
    %c0_33 = arith.constant 0 : index
    %83 = vector.load %arg7[%c4, %c0_32, %c0_33] : memref<9x128x128xbf16, #tpu.memory_space<vmem>>, vector<1x128x128xbf16>
    %84 = vector.shape_cast %83 : vector<1x128x128xbf16> to vector<128x128xbf16>
    %cst_34 = arith.constant dense<0.000000e+00> : vector<128x128xf32>
    %85 = tpu.matmul %82, %84, %cst_34 {dimension_numbers = #tpu.dot_dimension_numbers<[1], [0], [0], [1], [0, 0, 1, 1], [], []>} : vector<128x128xbf16>, vector<128x128xbf16>, vector<128x128xf32> -> vector<128x128xf32>
    %86 = arith.addf %80, %85 : vector<128x128xf32>
    %87 = vector.extract_strided_slice %55 {offsets = [1, 2, 0], sizes = [8, 16, 128], strides = [1, 1, 1]} : vector<10x18x128xbf16> to vector<8x16x128xbf16>
    %88 = vector.shape_cast %87 : vector<8x16x128xbf16> to vector<128x128xbf16>
    %c5 = arith.constant 5 : index
    %c0_35 = arith.constant 0 : index
    %c0_36 = arith.constant 0 : index
    %89 = vector.load %arg7[%c5, %c0_35, %c0_36] : memref<9x128x128xbf16, #tpu.memory_space<vmem>>, vector<1x128x128xbf16>
    %90 = vector.shape_cast %89 : vector<1x128x128xbf16> to vector<128x128xbf16>
    %cst_37 = arith.constant dense<0.000000e+00> : vector<128x128xf32>
    %91 = tpu.matmul %88, %90, %cst_37 {dimension_numbers = #tpu.dot_dimension_numbers<[1], [0], [0], [1], [0, 0, 1, 1], [], []>} : vector<128x128xbf16>, vector<128x128xbf16>, vector<128x128xf32> -> vector<128x128xf32>
    %92 = arith.addf %86, %91 : vector<128x128xf32>
    %93 = vector.extract_strided_slice %55 {offsets = [2, 0, 0], sizes = [8, 16, 128], strides = [1, 1, 1]} : vector<10x18x128xbf16> to vector<8x16x128xbf16>
    %94 = vector.shape_cast %93 : vector<8x16x128xbf16> to vector<128x128xbf16>
    %c6 = arith.constant 6 : index
    %c0_38 = arith.constant 0 : index
    %c0_39 = arith.constant 0 : index
    %95 = vector.load %arg7[%c6, %c0_38, %c0_39] : memref<9x128x128xbf16, #tpu.memory_space<vmem>>, vector<1x128x128xbf16>
    %96 = vector.shape_cast %95 : vector<1x128x128xbf16> to vector<128x128xbf16>
    %cst_40 = arith.constant dense<0.000000e+00> : vector<128x128xf32>
    %97 = tpu.matmul %94, %96, %cst_40 {dimension_numbers = #tpu.dot_dimension_numbers<[1], [0], [0], [1], [0, 0, 1, 1], [], []>} : vector<128x128xbf16>, vector<128x128xbf16>, vector<128x128xf32> -> vector<128x128xf32>
    %98 = arith.addf %92, %97 : vector<128x128xf32>
    %99 = vector.extract_strided_slice %55 {offsets = [2, 1, 0], sizes = [8, 16, 128], strides = [1, 1, 1]} : vector<10x18x128xbf16> to vector<8x16x128xbf16>
    %100 = vector.shape_cast %99 : vector<8x16x128xbf16> to vector<128x128xbf16>
    %c7 = arith.constant 7 : index
    %c0_41 = arith.constant 0 : index
    %c0_42 = arith.constant 0 : index
    %101 = vector.load %arg7[%c7, %c0_41, %c0_42] : memref<9x128x128xbf16, #tpu.memory_space<vmem>>, vector<1x128x128xbf16>
    %102 = vector.shape_cast %101 : vector<1x128x128xbf16> to vector<128x128xbf16>
    %cst_43 = arith.constant dense<0.000000e+00> : vector<128x128xf32>
    %103 = tpu.matmul %100, %102, %cst_43 {dimension_numbers = #tpu.dot_dimension_numbers<[1], [0], [0], [1], [0, 0, 1, 1], [], []>} : vector<128x128xbf16>, vector<128x128xbf16>, vector<128x128xf32> -> vector<128x128xf32>
    %104 = arith.addf %98, %103 : vector<128x128xf32>
    %105 = vector.extract_strided_slice %55 {offsets = [2, 2, 0], sizes = [8, 16, 128], strides = [1, 1, 1]} : vector<10x18x128xbf16> to vector<8x16x128xbf16>
    %106 = vector.shape_cast %105 : vector<8x16x128xbf16> to vector<128x128xbf16>
    %c8 = arith.constant 8 : index
    %c0_44 = arith.constant 0 : index
    %c0_45 = arith.constant 0 : index
    %107 = vector.load %arg7[%c8, %c0_44, %c0_45] : memref<9x128x128xbf16, #tpu.memory_space<vmem>>, vector<1x128x128xbf16>
    %108 = vector.shape_cast %107 : vector<1x128x128xbf16> to vector<128x128xbf16>
    %cst_46 = arith.constant dense<0.000000e+00> : vector<128x128xf32>
    %109 = tpu.matmul %106, %108, %cst_46 {dimension_numbers = #tpu.dot_dimension_numbers<[1], [0], [0], [1], [0, 0, 1, 1], [], []>} : vector<128x128xbf16>, vector<128x128xbf16>, vector<128x128xf32> -> vector<128x128xf32>
    %110 = arith.addf %104, %109 : vector<128x128xf32>
    %111 = vector.shape_cast %110 : vector<128x128xf32> to vector<8x16x128xf32>
    %112 = arith.truncf %111 : vector<8x16x128xf32> to vector<8x16x128xbf16>
    %c0_47 = arith.constant 0 : index
    %c0_48 = arith.constant 0 : index
    %c0_49 = arith.constant 0 : index
    %c0_50 = arith.constant 0 : index
    %113 = vector.load %arg8[%c0_47, %c0_48, %c0_49, %c0_50] : memref<1x8x16x128xbf16, #tpu.memory_space<vmem>>, vector<1x8x16x128xbf16>
    %114 = vector.shape_cast %113 : vector<1x8x16x128xbf16> to vector<8x16x128xbf16>
    %115 = vector.shape_cast %112 : vector<8x16x128xbf16> to vector<1x8x16x128xbf16>
    tpu.vector_store %arg8[%c0_47, %c0_48, %c0_49, %c0_50], %115 {strides = array<i32>} : memref<1x8x16x128xbf16, #tpu.memory_space<vmem>>, vector<1x8x16x128xbf16>,
    %cst_51 = arith.constant dense<0.000000e+00> : vector<128xf32>
    %116 = vector.multi_reduction <add>, %110, %cst_51 [0] : vector<128x128xf32> to vector<128xf32>
    %117 = vector.shape_cast %116 : vector<128xf32> to vector<1x128xf32>
    %118 = arith.mulf %110, %110 : vector<128x128xf32>
    %cst_52 = arith.constant dense<0.000000e+00> : vector<128xf32>
    %119 = vector.multi_reduction <add>, %118, %cst_52 [0] : vector<128x128xf32> to vector<128xf32>
    %120 = vector.shape_cast %119 : vector<128xf32> to vector<1x128xf32>
    %121 = tpu.concatenate %117, %120 in 0 : vector<1x128xf32>, vector<1x128xf32> -> vector<2x128xf32>
    %c0_53 = arith.constant 0 : index
    %c0_54 = arith.constant 0 : index
    %c0_55 = arith.constant 0 : index
    %c0_56 = arith.constant 0 : index
    %122 = vector.load %arg9[%c0_53, %c0_54, %c0_55, %c0_56] : memref<1x1x2x128xf32, #tpu.memory_space<vmem>>, vector<1x1x2x128xf32>
    %123 = vector.shape_cast %122 : vector<1x1x2x128xf32> to vector<2x128xf32>
    %124 = vector.shape_cast %121 : vector<2x128xf32> to vector<1x1x2x128xf32>
    tpu.vector_store %arg9[%c0_53, %c0_54, %c0_55, %c0_56], %124 {strides = array<i32>} : memref<1x1x2x128xf32, #tpu.memory_space<vmem>>, vector<1x1x2x128xf32>,
    return
  }
  func.func @transform_0(%arg0: i32, %arg1: i32) -> (i32, i32, i32, i32) {
    %c0_i32 = arith.constant 0 : i32
    %c0_i32_0 = arith.constant 0 : i32
    %c0_i32_1 = arith.constant 0 : i32
    return %arg0, %arg1, %c0_i32, %c0_i32_0 : i32, i32, i32, i32
  }
  func.func @transform_1(%arg0: i32, %arg1: i32) -> (i32, i32, i32, i32) {
    %c8_i32 = arith.constant 8 : i32
    %0 = arith.muli %arg1, %c8_i32 : i32
    %c1_i32 = arith.constant 1 : i32
    %1 = arith.subi %0, %c1_i32 : i32
    %c0_i32 = arith.constant 0 : i32
    %2 = arith.maxsi %1, %c0_i32 : i32
    %c0_i32_0 = arith.constant 0 : i32
    %c0_i32_1 = arith.constant 0 : i32
    %c0_i32_2 = arith.constant 0 : i32
    return %arg0, %2, %c0_i32_0, %c0_i32_1 : i32, i32, i32, i32
  }
  func.func @transform_2(%arg0: i32, %arg1: i32) -> (i32, i32, i32, i32) {
    %c1_i32 = arith.constant 1 : i32
    %0 = arith.addi %arg1, %c1_i32 : i32
    %c8_i32 = arith.constant 8 : i32
    %1 = arith.muli %0, %c8_i32 : i32
    %c15_i32 = arith.constant 15 : i32
    %2 = arith.minsi %1, %c15_i32 : i32
    %c0_i32 = arith.constant 0 : i32
    %c0_i32_0 = arith.constant 0 : i32
    %c0_i32_1 = arith.constant 0 : i32
    return %arg0, %2, %c0_i32, %c0_i32_0 : i32, i32, i32, i32
  }
  func.func @transform_3(%arg0: i32, %arg1: i32) -> (i32, i32) {
    %c0_i32 = arith.constant 0 : i32
    %c0_i32_0 = arith.constant 0 : i32
    %c0_i32_1 = arith.constant 0 : i32
    return %c0_i32, %c0_i32_0 : i32, i32
  }
  func.func @transform_4(%arg0: i32, %arg1: i32) -> (i32, i32) {
    %c0_i32 = arith.constant 0 : i32
    %c0_i32_0 = arith.constant 0 : i32
    %c0_i32_1 = arith.constant 0 : i32
    return %c0_i32, %c0_i32_0 : i32, i32
  }
  func.func @transform_5(%arg0: i32, %arg1: i32) -> (i32, i32, i32) {
    %c0_i32 = arith.constant 0 : i32
    %c0_i32_0 = arith.constant 0 : i32
    %c0_i32_1 = arith.constant 0 : i32
    %c0_i32_2 = arith.constant 0 : i32
    return %c0_i32, %c0_i32_0, %c0_i32_1 : i32, i32, i32
  }
  func.func @transform_6(%arg0: i32, %arg1: i32) -> (i32, i32, i32, i32) {
    %c0_i32 = arith.constant 0 : i32
    %c0_i32_0 = arith.constant 0 : i32
    %c0_i32_1 = arith.constant 0 : i32
    return %arg0, %arg1, %c0_i32, %c0_i32_0 : i32, i32, i32, i32
  }
  func.func @transform_7(%arg0: i32, %arg1: i32) -> (i32, i32, i32, i32) {
    %c0_i32 = arith.constant 0 : i32
    %c0_i32_0 = arith.constant 0 : i32
    %c0_i32_1 = arith.constant 0 : i32
    return %arg0, %arg1, %c0_i32, %c0_i32_0 : i32, i32, i32, i32
  }
}

</mosaic_0001>

<bundles_post_ra>
// kernel: double_conv.5
= control target key start
LH: loop header
LB: loop body
LE: loop exit
PB: predicated region body
PF: predicated region fallthrough
CT: control target
= control target key end

     0   :  { %s580_s12 = smov 0   ;;  %s582_s13 = smov 0   ;;  %s705_s0 = inlined_call_operand.vmem [shape: bf16[2,16,16,128], index: 0, kind: input, shape index: {}]   ;;  %s706_s1 = inlined_call_operand.vmem [shape: f32[1,128], index: 1, kind: input, shape index: {}]   ;;  %s707_s2 = inlined_call_operand.vmem [shape: f32[1,128], index: 2, kind: input, shape index: {}]   ;;  %s708_s3 = inlined_call_operand.vmem [shape: f32[2,16,16,128], index: 3, kind: output, shape index: {}]  }
   0x1   :  { %s584_s14 = smov 0   ;;  %s586_s15 = smov 0  }
   0x2   :  { %s588_s16 = smov 0  }
   0x3 LB: > { %s22_s17 = sadd.s32 1, %s550_s14  ;;  %s25_s18 = sadd.s32 1, %s554_s15  ;;  %s558_s16 = sphi %s588_s16, %s13_s16   ;;  %s554_s15 = sphi %s586_s15, %s712_s15   ;;  %s550_s14 = sphi %s584_s14, %s711_s14   ;;  %s546_s13 = sphi %s582_s13, %s710_s13   ;;  %s542_s12 = sphi %s580_s12, %s709_s12  }
   0x4   : > { %p23_p0 = scmp.ge.s32.totalorder %s22_s17, 2  ;;  %p428_p1 = scmp.ge.s32.totalorder %s558_s16, 1 }
   0x5   : > { %p159_p2 = scmp.lt.s32.totalorder %s558_s16, 5 }
   0x6   : > { %s714_s17 = smov (%p23_p0, %s22_s17), 0  ;;  %s716_s18 = smov (!%p23_p0, %s25_s18), %s554_s15 }
   0x7   : > { %p160_p3 = pnand %p428_p1, %p159_p2  ;;  %p27_p4 = scmp.ge.s32.totalorder %s716_s18, 2 }
   0x8   : > { %s429_s19 = sshll.u32 (!%p160_p3), %s542_s12, 3  ;;  %p194_p5 = scmp.lt.s32.totalorder (!%p160_p3), %s546_s13, 1  ;;  %v621_v0 = vld [vmem:[%s706_s1] ss:$0 sm:$0xff] (!%p160_p3) }
   0x9   : > { %s718_s18 = smov (%p27_p4, %s716_s18), 0  ;;  %163 = sbr.rel (%p160_p3) target bundleno = 42 (0x2a), region = 32 }
   0xa   : > { %p196_p6 = scmp.lt.s32.totalorder (!%p160_p3), %s429_s19, 15  ;;  %v630_v9 = vld [vmem:[%s707_s2] ss:$0 sm:$0xff] (!%p160_p3) }
  0x10   : > { %s720_s13 = smov (!%p194_p5, %s546_s13), 1  ;;  %s722_s19 = smov (!%p196_p6, %s429_s19), 15 }
  0x11   : > { %s431_s20 = sshll.u32 %s720_s13, 5  ;;  %s430_s21 = sshll.u32 %s722_s19, 1 }
  0x12   : > { %s610_s22 = sadd.s32 %s431_s20, %s430_s21 }
  0x13   : > { %s432_s23 = sshll.u32 %s610_s22, 2  ;;  %s436_s4 = sshll.u32 %s610_s22, 3 }
  0x14   : > { %s616_s26 = scalar_lea.vmem %s705_s0, %s432_s23  ;;  %s648_s7 = scalar_lea.vmem %s708_s3, %s436_s4 }
  0x15   : > { %v442_v1 = vld [vmem:[%s616_s26] sm:$0xff]   ;;  %v473_v2 = vld [vmem:[%s616_s26 + $0x8] sm:$0xff]   ;;  %v474_v3 = vld [vmem:[%s616_s26 + $0x10] sm:$0xff]  }
  0x16   : > { %v443_v4 = vunpack.c.l.bf16 %v442_v1  ;;  %v444_v5 = vunpack.c.h.bf16 %v442_v1  ;;  %v447_v6 = vunpack.c.l.bf16 %v473_v2  ;;  %v448_v7 = vunpack.c.h.bf16 %v473_v2  ;;  %v475_v8 = vld [vmem:[%s616_s26 + $0x18] sm:$0xff]   ;;  %v476_v30 = vld [vmem:[%s616_s26 + $0x20] sm:$0xff]   ;;  %v477_v31 = vld [vmem:[%s616_s26 + $0x28] sm:$0xff]  }
  0x17   : > { %v451_v10 = vunpack.c.l.bf16 %v474_v3  ;;  %v452_v11 = vunpack.c.h.bf16 %v474_v3  ;;  %v455_v12 = vunpack.c.l.bf16 %v475_v8  ;;  %v456_v13 = vunpack.c.h.bf16 %v475_v8  ;;  %v478_v36 = vld [vmem:[%s616_s26 + $0x30] sm:$0xff]   ;;  %v479_v37 = vld [vmem:[%s616_s26 + $0x38] sm:$0xff]  }
  0x18   : > { %v254_v14 = vmul.f32 %v443_v4, %v621_v0  ;;  %v255_v15 = vmul.f32 %v444_v5, %v621_v0  ;;  %v256_v16 = vmul.f32 %v447_v6, %v621_v0  ;;  %v257_v17 = vmul.f32 %v448_v7, %v621_v0 }
  0x19   : > { %v258_v18 = vmul.f32 %v451_v10, %v621_v0  ;;  %v259_v19 = vmul.f32 %v452_v11, %v621_v0  ;;  %v260_v20 = vmul.f32 %v455_v12, %v621_v0  ;;  %v261_v21 = vmul.f32 %v456_v13, %v621_v0 }
  0x1a   : > { %v277_v22 = vadd.f32 %v630_v9, %v254_v14  ;;  %v278_v23 = vadd.f32 %v630_v9, %v255_v15  ;;  %v279_v24 = vadd.f32 %v630_v9, %v256_v16  ;;  %v280_v25 = vadd.f32 %v630_v9, %v257_v17 }
  0x1b   : > { %v281_v26 = vadd.f32 %v630_v9, %v258_v18  ;;  %v282_v27 = vadd.f32 %v630_v9, %v259_v19  ;;  %v283_v28 = vadd.f32 %v630_v9, %v260_v20  ;;  %v284_v29 = vadd.f32 %v630_v9, %v261_v21 }
  0x1c   : > { %v293_v32 = vmax.f32 %v277_v22, 0.0  ;;  %v294_v33 = vmax.f32 %v278_v23, 0.0  ;;  %v295_v34 = vmax.f32 %v279_v24, 0.0  ;;  %v296_v35 = vmax.f32 %v280_v25, 0.0 }
  0x1d   : > { %v297_v38 = vmax.f32 %v281_v26, 0.0  ;;  %v298_v39 = vmax.f32 %v282_v27, 0.0  ;;  %v299_v40 = vmax.f32 %v283_v28, 0.0  ;;  %v300_v41 = vmax.f32 %v284_v29, 0.0 }
  0x1e   : > { %309 = vst [vmem:[%s648_s7] sm:$0xff] %v293_v32  ;;  %310 = vst [vmem:[%s648_s7 + $0x8] sm:$0xff] %v294_v33  ;;  %v459_v42 = vunpack.c.l.bf16 %v476_v30  ;;  %v460_v43 = vunpack.c.h.bf16 %v476_v30  ;;  %v463_v44 = vunpack.c.l.bf16 %v477_v31  ;;  %v464_v45 = vunpack.c.h.bf16 %v477_v31 }
  0x1f   : > { %311 = vst [vmem:[%s648_s7 + $0x10] sm:$0xff] %v295_v34  ;;  %312 = vst [vmem:[%s648_s7 + $0x18] sm:$0xff] %v296_v35  ;;  %v467_v46 = vunpack.c.l.bf16 %v478_v36  ;;  %v468_v47 = vunpack.c.h.bf16 %v478_v36  ;;  %v471_v48 = vunpack.c.l.bf16 %v479_v37  ;;  %v472_v49 = vunpack.c.h.bf16 %v479_v37 }
  0x20   : > { %313 = vst [vmem:[%s648_s7 + $0x20] sm:$0xff] %v297_v38  ;;  %314 = vst [vmem:[%s648_s7 + $0x28] sm:$0xff] %v298_v39  ;;  %v262_v50 = vmul.f32 %v459_v42, %v621_v0  ;;  %v263_v51 = vmul.f32 %v460_v43, %v621_v0  ;;  %v264_v52 = vmul.f32 %v463_v44, %v621_v0 }
  0x21   : > { %315 = vst [vmem:[%s648_s7 + $0x30] sm:$0xff] %v299_v40  ;;  %316 = vst [vmem:[%s648_s7 + $0x38] sm:$0xff] %v300_v41  ;;  %v265_v53 = vmul.f32 %v464_v45, %v621_v0  ;;  %v266_v54 = vmul.f32 %v467_v46, %v621_v0  ;;  %v267_v55 = vmul.f32 %v468_v47, %v621_v0 }
  0x22   : > { %v268_v56 = vmul.f32 %v471_v48, %v621_v0  ;;  %v269_v57 = vmul.f32 %v472_v49, %v621_v0  ;;  %v285_v58 = vadd.f32 %v630_v9, %v262_v50  ;;  %v286_v59 = vadd.f32 %v630_v9, %v263_v51 }
  0x23   : > { %v287_v60 = vadd.f32 %v630_v9, %v264_v52  ;;  %v288_v61 = vadd.f32 %v630_v9, %v265_v53  ;;  %v289_v62 = vadd.f32 %v630_v9, %v266_v54  ;;  %v290_v63 = vadd.f32 %v630_v9, %v267_v55 }
  0x24   : > { %v291_v0 = vadd.f32 %v630_v9, %v268_v56  ;;  %v292_v1 = vadd.f32 %v630_v9, %v269_v57  ;;  %v301_v2 = vmax.f32 %v285_v58, 0.0  ;;  %v302_v3 = vmax.f32 %v286_v59, 0.0 }
  0x25   : > { %v303_v4 = vmax.f32 %v287_v60, 0.0  ;;  %v304_v5 = vmax.f32 %v288_v61, 0.0  ;;  %v305_v6 = vmax.f32 %v289_v62, 0.0  ;;  %v306_v7 = vmax.f32 %v290_v63, 0.0 }
  0x26   : > { %v307_v8 = vmax.f32 %v291_v0, 0.0  ;;  %v308_v10 = vmax.f32 %v292_v1, 0.0  ;;  %317 = vst [vmem:[%s648_s7 + $0x40] sm:$0xff] %v301_v2  ;;  %318 = vst [vmem:[%s648_s7 + $0x48] sm:$0xff] %v302_v3 }
  0x27   : > { %319 = vst [vmem:[%s648_s7 + $0x50] sm:$0xff] %v303_v4  ;;  %320 = vst [vmem:[%s648_s7 + $0x58] sm:$0xff] %v304_v5 }
  0x28   : > { %321 = vst [vmem:[%s648_s7 + $0x60] sm:$0xff] %v305_v6  ;;  %322 = vst [vmem:[%s648_s7 + $0x68] sm:$0xff] %v306_v7 }
  0x29   : > { %323 = vst [vmem:[%s648_s7 + $0x70] sm:$0xff] %v307_v8  ;;  %324 = vst [vmem:[%s648_s7 + $0x78] sm:$0xff] %v308_v10 }
  0x2a PF: > { %s13_s16 = sadd.s32 1, %s558_s16   ;;  %s709_s12 = smov %s550_s14 }
  0x2b   : > { %p10_p7 = scmp.ge.s32.totalorder %s13_s16, 6   ;;  %s710_s13 = smov %s554_s15 }
  0x2c   : > { %s711_s14 = smov %s714_s17  ;;  %s712_s15 = smov %s718_s18 }
  0x2d   :  { %12 = sbr.rel (!%p10_p7) target bundleno = 3 (0x3), region = 62 }

// kernel: double_conv.4
= control target key start
LH: loop header
LB: loop body
LE: loop exit
PB: predicated region body
PF: predicated region fallthrough
CT: control target
= control target key end

     0   :  { %s3976_s24 = smov 0   ;;  %s3978_s25 = smov 0   ;;  %s4692_s0 = inlined_call_operand.vmem [shape: bf16[2,16,16,128], index: 0, kind: input, shape index: {}, may-alias: {0,1,2}]   ;;  %s4693_s1 = inlined_call_operand.vmem [shape: bf16[2,16,16,128], index: 1, kind: input, shape index: {}, may-alias: {0,1,2}]   ;;  %s4694_s2 = inlined_call_operand.vmem [shape: bf16[2,16,16,128], index: 2, kind: input, shape index: {}, may-alias: {0,1,2}]   ;;  %s4695_s3 = inlined_call_operand.vmem [shape: f32[1,128], index: 3, kind: input, shape index: {}]   ;;  %s4696_s4 = inlined_call_operand.vmem [shape: f32[1,128], index: 4, kind: input, shape index: {}]   ;;  %s4697_s5 = inlined_call_operand.vmem [shape: bf16[9,128,128], index: 5, kind: input, shape index: {}]   ;;  %s4698_s6 = inlined_call_operand.vmem [shape: bf16[2,16,16,128], index: 6, kind: output, shape index: {0}]   ;;  %s4699_s7 = inlined_call_operand.vmem [shape: f32[2,2,2,128], index: 7, kind: output, shape index: {1}]  }
   0x1   :  { %s3980_s26 = smov 0   ;;  %s3982_s27 = smov 0  }
   0x2   :  { %s3984_s28 = smov 0  }
   0x3 LB: > { %s27_s29 = sadd.s32 1, %s3926_s26  ;;  %s30_s30 = sadd.s32 1, %s3930_s27  ;;  %s3934_s28 = sphi %s3984_s28, %s18_s28   ;;  %s3930_s27 = sphi %s3982_s27, %s4706_s27   ;;  %s3926_s26 = sphi %s3980_s26, %s4705_s26   ;;  %s3922_s25 = sphi %s3978_s25, %s4704_s25   ;;  %s3918_s24 = sphi %s3976_s24, %s4703_s24  }
   0x4   : > { %p28_p0 = scmp.ge.s32.totalorder %s27_s29, 2  ;;  %p2842_p1 = scmp.ge.s32.totalorder %s3934_s28, 1 }
   0x5   : > { %p328_p2 = scmp.lt.s32.totalorder %s3934_s28, 5 }
   0x6   : > { %s4708_s29 = smov (%p28_p0, %s27_s29), 0  ;;  %s4710_s30 = smov (!%p28_p0, %s30_s30), %s3930_s27 }
   0x7   : > { %p329_p3 = pnand %p2842_p1, %p328_p2  ;;  %p32_p4 = scmp.ge.s32.totalorder %s4710_s30, 2 }
   0x8   : > { %v3824_v0 = vld [vmem:[%s4697_s5 + $0x100] sm:$0xff] (!%p329_p3)   ;;  %s4012_s10 = sshll.u32 (!%p329_p3), %s3918_s24, 3  ;;  %v3825_v1 = vld [vmem:[%s4697_s5 + $0x108] sm:$0xff] (!%p329_p3)   ;;  %p405_p5 = scmp.lt.s32.totalorder (!%p329_p3), %s3922_s25, 1  ;;  %v3827_v3 = vld [vmem:[%s4697_s5 + $0x110] sm:$0xff] (!%p329_p3)   ;;  %vm719_vm1 = vcmask (!%p329_p3), 1040384  }
   0x9   : > { %s4712_s30 = smov (%p32_p4, %s4710_s30), 0  ;;  %332 = sbr.rel (%p329_p3) target bundleno = 450 (0x1c2), region = 44 }
   0xa   : > { %3480 = vmatprep.subr.bf16.mxu0 (!%p329_p3), %v3824_v0  ;;  %v3826_v2 = vld [vmem:[%s4697_s5 + $0x40] sm:$0xff] (!%p329_p3)   ;;  %p407_p6 = scmp.lt.s32.totalorder (!%p329_p3), %s4012_s10, 15  ;;  %v3828_v4 = vld [vmem:[%s4697_s5 + $0x48] sm:$0xff] (!%p329_p3)   ;;  %v3830_v5 = vld [vmem:[%s4697_s5 + $0x50] sm:$0xff] (!%p329_p3)   ;;  %s2848_s13 = sadd.s32 (!%p329_p3), 4294967295, %s4012_s10  ;;  %vm1186_vm4 = vcmask (!%p329_p3), 1046528  }
   0xb   : > { %3481 = vmatpush3.bf16.msra.mxu0 (!%p329_p3), %v3824_v0  ;;  %3352 = vmatprep.subr.bf16.mxu1 (!%p329_p3), %v3826_v2  ;;  %v3829_v6 = vld [vmem:[%s4697_s5 + $0x118] sm:$0xff] (!%p329_p3)   ;;  %p417_p7 = scmp.gt.s32.totalorder (!%p329_p3), %s2848_s13, 0  ;;  %p2849_p8 = scmp.lt.s32.totalorder (!%p329_p3), %s2848_s13, 15  ;;  %v3831_v8 = vld [vmem:[%s4697_s5 + $0x120] sm:$0xff] (!%p329_p3)   ;;  %v3833_v12 = vld [vmem:[%s4697_s5 + $0x128] sm:$0xff] (!%p329_p3)  }
   0xc   : > { %3482 = vmatprep.subr.bf16.mxu0 (!%p329_p3), %v3825_v1  ;;  %3353 = vmatpush3.bf16.msra.mxu1 (!%p329_p3), %v3826_v2  ;;  %v3832_v7 = vld [vmem:[%s4697_s5 + $0x58] sm:$0xff] (!%p329_p3)   ;;  %v3834_v9 = vld [vmem:[%s4697_s5 + $0x60] sm:$0xff] (!%p329_p3)   ;;  %p582_p9 = scmp.gt.s32.totalorder (!%p329_p3), %s3918_s24, 0  ;;  %v3836_v19 = vld [vmem:[%s4697_s5 + $0x68] sm:$0xff] (!%p329_p3)   ;;  %vm720_vm0 = vsmask.f32 (!%p329_p3), 256 }
   0xd   : > { %3354 = vmatprep.subr.bf16.mxu1 (!%p329_p3), %v3828_v4  ;;  %v4063_v10 = vld [vmem:[%s4695_s3] ss:$0 sm:$0xff] (!%p329_p3)  ;;  %v3835_v22 = vld [vmem:[%s4697_s5 + $0x130] sm:$0xff] (!%p329_p3)   ;;  %v3837_v37 = vld [vmem:[%s4697_s5 + $0x138] sm:$0xff] (!%p329_p3)   ;;  %vm758_vm2 = vsmask.f32 (!%p329_p3), 7424 }
   0xe   : > { %v4072_v13 = vld [vmem:[%s4696_s4] ss:$0 sm:$0xff] (!%p329_p3)  ;;  %v3838_v25 = vld [vmem:[%s4697_s5 + $0x70] sm:$0xff] (!%p329_p3)   ;;  %v3840_v52 = vld [vmem:[%s4697_s5 + $0x78] sm:$0xff] (!%p329_p3)   ;;  %p462_p12 = scmp.lt.s32.totalorder (!%p329_p3), %s3918_s24, 1 }
   0xf   : > { %3483 = vmatpush3.bf16.msra.mxu0 (!%p329_p3), %v3825_v1  ;;  %v4121_v57 = vld [vmem:[%s4697_s5 + $0x140] sm:$0xff] (!%p329_p3)   ;;  %vm4134_vm3 = vmand (!%p329_p3), %vm719_vm1, %vm720_vm0 }
  0x10   : > { %s4714_s25 = smov (!%p405_p5, %s3922_s25), 1  ;;  %3484 = vmatprep.subr.bf16.mxu0 %v3827_v3  ;;  %3355 = vmatpush3.bf16.msra.mxu1 %v3828_v4  ;;  %s4716_s13 = smov (!%p417_p7, %s2848_s13), 0  ;;  %v4129_v63 = vld [vmem:[%s4697_s5] sm:$0xff]  }
  0x11   : > { %s408_s19 = scalar_select %p407_p6, %s4012_s10, 15  ;;  %3356 = vmatprep.subr.bf16.mxu1 %v3830_v5 }
  0x12   : > { %s4031_s20 = sshll.u32 %s4714_s25, 5  ;;  %s4718_s13 = smov (!%p2849_p8, %s4716_s13), 15 }
  0x13   : > { %s2844_s23 = sshll.u32 %s408_s19, 1  ;;  %3485 = vmatpush3.bf16.msra.mxu0 %v3827_v3  ;;  %s2854_s19 = sshll.u32 %s4718_s13, 1 }
  0x14   : > { %s4037_s8 = sadd.s32 %s4031_s20, %s2844_s23  ;;  %3486 = vmatprep.subr.bf16.mxu0 %v3829_v6  ;;  %3357 = vmatpush3.bf16.msra.mxu1 %v3830_v5  ;;  %s425_s23 = sadd.s32 %s2854_s19, %s4031_s20 }
  0x15   : > { %s2846_s12 = sshll.u32 %s4037_s8, 2  ;;  %3358 = vmatprep.subr.bf16.mxu1 %v3832_v7  ;;  %s2856_s13 = sshll.u32 %s425_s23, 2 }
  0x16   : > { %s4052_s18 = scalar_lea.vmem %s4692_s0, %s2846_s12  ;;  %s427_s19 = scalar_lea.vmem %s4693_s1, %s2856_s13 }
  0x17   : > { %3487 = vmatpush3.bf16.msra.mxu0 %v3829_v6  ;;  %v3115_v11 = vld [vmem:[%s4052_s18] sm:$0xff]   ;;  %v3194_v16 = vld [vmem:[%s4052_s18 + $0x8] sm:$0xff]   ;;  %s583_s21 = scalar_select %p582_p9, 1, 0  ;;  %v3195_v31 = vld [vmem:[%s4052_s18 + $0x10] sm:$0xff]  }
  0x18   : > { %3488 = vmatprep.subr.bf16.mxu0 %v3831_v8  ;;  %v3116_v14 = vunpack.c.l.bf16 %v3115_v11  ;;  %v3117_v15 = vunpack.c.h.bf16 %v3115_v11  ;;  %3359 = vmatpush3.bf16.msra.mxu1 %v3832_v7  ;;  %v3120_v17 = vunpack.c.l.bf16 %v3194_v16  ;;  %v3121_v18 = vunpack.c.h.bf16 %v3194_v16  ;;  %v3147_v30 = vld [vmem:[%s427_s19] sm:$0xff]   ;;  %v3196_v32 = vld [vmem:[%s4052_s18 + $0x18] sm:$0xff]   ;;  %s4643_s23 = scalar_lea.vmem %s4698_s6, %s2846_s12  ;;  %s4728_s24 = smov (!%p462_p12, %s3918_s24), 1 }
  0x19   : > { %3360 = vmatprep.subr.bf16.mxu1 %v3834_v9  ;;  %v3148_v35 = vunpack.c.l.bf16 %v3147_v30  ;;  %v3149_v36 = vunpack.c.h.bf16 %v3147_v30  ;;  %s4104_s9 = scvt.s32.f32 %s583_s21  ;;  %v3124_v40 = vunpack.c.l.bf16 %v3195_v31  ;;  %v3125_v41 = vunpack.c.h.bf16 %v3195_v31  ;;  %s2868_s8 = sshll.u32 %s4714_s25, 1 }
  0x1a   : > { %v509_v20 = vmul.f32 %v3116_v14, %v4063_v10  ;;  %v510_v21 = vmul.f32 %v3117_v15, %v4063_v10  ;;  %v511_v23 = vmul.f32 %v3120_v17, %v4063_v10  ;;  %v512_v24 = vmul.f32 %v3121_v18, %v4063_v10  ;;  %s465_s12 = sadd.s32 %s2868_s8, %s4728_s24 }
  0x1b   : > { %3489 = vmatpush3.bf16.msra.mxu0 %v3831_v8  ;;  %v575_v43 = vmul.f32 %v3148_v35, %v4063_v10  ;;  %v576_v44 = vmul.f32 %v3149_v36, %v4063_v10  ;;  %v3128_v45 = vunpack.c.l.bf16 %v3196_v32  ;;  %s587_s11 = sshrl.u32 %s4104_s9, 16  ;;  %v513_v47 = vmul.f32 %v3124_v40, %v4063_v10  ;;  %p586_p10 = scmp.ne.f32.partialorder %s4104_s9, %s4104_s9 }
  0x1c   : > { %3490 = vmatprep.subr.bf16.mxu0 %v3833_v12  ;;  %v531_v26 = vadd.f32 %v4072_v13, %v509_v20  ;;  %v532_v27 = vadd.f32 %v4072_v13, %v510_v21  ;;  %3361 = vmatpush3.bf16.msra.mxu1 %v3834_v9  ;;  %v533_v28 = vadd.f32 %v4072_v13, %v511_v23  ;;  %v3129_v49 = vunpack.c.h.bf16 %v3196_v32  ;;  %s588_s15 = sand.u32 1, %s587_s11 }
  0x1d   : > { %v534_v29 = vadd.f32 %v4072_v13, %v512_v24  ;;  %3362 = vmatprep.subr.bf16.mxu1 %v3836_v19  ;;  %v514_v48 = vmul.f32 %v3125_v41, %v4063_v10  ;;  %v577_v53 = vadd.f32 %v4072_v13, %v575_v43  ;;  %v578_v54 = vadd.f32 %v4072_v13, %v576_v44  ;;  %s589_s19 = sadd.s32 32767, %s588_s15  ;;  %v4167_v24 = vld [vmem:[%s4052_s18 + $0x28] sm:$0xff]  }
  0x1e   : > { %v547_v33 = vmax.f32 %v531_v26, 0.0  ;;  %v548_v34 = vmax.f32 %v532_v27, 0.0  ;;  %v549_v38 = vmax.f32 %v533_v28, 0.0  ;;  %v535_v58 = vadd.f32 %v4072_v13, %v513_v47  ;;  %s590_s21 = sadd.s32 %s589_s19, %s4104_s9 }
  0x1f   : > { %3491 = vmatpush3.bf16.msra.mxu0 %v3833_v12  ;;  %v550_v39 = vmax.f32 %v534_v29, 0.0  ;;  %v536_v59 = vadd.f32 %v4072_v13, %v514_v48  ;;  %v579_v61 = vmax.f32 %v577_v53, 0.0  ;;  %v580_v62 = vmax.f32 %v578_v54, 0.0  ;;  %s591_s11 = sand.u32 4294901760, %s590_s21 }
  0x20   : > { %3492 = vmatprep.subr.bf16.mxu0 %v3835_v22  ;;  %v563_v42 = vpack.c.bf16 %v548_v34, %v547_v33  ;;  %3363 = vmatpush3.bf16.msra.mxu1 %v3836_v19  ;;  %v515_v0 = vmul.f32 %v3128_v45, %v4063_v10  ;;  %v551_v3 = vmax.f32 %v535_v58, 0.0  ;;  %v516_v5 = vmul.f32 %v3129_v49, %v4063_v10  ;;  %s4720_s11 = smov (%p586_p10, %s591_s11), 2143289344  ;;  %v3197_v19 = vld [vmem:[%s4052_s18 + $0x20] sm:$0xff]  }
  0x21   : > { %v564_v46 = vpack.c.bf16 %v550_v39, %v549_v38  ;;  %3364 = vmatprep.subr.bf16.mxu1 %v3838_v25  ;;  %v552_v4 = vmax.f32 %v536_v59, 0.0  ;;  %v581_v17 = vpack.c.bf16 %v580_v62, %v579_v61  ;;  %s594_s9 = sshrl.u32 %s4720_s11, 16  ;;  %v3132_v38 = vunpack.c.l.bf16 %v3197_v19 }
  0x22   : > { %v637_v50 = vshrl.u32 %v563_v42, 16  ;;  %v640_v51 = vshll.u32 %v563_v42, 16  ;;  %v537_v8 = vadd.f32 %v4072_v13, %v515_v0  ;;  %v538_v18 = vadd.f32 %v4072_v13, %v516_v5  ;;  %s595_s13 = sshll.u32 %s594_s9, 16 }
  0x23   : > { %3493 = vmatpush3.bf16.msra.mxu0 %v3835_v22  ;;  %v644_v55 = vshrl.u32 %v564_v46, 16  ;;  %v647_v56 = vshll.u32 %v564_v46, 16  ;;  %v565_v14 = vpack.c.bf16 %v552_v4, %v551_v3  ;;  %s596_s14 = sor.u32 %s595_s13, %s594_s9  ;;  %v3133_v39 = vunpack.c.h.bf16 %v3197_v19  ;;  %v3841_v46 = vld [vmem:[%s4697_s5 + $0x148] sm:$0xff]   ;;  %v3843_v4 = vld [vmem:[%s4697_s5 + $0x150] sm:$0xff]  }
  0x24   : > { %3494 = vmatprep.subr.bf16.mxu0 %v3837_v37  ;;  %v639_v60 = vrot.slane %v637_v50, 7  ;;  %3365 = vmatpush3.bf16.msra.mxu1 %v3838_v25  ;;  %v597_v30 = vstv %s596_s14  ;;  %v553_v32 = vmax.f32 %v537_v8, 0.0  ;;  %v554_v36 = vmax.f32 %v538_v18, 0.0  ;;  %v3199_v18 = vld [vmem:[%s4052_s18 + $0x30] sm:$0xff]  }
  0x25   : > { %v646_v2 = vrot.slane %v644_v55, 7  ;;  %3366 = vmatprep.subr.bf16.mxu1 %v3840_v52  ;;  %v651_v28 = vshrl.u32 %v565_v14, 16  ;;  %v654_v31 = vshll.u32 %v565_v14, 16  ;;  %v599_v34 = vmul.bf16 %v597_v30, %v581_v17 }
  0x26   : > { %v642_v6 = vor.u32 %v640_v51, %v639_v60  ;;  %v4141_v7 = vsel %vm4134_vm3, %v639_v60, 0  ;;  %v3136_v40 = vunpack.c.l.bf16 %v4167_v24  ;;  %v566_v48 = vpack.c.bf16 %v554_v36, %v553_v32 }
  0x27   : > { %3495 = vmatpush3.bf16.msra.mxu0 %v3837_v37  ;;  %v779_v9 = vshll.u32 %v4141_v7, 16  ;;  %v649_v11 = vor.u32 %v647_v56, %v646_v2  ;;  %v4150_v12 = vsel %vm4134_vm3, %v646_v2, 0  ;;  %v653_v35 = vrot.slane %v651_v28, 7 }
  0x28   : > { %v4154_v15 = vsel %vm4134_vm3, 0, %v642_v6  ;;  %v791_v16 = vshll.u32 %v4150_v12, 16  ;;  %3512 = vmatprep.subr.bf16.mxu0 %v4121_v57  ;;  %3367 = vmatpush3.bf16.msra.mxu1 %v3840_v52  ;;  %v630_v42 = vshrl.u32 %v599_v34, 16  ;;  %v633_v43 = vshll.u32 %v599_v34, 16 }
  0x29   : > { %v772_v20 = vshrl.u32 %v4154_v15, 16  ;;  %v774_v21 = vshll.u32 %v4154_v15, 16  ;;  %v781_v22 = vrot.slane %v779_v9, 1  ;;  %v4164_v23 = vsel %vm4134_vm3, 0, %v649_v11  ;;  %3384 = vmatprep.subr.bf16.mxu1 %v4129_v63 }
  0x2a   : > { %v784_v25 = vshrl.u32 %v4164_v23, 16  ;;  %v786_v26 = vshll.u32 %v4164_v23, 16  ;;  %v793_v27 = vrot.slane %v791_v16, 1  ;;  %v656_v44 = vor.u32 %v654_v31, %v653_v35 }
  0x2b   : > { %v776_v29 = vrot.slane %v774_v21, 1  ;;  %v4181_v47 = vsel %vm4134_vm3, %v653_v35, 0  ;;  %v517_v49 = vmul.f32 %v3132_v38, %v4063_v10  ;;  %v632_v51 = vrot.slane %v630_v42, 7  ;;  %v3845_v21 = vld [vmem:[%s4697_s5 + $0x158] sm:$0xff]   ;;  %v3844_v38 = vld [vmem:[%s4697_s5 + $0x8] sm:$0xff]  }
  0x2c   : > { %v788_v33 = vrot.slane %v786_v26, 1  ;;  %v4190_v52 = vsel %vm4134_vm3, 0, %v656_v44  ;;  %v803_v53 = vshll.u32 %v4181_v47, 16  ;;  %v658_v56 = vshrl.u32 %v566_v48, 16 }
  0x2d   : > { %v777_v37 = vor.u32 %v776_v29, %v772_v20  ;;  %v796_v54 = vshrl.u32 %v4190_v52, 16  ;;  %v798_v55 = vshll.u32 %v4190_v52, 16  ;;  %v661_v58 = vshll.u32 %v566_v48, 16 }
  0x2e   : > { %v789_v41 = vor.u32 %v788_v33, %v784_v25  ;;  %v635_v59 = vor.u32 %v633_v43, %v632_v51  ;;  %v4199_v60 = vsel %vm4134_vm3, %v632_v51, 0  ;;  %v805_v61 = vrot.slane %v803_v53, 1 }
  0x2f   : > { %v4174_v45 = vsel %vm758_vm2, %v777_v37, %v781_v22  ;;  %v518_v62 = vmul.f32 %v3133_v39, %v4063_v10  ;;  %v767_v0 = vshll.u32 %v4199_v60, 16  ;;  %v800_v2 = vrot.slane %v798_v55, 1  ;;  %v3200_v37 = vld [vmem:[%s4052_s18 + $0x38] sm:$0xff]   ;;  %s3097_s18 = sadd.s32 8, %s4012_s10 }
  0x30   : > { %3496 = vmatprep.mubr.bf16.mxu0 %v4174_v45  ;;  %v4186_v50 = vsel %vm758_vm2, %v789_v41, %v793_v27  ;;  %v660_v3 = vrot.slane %v658_v56, 7  ;;  %v4209_v5 = vsel %vm4134_vm3, 0, %v635_v59  ;;  %v3137_v8 = vunpack.c.h.bf16 %v4167_v24  ;;  %p4337_p11 = scmp.lt.s32.totalorder %s3097_s18, 15 }
  0x31   : > { %3497 = vmatmul.mubr.bf16.vlgmr.msra.gmra.mrb[0].mxu0 %v4186_v50  ;;  %v540_v6 = vadd.f32 %v4072_v13, %v518_v62  ;;  %v519_v9 = vmul.f32 %v3136_v40, %v4063_v10  ;;  %v760_v11 = vshrl.u32 %v4209_v5, 16  ;;  %v762_v14 = vshll.u32 %v4209_v5, 16 }
  0x32   : > { %3513 = vmatpush3.bf16.msra.mxu0 %v4121_v57  ;;  %v539_v57 = vadd.f32 %v4072_v13, %v517_v49  ;;  %v769_v16 = vrot.slane %v767_v0, 1  ;;  %v801_v17 = vor.u32 %v800_v2, %v796_v54  ;;  %v663_v19 = vor.u32 %v661_v58, %v660_v3  ;;  %s4722_s18 = smov (!%p4337_p11, %s3097_s18), 15 }
  0x33   : > { %3514 = vmatprep.subr.bf16.mxu0 %v3841_v46  ;;  %v4219_v20 = vsel %vm4134_vm3, %v660_v3, 0  ;;  %v556_v24 = vmax.f32 %v540_v6, 0.0  ;;  %v764_v25 = vrot.slane %v762_v14, 1  ;;  %v520_v28 = vmul.f32 %v3137_v8, %v4063_v10  ;;  %s4724_s18 = smov (!%p4337_p11, %s4722_s18), 15 }
  0x34   : > { %v555_v22 = vmax.f32 %v539_v57, 0.0  ;;  %v4225_v26 = vsel %vm758_vm2, %v801_v17, %v805_v61  ;;  %v815_v27 = vshll.u32 %v4219_v20, 16  ;;  %v4232_v29 = vsel %vm4134_vm3, 0, %v663_v19  ;;  %v3846_v61 = vld [vmem:[%s4697_s5 + $0x10] sm:$0xff]   ;;  %s2861_s13 = sshll.u32 %s4724_s18, 1 }
  0x35   : > { %3500 = vmatprep.mubr.bf16.mxu0 %v4225_v26  ;;  %v541_v31 = vadd.f32 %v4072_v13, %v519_v9  ;;  %v3140_v32 = vunpack.c.l.bf16 %v3199_v18  ;;  %v765_v33 = vor.u32 %v764_v25, %v760_v11  ;;  %v808_v34 = vshrl.u32 %v4232_v29, 16  ;;  %v3849_v11 = vld [vmem:[%s4697_s5 + $0x168] sm:$0xff]   ;;  %s442_s14 = sadd.s32 %s2861_s13, %s4031_s20 }
  0x36   : > { %3515 = vmatpush3.bf16.msra.mxu0 %v3841_v46  ;;  %v567_v30 = vpack.c.bf16 %v556_v24, %v555_v22  ;;  %v810_v35 = vshll.u32 %v4232_v29, 16  ;;  %v817_v36 = vrot.slane %v815_v27, 1  ;;  %v542_v41 = vadd.f32 %v4072_v13, %v520_v28  ;;  %v3847_v46 = vld [vmem:[%s4697_s5 + $0x160] sm:$0xff]   ;;  %v3848_v27 = vld [vmem:[%s4697_s5 + $0x18] sm:$0xff]   ;;  %s2863_s15 = sshll.u32 %s442_s14, 2 }
  0x37   : > { %3516 = vmatprep.subr.bf16.mxu0 %v3843_v4  ;;  %v557_v42 = vmax.f32 %v541_v31, 0.0  ;;  %v770_v43 = vsel %vm758_vm2, %v765_v33, %v769_v16  ;;  %v3141_v48 = vunpack.c.h.bf16 %v3199_v18  ;;  %v521_v49 = vmul.f32 %v3140_v32, %v4063_v10  ;;  %s444_s19 = scalar_lea.vmem %s4694_s2, %s2863_s15 }
  0x38   : > { %v665_v39 = vshrl.u32 %v567_v30, 16  ;;  %v668_v40 = vshll.u32 %v567_v30, 16  ;;  %v812_v44 = vrot.slane %v810_v35, 1  ;;  %3368 = vmatprep.mubr.bf16.mxu1 %v770_v43  ;;  %v558_v53 = vmax.f32 %v542_v41, 0.0  ;;  %s612_s18 = scalar_select %p462_p12, 1, 0 }
  0x39   : > { %v3144_v54 = vunpack.c.l.bf16 %v3200_v37  ;;  %v3145_v55 = vunpack.c.h.bf16 %v3200_v37  ;;  %3369 = vmatmul.mubr.bf16.vlgmr.msra.gmra.mrb[0].mxu1 %v4174_v45  ;;  %v522_v58 = vmul.f32 %v3141_v48, %v4063_v10  ;;  %v543_v59 = vadd.f32 %v4072_v13, %v521_v49 }
  0x3a   : > { %3517 = vmatpush3.bf16.msra.mxu0 %v3843_v4  ;;  %v667_v51 = vrot.slane %v665_v39, 7  ;;  %v813_v56 = vor.u32 %v812_v44, %v808_v34  ;;  %3385 = vmatpush3.bf16.msra.mxu1 %v4129_v63  ;;  %v568_v2 = vpack.c.bf16 %v558_v53, %v557_v42  ;;  %v3851_v34 = vld [vmem:[%s4697_s5 + $0x170] sm:$0xff]   ;;  %v3850_v44 = vld [vmem:[%s4697_s5 + $0x20] sm:$0xff]   ;;  %s4409_s9 = scvt.s32.f32 %s612_s18 }
  0x3b   : > { %3518 = vmatprep.subr.bf16.mxu0 %v3845_v21  ;;  %3372 = vmatprep.mubr.bf16.mxu1 %v4186_v50  ;;  %v523_v45 = vmul.f32 %v3144_v54, %v4063_v10  ;;  %v544_v4 = vadd.f32 %v4072_v13, %v522_v58  ;;  %v559_v57 = vmax.f32 %v543_v59, 0.0  ;;  %v524_v14 = vmul.f32 %v3145_v55, %v4063_v10 }
  0x3c   : > { %v670_v62 = vor.u32 %v668_v40, %v667_v51  ;;  %v4257_v0 = vsel %vm4134_vm3, %v667_v51, 0  ;;  %v4261_v3 = vsel %vm758_vm2, %v813_v56, %v817_v36  ;;  %3386 = vmatprep.subr.bf16.mxu1 %v3844_v38  ;;  %v672_v8 = vshrl.u32 %v568_v2, 16  ;;  %v3853_v51 = vld [vmem:[%s4697_s5 + $0x178] sm:$0xff]   ;;  %s616_s15 = sshrl.u32 %s4409_s9, 16  ;;  %p615_p13 = scmp.ne.f32.partialorder %s4409_s9, %s4409_s9 }
  0x3d   : > { %v827_v63 = vshll.u32 %v4257_v0, 16  ;;  %3501 = vmatmul.mubr.bf16.gmra.mrb[4].mxu0 %v4261_v3  ;;  %v675_v9 = vshll.u32 %v568_v2, 16  ;;  %v560_v18 = vmax.f32 %v544_v4, 0.0  ;;  %v546_v22 = vadd.f32 %v4072_v13, %v524_v14  ;;  %s617_s16 = sand.u32 1, %s616_s15 }
  0x3e   : > { %3519 = vmatpush3.bf16.msra.mxu0 %v3845_v21  ;;  %v4268_v6 = vsel %vm4134_vm3, 0, %v670_v62  ;;  %3387 = vmatpush3.bf16.msra.mxu1 %v3844_v38  ;;  %v674_v19 = vrot.slane %v672_v8, 7  ;;  %v545_v21 = vadd.f32 %v4072_v13, %v523_v45  ;;  %v3852_v62 = vld [vmem:[%s4697_s5 + $0x28] sm:$0xff]   ;;  %s618_s17 = sadd.s32 32767, %s617_s16 }
  0x3f   : > { %3520 = vmatprep.subr.bf16.mxu0 %v3847_v46  ;;  %v820_v16 = vshrl.u32 %v4268_v6, 16  ;;  %v822_v17 = vshll.u32 %v4268_v6, 16  ;;  %3388 = vmatprep.subr.bf16.mxu1 %v3846_v61  ;;  %v829_v25 = vrot.slane %v827_v63, 1  ;;  %v569_v28 = vpack.c.bf16 %v560_v18, %v559_v57 }
  0x40   : > { %v677_v30 = vor.u32 %v675_v9, %v674_v19  ;;  %v4283_v31 = vsel %vm4134_vm3, %v674_v19, 0  ;;  %v561_v32 = vmax.f32 %v545_v21, 0.0  ;;  %v562_v33 = vmax.f32 %v546_v22, 0.0  ;;  %v4333_v9 = vld [vmem:[%s4697_s5 + $0x180] sm:$0xff]  }
  0x41   : > { %v824_v24 = vrot.slane %v822_v17, 1  ;;  %3373 = vmatmul.mubr.bf16.gmra.mrb[4].mxu1 %v4225_v26  ;;  %v839_v36 = vshll.u32 %v4283_v31, 16  ;;  %v679_v37 = vshrl.u32 %v569_v28, 16  ;;  %v682_v39 = vshll.u32 %v569_v28, 16 }
  0x42   : > { %3521 = vmatpush3.bf16.msra.mxu0 %v3847_v46  ;;  %3389 = vmatpush3.bf16.msra.mxu1 %v3846_v61  ;;  %v4292_v38 = vsel %vm4134_vm3, 0, %v677_v30  ;;  %v570_v40 = vpack.c.bf16 %v562_v33, %v561_v32  ;;  %v1190_v22 = vrot.slane %v4154_v15, 1  ;;  %v3856_v30 = vld [vmem:[%s4697_s5 + $0x38] sm:$0xff]  }
  0x43   : > { %3522 = vmatprep.subr.bf16.mxu0 %v3849_v11  ;;  %v825_v35 = vor.u32 %v824_v24, %v820_v16  ;;  %3376 = vmatprep.mubr.bf16.mxu1 %v4261_v3  ;;  %v832_v42 = vshrl.u32 %v4292_v38, 16  ;;  %v834_v43 = vshll.u32 %v4292_v38, 16  ;;  %v681_v46 = vrot.slane %v679_v37, 7  ;;  %v3854_v16 = vld [vmem:[%s4697_s5 + $0x30] sm:$0xff]  }
  0x44   : > { %3390 = vmatprep.subr.bf16.mxu1 %v3848_v27  ;;  %v686_v48 = vshrl.u32 %v570_v40, 16  ;;  %v689_v49 = vshll.u32 %v570_v40, 16  ;;  %v841_v54 = vrot.slane %v839_v36, 1  ;;  %v1191_v24 = vrot.slane %v4141_v7, 1  ;;  %v3858_v36 = vld [vmem:[%s4697_s5 + $0x80] sm:$0xff]  }
  0x45   : > { %v4296_v41 = vsel %vm758_vm2, %v825_v35, %v829_v25  ;;  %v836_v53 = vrot.slane %v834_v43, 1  ;;  %v684_v55 = vor.u32 %v682_v39, %v681_v46  ;;  %v4310_v56 = vsel %vm4134_vm3, %v681_v46, 0  ;;  %v3151_v43 = vld [vmem:[%s444_s19] sm:$0xff]   ;;  %s619_s19 = sadd.s32 %s618_s17, %s4409_s9 }
  0x46   : > { %3523 = vmatpush3.bf16.msra.mxu0 %v3849_v11  ;;  %3504 = vmatprep.mubr.bf16.mxu0 %v4296_v41  ;;  %v688_v58 = vrot.slane %v686_v48, 7  ;;  %v851_v61 = vshll.u32 %v4310_v56, 16  ;;  %v4369_v33 = vsel %vm1186_vm4, %v1190_v22, %v1191_v24  ;;  %v1194_v35 = vrot.slane %v4150_v12, 1  ;;  %s620_s21 = sand.u32 4294901760, %s619_s19 }
  0x47   : > { %3524 = vmatprep.subr.bf16.mxu0 %v3851_v34  ;;  %3391 = vmatpush3.bf16.msra.mxu1 %v3848_v27  ;;  %v837_v59 = vor.u32 %v836_v53, %v832_v42  ;;  %v4318_v2 = vsel %vm4134_vm3, 0, %v684_v55  ;;  %v1193_v37 = vrot.slane %v4164_v23, 1  ;;  %v1196_v39 = vrot.slane %v4190_v52, 1  ;;  %v3857_v42 = vld [vmem:[%s4697_s5 + $0x188] sm:$0xff]   ;;  %s4726_s21 = smov (%p615_p13, %s620_s21), 2143289344 }
  0x48   : > { %3392 = vmatprep.subr.bf16.mxu1 %v3850_v44  ;;  %v691_v45 = vor.u32 %v689_v49, %v688_v58  ;;  %v4322_v63 = vsel %vm4134_vm3, %v688_v58, 0  ;;  %v844_v57 = vshrl.u32 %v4318_v2, 16  ;;  %v846_v8 = vshll.u32 %v4318_v2, 16  ;;  %v3862_v49 = vld [vmem:[%s4697_s5 + $0x90] sm:$0xff]   ;;  %s623_s11 = sshrl.u32 %s4726_s21, 16 }
  0x49   : > { %v4325_v4 = vsel %vm758_vm2, %v837_v59, %v841_v54  ;;  %3377 = vmatmul.mubr.bf16.gmra.mrb[8].mxu1 %v4296_v41  ;;  %v1583_v14 = vshll.u32 %v4322_v63, 16  ;;  %v853_v18 = vrot.slane %v851_v61, 1  ;;  %v1197_v12 = vrot.slane %v4181_v47, 1  ;;  %v3859_v54 = vld [vmem:[%s4697_s5 + $0x190] sm:$0xff]   ;;  %s624_s9 = sshll.u32 %s623_s11, 16 }
  0x4a   : > { %3525 = vmatpush3.bf16.msra.mxu0 %v3851_v34  ;;  %v4344_v11 = vsel %vm4134_vm3, 0, %v691_v45  ;;  %v848_v17 = vrot.slane %v846_v8, 1  ;;  %3380 = vmatprep.mubr.bf16.mxu1 %v4325_v4  ;;  %v4392_v40 = vsel %vm1186_vm4, %v1193_v37, %v1194_v35  ;;  %v3152_v46 = vunpack.c.l.bf16 %v3151_v43  ;;  %v3864_v8 = vld [vmem:[%s4697_s5 + $0x98] sm:$0xff]   ;;  %s625_s16 = sor.u32 %s624_s9, %s623_s11  ;;  %v3870_v37 = vld [vmem:[%s4697_s5 + $0xb0] sm:$0xff]   ;;  %s2869_s11 = sshll.u32 %s465_s12, 1 }
  0x4b   : > { %3526 = vmatprep.subr.bf16.mxu0 %v3853_v51  ;;  %3505 = vmatmul.mubr.bf16.gmra.mrb[8].mxu0 %v4325_v4  ;;  %v1576_v19 = vshrl.u32 %v4344_v11, 16  ;;  %v1578_v21 = vshll.u32 %v4344_v11, 16  ;;  %v1585_v28 = vrot.slane %v1583_v14, 1  ;;  %v4400_v47 = vsel %vm1186_vm4, %v1196_v39, %v1197_v12  ;;  %v3867_v39 = vld [vmem:[%s4697_s5 + $0x1b0] sm:$0xff]   ;;  %s467_s9 = scalar_lea.vmem %s4699_s7, %s2869_s11 }
  0x4c   : > { %3393 = vmatpush3.bf16.msra.mxu1 %v3850_v44  ;;  %v849_v25 = vor.u32 %v848_v17, %v844_v57  ;;  %v3860_v44 = vld [vmem:[%s4697_s5 + $0x88] sm:$0xff]   ;;  %v3153_v48 = vunpack.c.h.bf16 %v3151_v43  ;;  %v1200_v53 = vrot.slane %v4219_v20, 1  ;;  %v604_v55 = vmul.f32 %v3152_v46, %v4063_v10  ;;  %v3866_v17 = vld [vmem:[%s4697_s5 + $0xa0] sm:$0xff]  }
  0x4d   : > { %3394 = vmatprep.subr.bf16.mxu1 %v3852_v62  ;;  %v1580_v27 = vrot.slane %v1578_v21, 1  ;;  %v1202_v59 = vrot.slane %v4268_v6, 1  ;;  %v1203_v20 = vrot.slane %v4257_v0, 1  ;;  %v1205_v14 = vrot.slane %v4292_v38, 1 }
  0x4e   : > { %3527 = vmatpush3.bf16.msra.mxu0 %v3853_v51  ;;  %v4365_v32 = vsel %vm758_vm2, %v849_v25, %v853_v18  ;;  %v1199_v51 = vrot.slane %v4232_v29, 1  ;;  %v605_v58 = vmul.f32 %v3153_v48, %v4063_v10  ;;  %v606_v61 = vadd.f32 %v4072_v13, %v604_v55  ;;  %v3863_v18 = vld [vmem:[%s4697_s5 + $0x1a0] sm:$0xff]   ;;  %v3865_v25 = vld [vmem:[%s4697_s5 + $0x1a8] sm:$0xff]  }
  0x4f   : > { %3544 = vmatprep.subr.bf16.mxu0 %v4333_v9  ;;  %v1581_v7 = vor.u32 %v1580_v27, %v1576_v19  ;;  %3508 = vmatprep.mubr.bf16.mxu0 %v4365_v32  ;;  %v4437_v0 = vsel %vm1186_vm4, %v1202_v59, %v1203_v20  ;;  %v1208_v19 = vrot.slane %v4318_v2, 1  ;;  %v1209_v21 = vrot.slane %v4310_v56, 1  ;;  %v3868_v56 = vld [vmem:[%s4697_s5 + $0xa8] sm:$0xff]   ;;  %v3878_v59 = vld [vmem:[%s4697_s5 + $0xd0] sm:$0xff]  }
  0x50   : > { %3395 = vmatpush3.bf16.msra.mxu1 %v3852_v62  ;;  %v607_v62 = vadd.f32 %v4072_v13, %v605_v58  ;;  %v608_v10 = vmax.f32 %v606_v61, 0.0  ;;  %v4431_v57 = vsel %vm1186_vm4, %v1199_v51, %v1200_v53  ;;  %v3861_v13 = vld [vmem:[%s4697_s5 + $0x198] sm:$0xff]   ;;  %v626_v22 = vstv %s625_s16  ;;  %v3874_v53 = vld [vmem:[%s4697_s5 + $0xc0] sm:$0xff]   ;;  %v3873_v55 = vld [vmem:[%s4697_s5 + $0x1c8] sm:$0xff]  }
  0x51   : > { %3396 = vmatprep.subr.bf16.mxu1 %v3854_v16  ;;  %v4372_v34 = vsel %vm758_vm2, %v1581_v7, %v1585_v28  ;;  %3381 = vmatmul.mubr.bf16.gmra.mrb[12].mxu1 %v4365_v32  ;;  %v4466_v27 = vsel %vm1186_vm4, %v1208_v19, %v1209_v21  ;;  %v1768_v35 = vrot.slane %v4344_v11, 1  ;;  %v3869_v51 = vld [vmem:[%s4697_s5 + $0x1b8] sm:$0xff]   ;;  %v3876_v58 = vld [vmem:[%s4697_s5 + $0xc8] sm:$0xff]   ;;  %v3875_v20 = vld [vmem:[%s4697_s5 + $0x1d0] sm:$0xff]  }
  0x52   : > { %3400 = vmatprep.mubr.bf16.mxu1 %v4209_v5  ;;  %v609_v45 = vmax.f32 %v607_v62, 0.0  ;;  %v3880_v61 = vld [vmem:[%s4697_s5 + $0xd8] sm:$0xff]   ;;  %v3882_v62 = vld [vmem:[%s4697_s5 + $0xe0] sm:$0xff]   ;;  %v3894_v19 = vld [vmem:[%s4697_s5 + $0x230] sm:$0xff]  }
  0x53   : > { %3509 = vmatmul.mubr.bf16.gmra.mrb[12].mxu0 %v4372_v34 }
  0x54   : > { %3397 = vmatpush3.bf16.msra.mxu1 %v3854_v16  ;;  %3528 = vmatprep.mubr.bf16.mxu0 %v4369_v33  ;;  %v1206_v16 = vrot.slane %v4283_v31, 1 }
  0x55   : > { %3398 = vmatprep.subr.bf16.mxu1 %v3856_v30 }
  0x56   : > { %v4460_v24 = vsel %vm1186_vm4, %v1205_v14, %v1206_v16  ;;  %v3885_v14 = vld [vmem:[%s4697_s5 + $0x1f8] sm:$0xff]  }
  0x57   : > { %v3888_v16 = vld [vmem:[%s4697_s5 + $0xf8] sm:$0xff]  }
  0x58   : > { %3399 = vmatpush3.bf16.msra.mxu1 %v3856_v30 }
  0x59   : > { %3416 = vmatprep.subr.bf16.mxu1 %v3858_v36 }
  0x5b   : > { %3401 = vmatmul.mubr.bf16.vlgmr.msra.gmra.mrb[0].mxu1 %v4154_v15  ;;  %3529 = vmatmul.mubr.bf16.vlgmr.msra.gmra.mrb[0].mxu0 %v4392_v40 }
  0x5c   : > { %3417 = vmatpush3.bf16.msra.mxu1 %v3858_v36  ;;  %3545 = vmatpush3.bf16.msra.mxu0 %v4333_v9  ;;  %v610_v9 = vpack.c.bf16 %v609_v45, %v608_v10  ;;  %v1769_v36 = vrot.slane %v4322_v63, 1  ;;  %v1187_v63 = vrot.slane %v4209_v5, 1  ;;  %v3879_v10 = vld [vmem:[%s4697_s5 + $0x1e0] sm:$0xff]   ;;  %v3881_v45 = vld [vmem:[%s4697_s5 + $0x1e8] sm:$0xff]  }
  0x5d   : > { %3532 = vmatprep.mubr.bf16.mxu0 %v4400_v47  ;;  %3546 = vmatprep.subr.bf16.mxu0 %v3857_v42 }
  0x5e   : > { %3418 = vmatprep.subr.bf16.mxu1 %v3860_v44  ;;  %3404 = vmatprep.mubr.bf16.mxu1 %v4164_v23  ;;  %v628_v31 = vmul.bf16 %v626_v22, %v610_v9  ;;  %v4495_v48 = vsel %vm1186_vm4, %v1768_v35, %v1769_v36  ;;  %v3883_v9 = vld [vmem:[%s4697_s5 + $0x1f0] sm:$0xff]  }
  0x60   : > { %3419 = vmatpush3.bf16.msra.mxu1 %v3860_v44  ;;  %3547 = vmatpush3.bf16.msra.mxu0 %v3857_v42  ;;  %v693_v28 = vshrl.u32 %v628_v31, 16  ;;  %v696_v30 = vshll.u32 %v628_v31, 16  ;;  %v1188_v44 = vrot.slane %v4199_v60, 1  ;;  %v3872_v60 = vld [vmem:[%s4697_s5 + $0xb8] sm:$0xff]  }
  0x61   : > { %3420 = vmatprep.subr.bf16.mxu1 %v3862_v49  ;;  %3548 = vmatprep.subr.bf16.mxu0 %v3859_v54 }
  0x62   : > { %v695_v7 = vrot.slane %v693_v28, 7  ;;  %v1189_v5 = vsel %vm1186_vm4, %v1187_v63, %v1188_v44 }
  0x63   : > { %3405 = vmatmul.mubr.bf16.gmra.mrb[4].mxu1 %v4190_v52  ;;  %3533 = vmatmul.mubr.bf16.gmra.mrb[4].mxu0 %v4431_v57 }
  0x64   : > { %3421 = vmatpush3.bf16.msra.mxu1 %v3862_v49  ;;  %3549 = vmatpush3.bf16.msra.mxu0 %v3859_v54  ;;  %v698_v12 = vor.u32 %v696_v30, %v695_v7  ;;  %v4484_v42 = vsel %vm4134_vm3, %v695_v7, 0  ;;  %v3871_v54 = vld [vmem:[%s4697_s5 + $0x1c0] sm:$0xff]  }
  0x65   : > { %3536 = vmatprep.mubr.bf16.mxu0 %v4437_v0  ;;  %3550 = vmatprep.subr.bf16.mxu0 %v3861_v13  ;;  %v2322_v43 = vrot.slane %v4484_v42, 1 }
  0x66   : > { %3422 = vmatprep.subr.bf16.mxu1 %v3864_v8  ;;  %3408 = vmatprep.mubr.bf16.mxu1 %v4232_v29  ;;  %v4492_v46 = vsel %vm4134_vm3, 0, %v698_v12 }
  0x67   : > { %v2321_v49 = vrot.slane %v4492_v46, 1 }
  0x68   : > { %3423 = vmatpush3.bf16.msra.mxu1 %v3864_v8  ;;  %3551 = vmatpush3.bf16.msra.mxu0 %v3861_v13  ;;  %v3884_v13 = vld [vmem:[%s4697_s5 + $0xe8] sm:$0xff]   ;;  %v3886_v8 = vld [vmem:[%s4697_s5 + $0xf0] sm:$0xff]  }
  0x69   : > { %3424 = vmatprep.subr.bf16.mxu1 %v3866_v17  ;;  %3552 = vmatprep.subr.bf16.mxu0 %v3863_v18  ;;  %v4506_v1 = vsel %vm1186_vm4, %v2321_v49, %v2322_v43 }
  0x6b   : > { %3409 = vmatmul.mubr.bf16.gmra.mrb[8].mxu1 %v4268_v6  ;;  %3537 = vmatmul.mubr.bf16.gmra.mrb[8].mxu0 %v4460_v24 }
  0x6c   : > { %3425 = vmatpush3.bf16.msra.mxu1 %v3866_v17  ;;  %3553 = vmatpush3.bf16.msra.mxu0 %v3863_v18  ;;  %v3887_v17 = vld [vmem:[%s4697_s5 + $0x200] sm:$0xff]   ;;  %v3889_v18 = vld [vmem:[%s4697_s5 + $0x208] sm:$0xff]  }
  0x6d   : > { %3540 = vmatprep.mubr.bf16.mxu0 %v4466_v27  ;;  %3554 = vmatprep.subr.bf16.mxu0 %v3865_v25 }
  0x6e   : > { %3426 = vmatprep.subr.bf16.mxu1 %v3868_v56  ;;  %3412 = vmatprep.mubr.bf16.mxu1 %v4292_v38 }
  0x70   : > { %3427 = vmatpush3.bf16.msra.mxu1 %v3868_v56  ;;  %3555 = vmatpush3.bf16.msra.mxu0 %v3865_v25 }
  0x71   : > { %3428 = vmatprep.subr.bf16.mxu1 %v3870_v37  ;;  %3556 = vmatprep.subr.bf16.mxu0 %v3867_v39 }
  0x73   : > { %3413 = vmatmul.mubr.bf16.gmra.mrb[12].mxu1 %v4318_v2  ;;  %3541 = vmatmul.mubr.bf16.gmra.mrb[12].mxu0 %v4495_v48 }
  0x74   : > { %3429 = vmatpush3.bf16.msra.mxu1 %v3870_v37  ;;  %3557 = vmatpush3.bf16.msra.mxu0 %v3867_v39 }
  0x75   : > { %3560 = vmatprep.mubr.bf16.mxu0 %v4164_v23  ;;  %3558 = vmatprep.subr.bf16.mxu0 %v3869_v51 }
  0x76   : > { %3430 = vmatprep.subr.bf16.mxu1 %v3872_v60  ;;  %3432 = vmatprep.mubr.bf16.mxu1 %v1189_v5 }
  0x78   : > { %3431 = vmatpush3.bf16.msra.mxu1 %v3872_v60  ;;  %3559 = vmatpush3.bf16.msra.mxu0 %v3869_v51 }
  0x79   : > { %3448 = vmatprep.subr.bf16.mxu1 %v3874_v53  ;;  %3576 = vmatprep.subr.bf16.mxu0 %v3871_v54 }
  0x7b   : > { %3433 = vmatmul.mubr.bf16.vlgmr.msra.gmra.mrb[0].mxu1 %v4369_v33  ;;  %3561 = vmatmul.mubr.bf16.vlgmr.msra.gmra.mrb[0].mxu0 %v4190_v52  ;;  %v3877_v33 = vld [vmem:[%s4697_s5 + $0x1d8] sm:$0xff]  }
  0x7c   : > { %3449 = vmatpush3.bf16.msra.mxu1 %v3874_v53  ;;  %3577 = vmatpush3.bf16.msra.mxu0 %v3871_v54 }
  0x7d   : > { %3564 = vmatprep.mubr.bf16.mxu0 %v4232_v29  ;;  %3578 = vmatprep.subr.bf16.mxu0 %v3873_v55 }
  0x7e   : > { %3450 = vmatprep.subr.bf16.mxu1 %v3876_v58  ;;  %3436 = vmatprep.mubr.bf16.mxu1 %v4392_v40 }
  0x80   : > { %3451 = vmatpush3.bf16.msra.mxu1 %v3876_v58  ;;  %3579 = vmatpush3.bf16.msra.mxu0 %v3873_v55 }
  0x81   : > { %3452 = vmatprep.subr.bf16.mxu1 %v3878_v59  ;;  %3580 = vmatprep.subr.bf16.mxu0 %v3875_v20 }
  0x83   : > { %3437 = vmatmul.mubr.bf16.gmra.mrb[4].mxu1 %v4400_v47  ;;  %3565 = vmatmul.mubr.bf16.gmra.mrb[4].mxu0 %v4268_v6 }
  0x84   : > { %3453 = vmatpush3.bf16.msra.mxu1 %v3878_v59  ;;  %3581 = vmatpush3.bf16.msra.mxu0 %v3875_v20 }
  0x85   : > { %3568 = vmatprep.mubr.bf16.mxu0 %v4292_v38  ;;  %3582 = vmatprep.subr.bf16.mxu0 %v3877_v33 }
  0x86   : > { %3454 = vmatprep.subr.bf16.mxu1 %v3880_v61  ;;  %3440 = vmatprep.mubr.bf16.mxu1 %v4431_v57 }
  0x88   : > { %3455 = vmatpush3.bf16.msra.mxu1 %v3880_v61  ;;  %3583 = vmatpush3.bf16.msra.mxu0 %v3877_v33 }
  0x89   : > { %3456 = vmatprep.subr.bf16.mxu1 %v3882_v62  ;;  %3584 = vmatprep.subr.bf16.mxu0 %v3879_v10 }
  0x8b   : > { %3441 = vmatmul.mubr.bf16.gmra.mrb[8].mxu1 %v4437_v0  ;;  %3569 = vmatmul.mubr.bf16.gmra.mrb[8].mxu0 %v4318_v2 }
  0x8c   : > { %3457 = vmatpush3.bf16.msra.mxu1 %v3882_v62  ;;  %3585 = vmatpush3.bf16.msra.mxu0 %v3879_v10 }
  0x8d   : > { %3572 = vmatprep.mubr.bf16.mxu0 %v4344_v11  ;;  %3586 = vmatprep.subr.bf16.mxu0 %v3881_v45 }
  0x8e   : > { %3458 = vmatprep.subr.bf16.mxu1 %v3884_v13  ;;  %3444 = vmatprep.mubr.bf16.mxu1 %v4460_v24 }
  0x90   : > { %3459 = vmatpush3.bf16.msra.mxu1 %v3884_v13  ;;  %3587 = vmatpush3.bf16.msra.mxu0 %v3881_v45 }
  0x91   : > { %3460 = vmatprep.subr.bf16.mxu1 %v3886_v8  ;;  %3588 = vmatprep.subr.bf16.mxu0 %v3883_v9 }
  0x93   : > { %3445 = vmatmul.mubr.bf16.gmra.mrb[12].mxu1 %v4466_v27  ;;  %3573 = vmatmul.mubr.bf16.gmra.mrb[12].mxu0 %v4492_v46 }
  0x94   : > { %3461 = vmatpush3.bf16.msra.mxu1 %v3886_v8  ;;  %3589 = vmatpush3.bf16.msra.mxu0 %v3883_v9 }
  0x95   : > { %3592 = vmatprep.mubr.bf16.mxu0 %v4186_v50  ;;  %3590 = vmatprep.subr.bf16.mxu0 %v3885_v14  ;;  %v2131_v50 = vshll.u32 %v4492_v46, 16 }
  0x96   : > { %3462 = vmatprep.subr.bf16.mxu1 %v3888_v16  ;;  %3464 = vmatprep.mubr.bf16.mxu1 %v4154_v15  ;;  %v3890_v15 = vld [vmem:[%s4697_s5 + $0x210] sm:$0xff]  }
  0x98   : > { %3463 = vmatpush3.bf16.msra.mxu1 %v3888_v16  ;;  %3591 = vmatpush3.bf16.msra.mxu0 %v3885_v14 }
  0x99   : > { %3640 = vmatprep.subr.bf16.mxu1 %v3887_v17  ;;  %3608 = vmatprep.subr.bf16.mxu0 %v3887_v17 }
  0x9b   : > { %3465 = vmatmul.mubr.bf16.vlgmr.msra.gmra.mrb[0].mxu1 %v4164_v23  ;;  %3593 = vmatmul.mubr.bf16.vlgmr.msra.gmra.mrb[0].mxu0 %v4225_v26  ;;  %v3891_v23 = vld [vmem:[%s4697_s5 + $0x218] sm:$0xff]   ;;  %v2129_v26 = vshrl.u32 %v4492_v46, 16 }
  0x9c   : > { %3648 = vmatpush3.bf16.msra.mxu1 %v3887_v17  ;;  %3609 = vmatpush3.bf16.msra.mxu0 %v3887_v17 }
  0x9d   : > { %3596 = vmatprep.mubr.bf16.mxu0 %v4261_v3  ;;  %3610 = vmatprep.subr.bf16.mxu0 %v3889_v18  ;;  %v2136_v3 = vshll.u32 %v4484_v42, 16 }
  0x9e   : > { %3641 = vmatprep.subr.bf16.mxu1 %v3889_v18  ;;  %3468 = vmatprep.mubr.bf16.mxu1 %v4190_v52  ;;  %v3892_v52 = vld [vmem:[%s4697_s5 + $0x220] sm:$0xff]  }
  0xa0   : > { %3649 = vmatpush3.bf16.msra.mxu1 %v3889_v18  ;;  %3611 = vmatpush3.bf16.msra.mxu0 %v3889_v18 }
  0xa1   : > { %3642 = vmatprep.subr.bf16.mxu1 %v3890_v15  ;;  %3612 = vmatprep.subr.bf16.mxu0 %v3890_v15 }
  0xa3   : > { %3469 = vmatmul.mubr.bf16.gmra.mrb[4].mxu1 %v4232_v29  ;;  %3597 = vmatmul.mubr.bf16.gmra.mrb[4].mxu0 %v4296_v41  ;;  %v2133_v29 = vrot.slane %v2131_v50, 1  ;;  %v3893_v41 = vld [vmem:[%s4697_s5 + $0x228] sm:$0xff]  }
  0xa4   : > { %3650 = vmatpush3.bf16.msra.mxu1 %v3890_v15  ;;  %3613 = vmatpush3.bf16.msra.mxu0 %v3890_v15 }
  0xa5   : > { %3600 = vmatprep.mubr.bf16.mxu0 %v4325_v4  ;;  %3614 = vmatprep.subr.bf16.mxu0 %v3891_v23  ;;  %v2138_v4 = vrot.slane %v2136_v3, 1 }
  0xa6   : > { %3643 = vmatprep.subr.bf16.mxu1 %v3891_v23  ;;  %3472 = vmatprep.mubr.bf16.mxu1 %v4268_v6  ;;  %v2134_v6 = vor.u32 %v2133_v29, %v2129_v26 }
  0xa8   : > { %3651 = vmatpush3.bf16.msra.mxu1 %v3891_v23  ;;  %3615 = vmatpush3.bf16.msra.mxu0 %v3891_v23 }
  0xa9   : > { %3644 = vmatprep.subr.bf16.mxu1 %v3892_v52  ;;  %3616 = vmatprep.subr.bf16.mxu0 %v3892_v52 }
  0xab   : > { %3473 = vmatmul.mubr.bf16.gmra.mrb[8].mxu1 %v4292_v38  ;;  %3601 = vmatmul.mubr.bf16.gmra.mrb[8].mxu0 %v4365_v32  ;;  %v2139_v38 = vsel %vm758_vm2, %v2134_v6, %v2138_v4  ;;  %v3895_v32 = vld [vmem:[%s4697_s5 + $0x238] sm:$0xff]  }
  0xac   : > { %3652 = vmatpush3.bf16.msra.mxu1 %v3892_v52  ;;  %3617 = vmatpush3.bf16.msra.mxu0 %v3892_v52 }
  0xad   : > { %3604 = vmatprep.mubr.bf16.mxu0 %v4372_v34  ;;  %3618 = vmatprep.subr.bf16.mxu0 %v3893_v41 }
  0xae   : > { %3645 = vmatprep.subr.bf16.mxu1 %v3893_v41  ;;  %3476 = vmatprep.mubr.bf16.mxu1 %v4318_v2 }
  0xb0   : > { %3653 = vmatpush3.bf16.msra.mxu1 %v3893_v41  ;;  %3619 = vmatpush3.bf16.msra.mxu0 %v3893_v41 }
  0xb1   : > { %3646 = vmatprep.subr.bf16.mxu1 %v3894_v19  ;;  %3620 = vmatprep.subr.bf16.mxu0 %v3894_v19 }
  0xb3   : > { %3477 = vmatmul.mubr.bf16.gmra.mrb[12].mxu1 %v4344_v11  ;;  %3605 = vmatmul.mubr.bf16.gmra.mrb[12].mxu0 %v2139_v38 }
  0xb4   : > { %3654 = vmatpush3.bf16.msra.mxu1 %v3894_v19  ;;  %3621 = vmatpush3.bf16.msra.mxu0 %v3894_v19 }
  0xb5   : > { %3624 = vmatprep.mubr.bf16.mxu0 %v4392_v40  ;;  %3622 = vmatprep.subr.bf16.mxu0 %v3895_v32 }
  0xb6   : > { %3647 = vmatprep.subr.bf16.mxu1 %v3895_v32  ;;  %3632 = vmatprep.mubr.bf16.mxu1 %v4460_v24 }
  0xb8   : > { %3655 = vmatpush3.bf16.msra.mxu1 %v3895_v32  ;;  %3623 = vmatpush3.bf16.msra.mxu0 %v3895_v32 }
  0xbb   : > { %3633 = vmatmul.mubr.bf16.vlgmr.msra.gmra.mrb[16].mxu1 %v4466_v27  ;;  %3625 = vmatmul.mubr.bf16.vlgmr.msra.gmra.mrb[0].mxu0 %v4400_v47 }
  0xbc   : > { %3636 = vmatprep.mubr.bf16.mxu1 %v4495_v48  ;;  %3628 = vmatprep.mubr.bf16.mxu0 %v4431_v57 }
  0xc3   : > { %3637 = vmatmul.mubr.bf16.gmra.mrb[20].mxu1 %v4506_v1  ;;  %3629 = vmatmul.mubr.bf16.gmra.mrb[4].mxu0 %v4437_v0 }
 0x16e   : > { %v3466_v2 = vpop.f32.mrb[0].mxu1 }
 0x16f   : > { %v1496_v11 = vpop.f32.mrb[1].mxu1 }
 0x170   : > { %v3467_v34 = vpop.f32.mrb[2].mxu1 }
 0x171   : > { %v1499_v40 = vpop.f32.mrb[3].mxu1 }
 0x176   : > { %v4624_v21 = vpop.f32.mrb[4].mxu1 }
 0x177   : > { %v4626_v22 = vpop.f32.mrb[5].mxu1 }
 0x178   : > { %v4628_v31 = vpop.f32.mrb[6].mxu1 }
 0x179   : > { %v4630_v24 = vpop.f32.mrb[7].mxu1 }
 0x17e   : > { %v3474_v47 = vpop.f32.mrb[8].mxu1  ;;  %v3602_v25 = vpop.f32.mrb[8].mxu0 }
 0x17f   : > { %v1528_v27 = vpop.f32.mrb[9].mxu1  ;;  %v2272_v57 = vpop.f32.mrb[9].mxu0  ;;  %v3664_v56 = vadd.f32 %v3602_v25, %v3474_v47 }
 0x180   : > { %v3475_v28 = vpop.f32.mrb[10].mxu1  ;;  %v3603_v30 = vpop.f32.mrb[10].mxu0  ;;  %v3666_v0 = vadd.f32 %v2272_v57, %v1528_v27 }
 0x181   : > { %v1531_v7 = vpop.f32.mrb[11].mxu1  ;;  %v2275_v35 = vpop.f32.mrb[11].mxu0  ;;  %v3668_v36 = vadd.f32 %v3603_v30, %v3475_v28 }
 0x182   : > { %v3670_v37 = vadd.f32 %v2275_v35, %v1531_v7 }
 0x186   : > { %v3478_v39 = vpop.f32.mrb[12].mxu1  ;;  %v3606_v12 = vpop.f32.mrb[12].mxu0 }
 0x187   : > { %v1544_v42 = vpop.f32.mrb[13].mxu1  ;;  %v2288_v43 = vpop.f32.mrb[13].mxu0  ;;  %v3672_v63 = vadd.f32 %v3606_v12, %v3478_v39 }
 0x188   : > { %v3479_v44 = vpop.f32.mrb[14].mxu1  ;;  %v3607_v46 = vpop.f32.mrb[14].mxu0  ;;  %v3674_v48 = vadd.f32 %v2288_v43, %v1544_v42 }
 0x189   : > { %v1547_v49 = vpop.f32.mrb[15].mxu1  ;;  %v2291_v51 = vpop.f32.mrb[15].mxu0  ;;  %v3676_v60 = vadd.f32 %v3607_v46, %v3479_v44 }
 0x18a   : > { %v3678_v1 = vadd.f32 %v2291_v51, %v1547_v49 }
 0x18e   : > { %v3634_v5 = vpop.f32.mrb[16].mxu1  ;;  %v3626_v53 = vpop.f32.mrb[0].mxu0 }
 0x18f   : > { %v4632_v54 = vadd.f32 %v3664_v56, %v3634_v5  ;;  %v2456_v55 = vpop.f32.mrb[17].mxu1  ;;  %v3656_v58 = vadd.f32 %v3626_v53, %v3466_v2  ;;  %v2424_v59 = vpop.f32.mrb[1].mxu0 }
 0x190   : > { %v4634_v20 = vadd.f32 %v3666_v0, %v2456_v55  ;;  %v3635_v33 = vpop.f32.mrb[18].mxu1  ;;  %v3657_v61 = vadd.f32 %v2424_v59, %v1496_v11  ;;  %v3627_v62 = vpop.f32.mrb[2].mxu0 }
 0x191   : > { %v4636_v10 = vadd.f32 %v3668_v36, %v3635_v33  ;;  %v2459_v45 = vpop.f32.mrb[19].mxu1  ;;  %v3658_v13 = vadd.f32 %v3627_v62, %v3467_v34  ;;  %v2427_v8 = vpop.f32.mrb[3].mxu0  ;;  %v2606_v29 = vmul.f32 %v3656_v58, %v3656_v58 }
 0x192   : > { %v3671_v9 = vadd.f32 %v3670_v37, %v2459_v45  ;;  %v3659_v14 = vadd.f32 %v2427_v8, %v1499_v40  ;;  %v2604_v15 = vmul.f32 %v3657_v61, %v3657_v61 }
 0x193   : > { %v3182_v16 = vpack.c.bf16 %v4636_v10, %v4632_v54  ;;  %v3162_v17 = vpack.c.bf16 %v3658_v13, %v3656_v58  ;;  %v2607_v34 = vmul.f32 %v3658_v13, %v3658_v13 }
 0x194   : > { %v3177_v18 = vpack.c.bf16 %v3671_v9, %v4634_v20  ;;  %v3157_v23 = vpack.c.bf16 %v3659_v14, %v3657_v61  ;;  %v2583_v50 = vadd.f32 %v3659_v14, %v3657_v61  ;;  %v2605_v52 = vmul.f32 %v3659_v14, %v3659_v14 }
 0x195   : > { %3205 = vst [vmem:[%s4643_s23 + $0x28] sm:$0xff] %v3182_v16   ;;  %3201 = vst [vmem:[%s4643_s23 + $0x8] sm:$0xff] %v3162_v17   ;;  %v2613_v53 = vmul.f32 %v3671_v9, %v3671_v9  ;;  %v2615_v61 = vmul.f32 %v4636_v10, %v4636_v10 }
 0x196   : > { %3204 = vst [vmem:[%s4643_s23 + $0x20] sm:$0xff] %v3177_v18   ;;  %v3638_v26 = vpop.f32.mrb[20].mxu1  ;;  %3158 = vst [vmem:[%s4643_s23] sm:$0xff] %v3157_v23   ;;  %v2584_v3 = vadd.f32 %v3656_v58, %v2583_v50  ;;  %v2620_v41 = vadd.f32 %v2605_v52, %v2604_v15  ;;  %v3630_v6 = vpop.f32.mrb[4].mxu0 }
 0x197   : > { %v3673_v4 = vadd.f32 %v3672_v63, %v3638_v26  ;;  %v2472_v19 = vpop.f32.mrb[21].mxu1  ;;  %v3660_v38 = vadd.f32 %v3630_v6, %v4624_v21  ;;  %v2440_v32 = vpop.f32.mrb[5].mxu0 }
 0x198   : > { %v3675_v2 = vadd.f32 %v3674_v48, %v2472_v19  ;;  %v3639_v11 = vpop.f32.mrb[22].mxu1  ;;  %v2621_v40 = vadd.f32 %v2620_v41, %v2606_v29  ;;  %v3661_v47 = vadd.f32 %v2440_v32, %v4626_v22  ;;  %v2585_v25 = vadd.f32 %v3658_v13, %v2584_v3  ;;  %v3631_v27 = vpop.f32.mrb[6].mxu0 }
 0x199   : > { %v2475_v57 = vpop.f32.mrb[23].mxu1  ;;  %v3662_v56 = vadd.f32 %v3631_v27, %v4628_v31  ;;  %v2443_v28 = vpop.f32.mrb[7].mxu0  ;;  %v3677_v30 = vadd.f32 %v3676_v60, %v3639_v11  ;;  %v2610_v63 = vmul.f32 %v3660_v38, %v3660_v38  ;;  %v2618_v17 = vmul.f32 %v3673_v4, %v3673_v4 }
 0x19a   : > { %v2586_v0 = vadd.f32 %v3661_v47, %v2585_v25  ;;  %v2608_v7 = vmul.f32 %v3661_v47, %v3661_v47  ;;  %v2622_v21 = vadd.f32 %v2621_v40, %v2607_v34  ;;  %v3663_v35 = vadd.f32 %v2443_v28, %v4630_v24 }
 0x19b   : > { %v3172_v36 = vpack.c.bf16 %v3662_v56, %v3660_v38  ;;  %v3192_v37 = vpack.c.bf16 %v3677_v30, %v3673_v4  ;;  %v3679_v43 = vadd.f32 %v3678_v1, %v2475_v57  ;;  %v2611_v48 = vmul.f32 %v3662_v56, %v3662_v56 }
 0x19c   : > { %v2623_v39 = vadd.f32 %v2622_v21, %v2608_v7  ;;  %v3167_v22 = vpack.c.bf16 %v3663_v35, %v3661_v47  ;;  %v2587_v12 = vadd.f32 %v3663_v35, %v2586_v0  ;;  %v2609_v42 = vmul.f32 %v3663_v35, %v3663_v35 }
 0x19d   : > { %3203 = vst [vmem:[%s4643_s23 + $0x18] sm:$0xff] %v3172_v36   ;;  %3207 = vst [vmem:[%s4643_s23 + $0x38] sm:$0xff] %v3192_v37   ;;  %v3187_v46 = vpack.c.bf16 %v3679_v43, %v3675_v2  ;;  %v2612_v24 = vmul.f32 %v4634_v20, %v4634_v20  ;;  %v2614_v1 = vmul.f32 %v4632_v54, %v4632_v54 }
 0x19e   : > { %3202 = vst [vmem:[%s4643_s23 + $0x10] sm:$0xff] %v3167_v22   ;;  %v2588_v31 = vadd.f32 %v3660_v38, %v2587_v12  ;;  %v2624_v44 = vadd.f32 %v2623_v39, %v2609_v42  ;;  %v2617_v16 = vmul.f32 %v3679_v43, %v3679_v43 }
 0x19f   : > { %3206 = vst [vmem:[%s4643_s23 + $0x30] sm:$0xff] %v3187_v46  }
 0x1a0   : > { %v2589_v49 = vadd.f32 %v3662_v56, %v2588_v31  ;;  %v2625_v51 = vadd.f32 %v2624_v44, %v2610_v63 }
 0x1a2   : > { %v2590_v60 = vadd.f32 %v4634_v20, %v2589_v49  ;;  %v2626_v5 = vadd.f32 %v2625_v51, %v2611_v48  ;;  %v2616_v20 = vmul.f32 %v3675_v2, %v3675_v2 }
 0x1a4   : > { %v2627_v55 = vadd.f32 %v2626_v5, %v2612_v24  ;;  %v2591_v58 = vadd.f32 %v3671_v9, %v2590_v60 }
 0x1a6   : > { %v2592_v59 = vadd.f32 %v4632_v54, %v2591_v58  ;;  %v2628_v33 = vadd.f32 %v2627_v55, %v2613_v53  ;;  %v2619_v54 = vmul.f32 %v3677_v30, %v3677_v30 }
 0x1a8   : > { %v2593_v62 = vadd.f32 %v4636_v10, %v2592_v59  ;;  %v2629_v45 = vadd.f32 %v2628_v33, %v2614_v1 }
 0x1aa   : > { %v2594_v13 = vadd.f32 %v3675_v2, %v2593_v62  ;;  %v2630_v8 = vadd.f32 %v2629_v45, %v2615_v61 }
 0x1ac   : > { %v2631_v14 = vadd.f32 %v2630_v8, %v2616_v20  ;;  %v2595_v9 = vadd.f32 %v3679_v43, %v2594_v13 }
 0x1ae   : > { %v2596_v18 = vadd.f32 %v3673_v4, %v2595_v9  ;;  %v2632_v15 = vadd.f32 %v2631_v14, %v2617_v16 }
 0x1b0   : > { %v2597_v23 = vadd.f32 %v3677_v30, %v2596_v18  ;;  %v2633_v50 = vadd.f32 %v2632_v15, %v2618_v17 }
 0x1b2   : > { %v2598_v52 = vrot.slane %v2597_v23, 4  ;;  %v2634_v26 = vadd.f32 %v2633_v50, %v2619_v54 }
 0x1b4   : > { %v2599_v10 = vadd.f32 %v2598_v52, %v2597_v23  ;;  %v2635_v29 = vrot.slane %v2634_v26, 4 }
 0x1b6   : > { %v2600_v3 = vrot.slane %v2599_v10, 2  ;;  %v2636_v41 = vadd.f32 %v2635_v29, %v2634_v26 }
 0x1b8   : > { %v2601_v6 = vadd.f32 %v2600_v3, %v2599_v10  ;;  %v2637_v19 = vrot.slane %v2636_v41, 2 }
 0x1ba   : > { %v2602_v38 = vrot.slane %v2601_v6, 1  ;;  %v2638_v32 = vadd.f32 %v2637_v19, %v2636_v41 }
 0x1bc   : > { %v2639_v4 = vrot.slane %v2638_v32, 1  ;;  %v2603_v2 = vadd.f32 %v2602_v38, %v2601_v6 }
 0x1be   : > { %v2640_v11 = vadd.f32 %v2639_v4, %v2638_v32 }
 0x1c0   : > { %v2642_v34 = vsel %vm719_vm1, %v2603_v2, %v2640_v11 }
 0x1c1   : > { %2643 = vst [vmem:[%s467_s9] sm:$0x3] %v2642_v34 }
 0x1c2 PF: > { %s18_s28 = sadd.s32 1, %s3934_s28   ;;  %s4703_s24 = smov %s3926_s26 }
 0x1c3   : > { %p15_p0 = scmp.ge.s32.totalorder %s18_s28, 6   ;;  %s4704_s25 = smov %s3930_s27 }
 0x1c4   : > { %s4705_s26 = smov %s4708_s29  ;;  %s4706_s27 = smov %s4712_s30 }
 0x1c5   :  { %17 = sbr.rel (!%p15_p0) target bundleno = 3 (0x3), region = 100 }

// kernel: double_conv.3
= control target key start
LH: loop header
LB: loop body
LE: loop exit
PB: predicated region body
PF: predicated region fallthrough
CT: control target
= control target key end

     0   :  { %s3893_s24 = smov 0   ;;  %s3895_s25 = smov 0   ;;  %s4508_s0 = inlined_call_operand.vmem [shape: bf16[2,16,16,128], index: 0, kind: input, shape index: {}, may-alias: {0,1,2}]   ;;  %s4509_s1 = inlined_call_operand.vmem [shape: bf16[2,16,16,128], index: 1, kind: input, shape index: {}, may-alias: {0,1,2}]   ;;  %s4510_s2 = inlined_call_operand.vmem [shape: bf16[2,16,16,128], index: 2, kind: input, shape index: {}, may-alias: {0,1,2}]   ;;  %s4511_s3 = inlined_call_operand.vmem [shape: f32[1,128], index: 3, kind: input, shape index: {}]   ;;  %s4512_s4 = inlined_call_operand.vmem [shape: f32[1,128], index: 4, kind: input, shape index: {}]   ;;  %s4513_s5 = inlined_call_operand.vmem [shape: bf16[9,128,128], index: 5, kind: input, shape index: {}]   ;;  %s4514_s6 = inlined_call_operand.vmem [shape: bf16[2,16,16,128], index: 6, kind: output, shape index: {0}]   ;;  %s4515_s7 = inlined_call_operand.vmem [shape: f32[2,2,2,128], index: 7, kind: output, shape index: {1}]  }
   0x1   :  { %s3897_s26 = smov 0   ;;  %s3899_s27 = smov 0  }
   0x2   :  { %s3901_s3 = smov 0  }
   0x3 LB: > { %s27_s4 = sadd.s32 1, %s3843_s26  ;;  %s30_s28 = sadd.s32 1, %s3847_s27  ;;  %s3851_s3 = sphi %s3901_s3, %s18_s3   ;;  %s3847_s27 = sphi %s3899_s27, %s4522_s27   ;;  %s3843_s26 = sphi %s3897_s26, %s4521_s26   ;;  %s3839_s25 = sphi %s3895_s25, %s4520_s25   ;;  %s3835_s24 = sphi %s3893_s24, %s4519_s24  }
   0x4   : > { %p28_p0 = scmp.ge.s32.totalorder %s27_s4, 2  ;;  %p2790_p1 = scmp.ge.s32.totalorder %s3851_s3, 1 }
   0x5   : > { %p328_p2 = scmp.lt.s32.totalorder %s3851_s3, 5 }
   0x6   : > { %s4524_s4 = smov (%p28_p0, %s27_s4), 0  ;;  %s4526_s28 = smov (!%p28_p0, %s30_s28), %s3847_s27 }
   0x7   : > { %p329_p3 = pnand %p2790_p1, %p328_p2  ;;  %p32_p4 = scmp.ge.s32.totalorder %s4526_s28, 2 }
   0x8   : > { %v3733_v0 = vld [vmem:[%s4513_s5 + $0x100] sm:$0xff] (!%p329_p3)   ;;  %s3929_s8 = sshll.u32 (!%p329_p3), %s3835_s24, 3  ;;  %p405_p5 = scmp.lt.s32.totalorder (!%p329_p3), %s3839_s25, 1  ;;  %v3735_v2 = vld [vmem:[%s4513_s5 + $0x108] sm:$0xff] (!%p329_p3)   ;;  %v3737_v4 = vld [vmem:[%s4513_s5 + $0x110] sm:$0xff] (!%p329_p3)   ;;  %vm667_vm1 = vcmask (!%p329_p3), 1040384  }
   0x9   : > { %s4528_s28 = smov (%p32_p4, %s4526_s28), 0  ;;  %332 = sbr.rel (%p329_p3) target bundleno = 433 (0x1b1), region = 44 }
   0xa   : > { %v3734_v1 = vld [vmem:[%s4513_s5 + $0x40] sm:$0xff] (!%p329_p3)   ;;  %3389 = vmatprep.subr.bf16.mxu0 (!%p329_p3), %v3733_v0  ;;  %p407_p6 = scmp.lt.s32.totalorder (!%p329_p3), %s3929_s8, 15  ;;  %v3736_v3 = vld [vmem:[%s4513_s5 + $0x48] sm:$0xff] (!%p329_p3)   ;;  %v3738_v5 = vld [vmem:[%s4513_s5 + $0x50] sm:$0xff] (!%p329_p3)   ;;  %s2796_s10 = sadd.s32 (!%p329_p3), 4294967295, %s3929_s8  ;;  %vm1134_vm4 = vcmask (!%p329_p3), 1046528  }
   0xb   : > { %3261 = vmatprep.subr.bf16.mxu1 (!%p329_p3), %v3734_v1  ;;  %3390 = vmatpush3.bf16.msra.mxu0 (!%p329_p3), %v3733_v0  ;;  %v3739_v6 = vld [vmem:[%s4513_s5 + $0x118] sm:$0xff] (!%p329_p3)   ;;  %p417_p7 = scmp.gt.s32.totalorder (!%p329_p3), %s2796_s10, 0  ;;  %p2797_p8 = scmp.lt.s32.totalorder (!%p329_p3), %s2796_s10, 15  ;;  %v3741_v8 = vld [vmem:[%s4513_s5 + $0x120] sm:$0xff] (!%p329_p3)   ;;  %v3743_v10 = vld [vmem:[%s4513_s5 + $0x128] sm:$0xff] (!%p329_p3)  }
   0xc   : > { %3262 = vmatpush3.bf16.msra.mxu1 (!%p329_p3), %v3734_v1  ;;  %3391 = vmatprep.subr.bf16.mxu0 (!%p329_p3), %v3735_v2  ;;  %v3740_v7 = vld [vmem:[%s4513_s5 + $0x58] sm:$0xff] (!%p329_p3)   ;;  %v3742_v9 = vld [vmem:[%s4513_s5 + $0x60] sm:$0xff] (!%p329_p3)   ;;  %v3744_v12 = vld [vmem:[%s4513_s5 + $0x68] sm:$0xff] (!%p329_p3)   ;;  %vm668_vm0 = vsmask.f32 (!%p329_p3), 256  ;;  %p487_p9 = scmp.gt.s32.totalorder (!%p329_p3), %s3835_s24, 0 }
   0xd   : > { %3263 = vmatprep.subr.bf16.mxu1 (!%p329_p3), %v3736_v3  ;;  %v3745_v16 = vld [vmem:[%s4513_s5 + $0x130] sm:$0xff] (!%p329_p3)   ;;  %vm706_vm2 = vsmask.f32 (!%p329_p3), 7424  ;;  %vm3994_vm3 = vmand (!%p329_p3), %vm667_vm1, %vm668_vm0  ;;  %v3747_v25 = vld [vmem:[%s4513_s5 + $0x138] sm:$0xff] (!%p329_p3)   ;;  %p462_p12 = scmp.lt.s32.totalorder (!%p329_p3), %s3835_s24, 1 }
   0xe   : > { %v3746_v19 = vld [vmem:[%s4513_s5 + $0x70] sm:$0xff] (!%p329_p3)   ;;  %v3748_v27 = vld [vmem:[%s4513_s5 + $0x78] sm:$0xff] (!%p329_p3)   ;;  %v3751_v43 = vld [vmem:[%s4513_s5 + $0x140] sm:$0xff] (!%p329_p3)  }
   0xf   : > { %3392 = vmatpush3.bf16.msra.mxu0 (!%p329_p3), %v3735_v2  ;;  %v4045_v44 = vld [vmem:[%s4513_s5] sm:$0xff] (!%p329_p3)   ;;  %v3753_v59 = vld [vmem:[%s4513_s5 + $0x148] sm:$0xff] (!%p329_p3)  }
  0x10   : > { %s4530_s25 = smov (!%p405_p5, %s3839_s25), 1  ;;  %3264 = vmatpush3.bf16.msra.mxu1 %v3736_v3  ;;  %3393 = vmatprep.subr.bf16.mxu0 %v3737_v4  ;;  %s4532_s10 = smov (!%p417_p7, %s2796_s10), 0  ;;  %v3757_v3 = vld [vmem:[%s4513_s5 + $0x150] sm:$0xff]  }
  0x11   : > { %s408_s17 = scalar_select %p407_p6, %s3929_s8, 15  ;;  %3265 = vmatprep.subr.bf16.mxu1 %v3738_v5 }
  0x12   : > { %s3951_s20 = sshll.u32 %s4530_s25, 5  ;;  %s4534_s10 = smov (!%p2797_p8, %s4532_s10), 15 }
  0x13   : > { %s2792_s21 = sshll.u32 %s408_s17, 1  ;;  %3394 = vmatpush3.bf16.msra.mxu0 %v3737_v4  ;;  %s2802_s30 = sshll.u32 %s4534_s10, 1 }
  0x14   : > { %s3954_s22 = sadd.s32 %s3951_s20, %s2792_s21  ;;  %3266 = vmatpush3.bf16.msra.mxu1 %v3738_v5  ;;  %3395 = vmatprep.subr.bf16.mxu0 %v3739_v6  ;;  %s4005_s15 = sadd.s32 %s2802_s30, %s3951_s20 }
  0x15   : > { %s2794_s11 = sshll.u32 %s3954_s22, 2  ;;  %3267 = vmatprep.subr.bf16.mxu1 %v3740_v7  ;;  %s2804_s29 = sshll.u32 %s4005_s15, 2 }
  0x16   : > { %s3975_s18 = scalar_lea.vmem %s4508_s0, %s2794_s11  ;;  %s427_s21 = scalar_lea.vmem %s4509_s1, %s2804_s29 }
  0x17   : > { %3396 = vmatpush3.bf16.msra.mxu0 %v3739_v6  ;;  %v3749_v11 = vld [vmem:[%s3975_s18] sm:$0xff]   ;;  %v3750_v15 = vld [vmem:[%s3975_s18 + $0x8] sm:$0xff]   ;;  %s488_s10 = scalar_select %p487_p9, 1, 0  ;;  %v3755_v31 = vld [vmem:[%s3975_s18 + $0x10] sm:$0xff]  }
  0x18   : > { %3268 = vmatpush3.bf16.msra.mxu1 %v3740_v7  ;;  %3397 = vmatprep.subr.bf16.mxu0 %v3741_v8  ;;  %v585_v13 = vshrl.u32 %v3749_v11, 16  ;;  %v588_v14 = vshll.u32 %v3749_v11, 16  ;;  %v592_v18 = vshrl.u32 %v3750_v15, 16  ;;  %v595_v21 = vshll.u32 %v3750_v15, 16  ;;  %v3756_v35 = vld [vmem:[%s3975_s18 + $0x18] sm:$0xff]   ;;  %s4475_s16 = scalar_lea.vmem %s4514_s6, %s2794_s11  ;;  %s4544_s24 = smov (!%p462_p12, %s3835_s24), 1 }
  0x19   : > { %3269 = vmatprep.subr.bf16.mxu1 %v3742_v9  ;;  %s4011_s19 = scvt.s32.f32 %s488_s10  ;;  %v599_v38 = vshrl.u32 %v3755_v31, 16  ;;  %v602_v46 = vshll.u32 %v3755_v31, 16  ;;  %v606_v49 = vshrl.u32 %v3756_v35, 16  ;;  %v609_v50 = vshll.u32 %v3756_v35, 16  ;;  %v485_v54 = vld [vmem:[%s427_s21] sm:$0xf] }
  0x1a   : > { %v587_v17 = vrot.slane %v585_v13, 7  ;;  %v594_v24 = vrot.slane %v592_v18, 7  ;;  %v486_v55 = vld [vmem:[%s427_s21 + $0x4] sm:$0xf]  ;;  %s2816_s22 = sshll.u32 %s4530_s25, 1 }
  0x1b   : > { %3398 = vmatpush3.bf16.msra.mxu0 %v3741_v8  ;;  %s492_s30 = sshrl.u32 %s4011_s19, 16  ;;  %p491_p10 = scmp.ne.f32.partialorder %s4011_s19, %s4011_s19  ;;  %v601_v45 = vrot.slane %v599_v38, 7  ;;  %v608_v58 = vrot.slane %v606_v49, 7  ;;  %v3763_v38 = vld [vmem:[%s4513_s5 + $0x160] sm:$0xff]  }
  0x1c   : > { %3270 = vmatpush3.bf16.msra.mxu1 %v3742_v9  ;;  %3399 = vmatprep.subr.bf16.mxu0 %v3743_v10  ;;  %v590_v22 = vor.u32 %v588_v14, %v587_v17  ;;  %v4002_v23 = vsel %vm3994_vm3, %v587_v17, 0  ;;  %v597_v29 = vor.u32 %v595_v21, %v594_v24  ;;  %v4022_v30 = vsel %vm3994_vm3, %v594_v24, 0  ;;  %s493_s9 = sand.u32 1, %s492_s30  ;;  %v3762_v14 = vld [vmem:[%s3975_s18 + $0x28] sm:$0xff]   ;;  %s465_s11 = sadd.s32 %s2816_s22, %s4544_s24 }
  0x1d   : > { %3271 = vmatprep.subr.bf16.mxu1 %v3744_v12  ;;  %v727_v26 = vshll.u32 %v4002_v23, 16  ;;  %v739_v34 = vshll.u32 %v4022_v30, 16  ;;  %s494_s12 = sadd.s32 32767, %s493_s9  ;;  %v604_v51 = vor.u32 %v602_v46, %v601_v45  ;;  %v4056_v52 = vsel %vm3994_vm3, %v601_v45, 0 }
  0x1e   : > { %v4018_v28 = vsel %vm3994_vm3, 0, %v590_v22  ;;  %v4035_v37 = vsel %vm3994_vm3, 0, %v597_v29  ;;  %s495_s23 = sadd.s32 %s494_s12, %s4011_s19  ;;  %v751_v57 = vshll.u32 %v4056_v52, 16  ;;  %v611_v1 = vor.u32 %v609_v50, %v608_v58 }
  0x1f   : > { %3400 = vmatpush3.bf16.msra.mxu0 %v3743_v10  ;;  %v720_v32 = vshrl.u32 %v4018_v28, 16  ;;  %v722_v33 = vshll.u32 %v4018_v28, 16  ;;  %v729_v36 = vrot.slane %v727_v26, 1  ;;  %v732_v40 = vshrl.u32 %v4035_v37, 16  ;;  %s496_s30 = sand.u32 4294901760, %s495_s23  ;;  %v3761_v10 = vld [vmem:[%s3975_s18 + $0x20] sm:$0xff]  }
  0x20   : > { %3272 = vmatpush3.bf16.msra.mxu1 %v3744_v12  ;;  %3401 = vmatprep.subr.bf16.mxu0 %v3745_v16  ;;  %v734_v41 = vshll.u32 %v4035_v37, 16  ;;  %v741_v42 = vrot.slane %v739_v34, 1  ;;  %s4536_s30 = smov (%p491_p10, %s496_s30), 2143289344  ;;  %v4068_v60 = vsel %vm3994_vm3, 0, %v604_v51  ;;  %v753_v0 = vrot.slane %v751_v57, 1 }
  0x21   : > { %3273 = vmatprep.subr.bf16.mxu1 %v3746_v19  ;;  %v724_v39 = vrot.slane %v722_v33, 1  ;;  %s499_s19 = sshrl.u32 %s4536_s30, 16  ;;  %v744_v62 = vshrl.u32 %v4068_v60, 16  ;;  %v746_v63 = vshll.u32 %v4068_v60, 16  ;;  %v4079_v2 = vsel %vm3994_vm3, %v608_v58, 0  ;;  %v3767_v33 = vld [vmem:[%s3975_s18 + $0x30] sm:$0xff]  }
  0x22   : > { %v736_v48 = vrot.slane %v734_v41, 1  ;;  %s500_s12 = sshll.u32 %s499_s19, 16  ;;  %v763_v6 = vshll.u32 %v4079_v2, 16  ;;  %v4087_v9 = vsel %vm3994_vm3, 0, %v611_v1  ;;  %v613_v17 = vshrl.u32 %v3761_v10, 16  ;;  %s3053_s30 = sadd.s32 8, %s3929_s8 }
  0x23   : > { %3402 = vmatpush3.bf16.msra.mxu0 %v3745_v16  ;;  %v725_v47 = vor.u32 %v724_v39, %v720_v32  ;;  %s501_s13 = sor.u32 %s500_s12, %s499_s19  ;;  %v748_v5 = vrot.slane %v746_v63, 1  ;;  %v756_v12 = vshrl.u32 %v4087_v9, 16  ;;  %v758_v13 = vshll.u32 %v4087_v9, 16  ;;  %p4224_p11 = scmp.lt.s32.totalorder %s3053_s30, 15 }
  0x24   : > { %3274 = vmatpush3.bf16.msra.mxu1 %v3746_v19  ;;  %3403 = vmatprep.subr.bf16.mxu0 %v3747_v25  ;;  %v737_v56 = vor.u32 %v736_v48, %v732_v40  ;;  %v502_v4 = vstv %s501_s13  ;;  %v765_v16 = vrot.slane %v763_v6, 1  ;;  %v616_v18 = vshll.u32 %v3761_v10, 16  ;;  %v3768_v48 = vld [vmem:[%s3975_s18 + $0x38] sm:$0xff]   ;;  %s509_s12 = scalar_select %p462_p12, 1, 0 }
  0x25   : > { %3275 = vmatprep.subr.bf16.mxu1 %v3748_v27  ;;  %v4059_v53 = vsel %vm706_vm2, %v725_v47, %v729_v36  ;;  %v504_v7 = vmul.bf16 %v502_v4, %v485_v54  ;;  %v505_v8 = vmul.bf16 %v502_v4, %v486_v55  ;;  %v749_v11 = vor.u32 %v748_v5, %v744_v62  ;;  %v3765_v4 = vld [vmem:[%s4513_s5 + $0x168] sm:$0xff]   ;;  %s4538_s30 = smov (!%p4224_p11, %s3053_s30), 15 }
  0x26   : > { %3405 = vmatprep.mubr.bf16.mxu0 %v4059_v53  ;;  %v4071_v61 = vsel %vm706_vm2, %v737_v56, %v741_v42  ;;  %v760_v21 = vrot.slane %v758_v13, 1  ;;  %v620_v22 = vshrl.u32 %v3762_v14, 16  ;;  %v623_v24 = vshll.u32 %v3762_v14, 16  ;;  %s4540_s30 = smov (!%p4224_p11, %s4538_s30), 15  ;;  %s510_s10 = scvt.s32.f32 %s509_s12 }
  0x27   : > { %3404 = vmatpush3.bf16.msra.mxu0 %v3747_v25  ;;  %v2818_v15 = vcombine.low %v504_v7, %v505_v8  ;;  %v4094_v19 = vsel %vm706_vm2, %v749_v11, %v753_v0  ;;  %v615_v29 = vrot.slane %v613_v17, 7  ;;  %v627_v58 = vshrl.u32 %v3767_v33, 16  ;;  %s2809_s29 = sshll.u32 %s4540_s30, 1 }
  0x28   : > { %3276 = vmatpush3.bf16.msra.mxu1 %v3748_v27  ;;  %3421 = vmatprep.subr.bf16.mxu0 %v3751_v43  ;;  %v3759_v27 = vld [vmem:[%s4513_s5 + $0x158] sm:$0xff]   ;;  %v761_v31 = vor.u32 %v760_v21, %v756_v12  ;;  %v622_v32 = vrot.slane %v620_v22, 7  ;;  %v630_v6 = vshll.u32 %v3767_v33, 16  ;;  %v634_v10 = vshrl.u32 %v3768_v48, 16  ;;  %v3769_v33 = vld [vmem:[%s4513_s5 + $0x170] sm:$0xff]   ;;  %s442_s30 = sadd.s32 %s2809_s29, %s3951_s20  ;;  %s513_s17 = sshrl.u32 %s510_s10, 16 }
  0x29   : > { %3293 = vmatprep.subr.bf16.mxu1 %v4045_v44  ;;  %v578_v25 = vshrl.u32 %v2818_v15, 16  ;;  %v581_v26 = vshll.u32 %v2818_v15, 16  ;;  %v618_v35 = vor.u32 %v616_v18, %v615_v29  ;;  %v4103_v36 = vsel %vm3994_vm3, %v615_v29, 0  ;;  %s2811_s20 = sshll.u32 %s442_s30, 2  ;;  %p512_p13 = scmp.ne.f32.partialorder %s510_s10, %s510_s10 }
  0x2a   : > { %3406 = vmatmul.mubr.bf16.vlgmr.msra.gmra.mrb[0].mxu0 %v4071_v61  ;;  %v4109_v39 = vsel %vm706_vm2, %v761_v31, %v765_v16  ;;  %v775_v40 = vshll.u32 %v4103_v36, 16  ;;  %v625_v41 = vor.u32 %v623_v24, %v622_v32  ;;  %v4114_v42 = vsel %vm3994_vm3, %v622_v32, 0  ;;  %s514_s21 = sand.u32 1, %s513_s17  ;;  %s444_s9 = scalar_lea.vmem %s4510_s2, %s2811_s20 }
  0x2b   : > { %3422 = vmatpush3.bf16.msra.mxu0 %v3751_v43  ;;  %3409 = vmatprep.mubr.bf16.mxu0 %v4094_v19  ;;  %v580_v34 = vrot.slane %v578_v25, 7  ;;  %v4123_v46 = vsel %vm3994_vm3, 0, %v618_v35  ;;  %v787_v47 = vshll.u32 %v4114_v42, 16  ;;  %v629_v5 = vrot.slane %v627_v58, 7  ;;  %v3754_v25 = vld [vmem:[%s4513_s5 + $0x8] sm:$0xff]   ;;  %s515_s19 = sadd.s32 32767, %s514_s21 }
  0x2c   : > { %3423 = vmatprep.subr.bf16.mxu0 %v3753_v59  ;;  %v768_v50 = vshrl.u32 %v4123_v46, 16  ;;  %v770_v51 = vshll.u32 %v4123_v46, 16  ;;  %v777_v54 = vrot.slane %v775_v40, 1  ;;  %v4136_v56 = vsel %vm3994_vm3, 0, %v625_v41  ;;  %v3758_v41 = vld [vmem:[%s4513_s5 + $0x10] sm:$0xff]   ;;  %s516_s12 = sadd.s32 %s515_s19, %s510_s10 }
  0x2d   : > { %v583_v43 = vor.u32 %v581_v26, %v580_v34  ;;  %v4118_v45 = vsel %vm3994_vm3, %v580_v34, 0  ;;  %v789_v57 = vrot.slane %v787_v47, 1  ;;  %v780_v1 = vshrl.u32 %v4136_v56, 16  ;;  %s517_s14 = sand.u32 4294901760, %s516_s12 }
  0x2e   : > { %v715_v49 = vshll.u32 %v4118_v45, 16  ;;  %v772_v0 = vrot.slane %v770_v51, 1  ;;  %v637_v11 = vshll.u32 %v3768_v48, 16  ;;  %v632_v13 = vor.u32 %v630_v6, %v629_v5  ;;  %s4542_s14 = smov (%p512_p13, %s517_s14), 2143289344 }
  0x2f   : > { %3424 = vmatpush3.bf16.msra.mxu0 %v3753_v59  ;;  %v4132_v55 = vsel %vm3994_vm3, 0, %v583_v43  ;;  %v4147_v14 = vsel %vm3994_vm3, %v629_v5, 0  ;;  %v636_v18 = vrot.slane %v634_v10, 7  ;;  %v1138_v48 = vrot.slane %v4018_v28, 1  ;;  %v3766_v5 = vld [vmem:[%s4513_s5 + $0x28] sm:$0xff]   ;;  %s520_s20 = sshrl.u32 %s4542_s14, 16 }
  0x30   : > { %3425 = vmatprep.subr.bf16.mxu0 %v3757_v3  ;;  %v708_v59 = vshrl.u32 %v4132_v55, 16  ;;  %v710_v62 = vshll.u32 %v4132_v55, 16  ;;  %v717_v63 = vrot.slane %v715_v49, 1  ;;  %v773_v8 = vor.u32 %v772_v0, %v768_v50  ;;  %s521_s18 = sshll.u32 %s520_s20, 16 }
  0x31   : > { %v799_v17 = vshll.u32 %v4147_v14, 16  ;;  %v4156_v22 = vsel %vm3994_vm3, 0, %v632_v13  ;;  %v639_v31 = vor.u32 %v637_v11, %v636_v18  ;;  %v4169_v32 = vsel %vm3994_vm3, %v636_v18, 0  ;;  %v3774_v18 = vld [vmem:[%s4513_s5 + $0x80] sm:$0xff]   ;;  %s522_s10 = sor.u32 %s521_s18, %s520_s20  ;;  %s2817_s20 = sshll.u32 %s465_s11, 1 }
  0x32   : > { %3410 = vmatmul.mubr.bf16.gmra.mrb[4].mxu0 %v4109_v39  ;;  %v712_v7 = vrot.slane %v710_v62, 1  ;;  %v4150_v16 = vsel %vm706_vm2, %v773_v8, %v777_v54  ;;  %v792_v26 = vshrl.u32 %v4156_v22, 16  ;;  %v1139_v49 = vrot.slane %v4002_v23, 1  ;;  %v3773_v62 = vld [vmem:[%s4513_s5 + $0x180] sm:$0xff]   ;;  %v3777_v8 = vld [vmem:[%s4513_s5 + $0x190] sm:$0xff]   ;;  %s467_s18 = scalar_lea.vmem %s4515_s7, %s2817_s20 }
  0x33   : > { %3426 = vmatpush3.bf16.msra.mxu0 %v3757_v3  ;;  %v782_v3 = vshll.u32 %v4136_v56, 16  ;;  %3413 = vmatprep.mubr.bf16.mxu0 %v4150_v16  ;;  %v801_v35 = vrot.slane %v799_v17, 1  ;;  %v4181_v40 = vsel %vm3994_vm3, 0, %v639_v31  ;;  %v1142_v0 = vrot.slane %v4022_v30, 1  ;;  %v3776_v31 = vld [vmem:[%s4513_s5 + $0x88] sm:$0xff]  }
  0x34   : > { %3427 = vmatprep.subr.bf16.mxu0 %v3759_v27  ;;  %v713_v15 = vor.u32 %v712_v7, %v708_v59  ;;  %v1524_v43 = vshrl.u32 %v4181_v40, 16  ;;  %v1526_v47 = vshll.u32 %v4181_v40, 16  ;;  %v4205_v59 = vsel %vm1134_vm4, %v1138_v48, %v1139_v49  ;;  %v3770_v7 = vld [vmem:[%s4513_s5 + $0x30] sm:$0xff]   ;;  %v3782_v48 = vld [vmem:[%s4513_s5 + $0xa0] sm:$0xff]  }
  0x35   : > { %v784_v12 = vrot.slane %v782_v3, 1  ;;  %v1144_v3 = vrot.slane %v4068_v60, 1  ;;  %v1147_v10 = vrot.slane %v4087_v9, 1  ;;  %v1148_v11 = vrot.slane %v4079_v2, 1  ;;  %v3779_v2 = vld [vmem:[%s4513_s5 + $0x198] sm:$0xff]  }
  0x36   : > { %v718_v24 = vsel %vm706_vm2, %v713_v15, %v717_v63  ;;  %v1528_v51 = vrot.slane %v1526_v47, 1  ;;  %v3764_v63 = vld [vmem:[%s4513_s5 + $0x20] sm:$0xff]   ;;  %v1151_v13 = vrot.slane %v4103_v36, 1  ;;  %v3772_v15 = vld [vmem:[%s4513_s5 + $0x38] sm:$0xff]   ;;  %v523_v49 = vstv %s522_s10 }
  0x37   : > { %3428 = vmatpush3.bf16.msra.mxu0 %v3759_v27  ;;  %v785_v21 = vor.u32 %v784_v12, %v780_v1  ;;  %v794_v27 = vshll.u32 %v4156_v22, 16  ;;  %3277 = vmatprep.mubr.bf16.mxu1 %v718_v24  ;;  %v1141_v1 = vrot.slane %v4035_v37, 1  ;;  %v1150_v12 = vrot.slane %v4123_v46, 1 }
  0x38   : > { %3429 = vmatprep.subr.bf16.mxu0 %v3763_v38  ;;  %3278 = vmatmul.mubr.bf16.vlgmr.msra.gmra.mrb[0].mxu1 %v4059_v53  ;;  %v1529_v58 = vor.u32 %v1528_v51, %v1524_v43  ;;  %v4259_v17 = vsel %vm1134_vm4, %v1147_v10, %v1148_v11  ;;  %v1154_v24 = vrot.slane %v4114_v42, 1  ;;  %v507_v43 = vld [vmem:[%s444_s9 + $0x4] sm:$0xf]  ;;  %v3793_v10 = vld [vmem:[%s4513_s5 + $0x1d0] sm:$0xff]  }
  0x39   : > { %v4165_v29 = vsel %vm706_vm2, %v785_v21, %v789_v57  ;;  %v796_v34 = vrot.slane %v794_v27, 1  ;;  %3294 = vmatpush3.bf16.msra.mxu1 %v4045_v44  ;;  %3281 = vmatprep.mubr.bf16.mxu1 %v4071_v61  ;;  %v3771_v44 = vld [vmem:[%s4513_s5 + $0x178] sm:$0xff]   ;;  %v4229_v30 = vsel %vm1134_vm4, %v1141_v1, %v1142_v0  ;;  %v4266_v36 = vsel %vm1134_vm4, %v1150_v12, %v1151_v13  ;;  %v3791_v1 = vld [vmem:[%s4513_s5 + $0x1c8] sm:$0xff]  }
  0x3a   : > { %3414 = vmatmul.mubr.bf16.gmra.mrb[8].mxu0 %v4165_v29  ;;  %3295 = vmatprep.subr.bf16.mxu1 %v3754_v25  ;;  %v3760_v57 = vld [vmem:[%s4513_s5 + $0x18] sm:$0xff]   ;;  %v1153_v21 = vrot.slane %v4136_v56, 1  ;;  %v1157_v27 = vrot.slane %v4147_v14, 1 }
  0x3b   : > { %3430 = vmatpush3.bf16.msra.mxu0 %v3763_v38  ;;  %v1531_v38 = vshll.u32 %v4169_v32, 16  ;;  %v797_v53 = vor.u32 %v796_v34, %v792_v26  ;;  %v1156_v26 = vrot.slane %v4156_v22, 1  ;;  %v3778_v34 = vld [vmem:[%s4513_s5 + $0x90] sm:$0xff]  }
  0x3c   : > { %3431 = vmatprep.subr.bf16.mxu0 %v3765_v4  ;;  %v4289_v42 = vsel %vm1134_vm4, %v1153_v21, %v1154_v24  ;;  %v3792_v21 = vld [vmem:[%s4513_s5 + $0xc8] sm:$0xff]  }
  0x3d   : > { %v4194_v50 = vsel %vm706_vm2, %v797_v53, %v801_v35  ;;  %v1533_v54 = vrot.slane %v1531_v38, 1  ;;  %3296 = vmatpush3.bf16.msra.mxu1 %v3754_v25  ;;  %v3781_v25 = vld [vmem:[%s4513_s5 + $0x1a0] sm:$0xff]   ;;  %v4296_v14 = vsel %vm1134_vm4, %v1156_v26, %v1157_v27  ;;  %v1716_v35 = vrot.slane %v4181_v40, 1  ;;  %v3780_v53 = vld [vmem:[%s4513_s5 + $0x98] sm:$0xff]   ;;  %v3799_v24 = vld [vmem:[%s4513_s5 + $0x1e8] sm:$0xff]  }
  0x3e   : > { %3417 = vmatprep.mubr.bf16.mxu0 %v4194_v50  ;;  %3297 = vmatprep.subr.bf16.mxu1 %v3758_v41  ;;  %v1717_v38 = vrot.slane %v4169_v32, 1  ;;  %v506_v32 = vld [vmem:[%s444_s9] sm:$0xf]  ;;  %v3796_v26 = vld [vmem:[%s4513_s5 + $0xd8] sm:$0xff]  }
  0x3f   : > { %3432 = vmatpush3.bf16.msra.mxu0 %v3765_v4  ;;  %v4202_v23 = vsel %vm706_vm2, %v1529_v58, %v1533_v54  ;;  %v1145_v4 = vrot.slane %v4056_v52, 1  ;;  %v3775_v52 = vld [vmem:[%s4513_s5 + $0x188] sm:$0xff]   ;;  %v525_v51 = vmul.bf16 %v523_v49, %v506_v32  ;;  %v526_v54 = vmul.bf16 %v523_v49, %v507_v43  ;;  %v3803_v27 = vld [vmem:[%s4513_s5 + $0x1f8] sm:$0xff]  }
  0x40   : > { %3433 = vmatprep.subr.bf16.mxu0 %v3769_v33  ;;  %3282 = vmatmul.mubr.bf16.gmra.mrb[4].mxu1 %v4094_v19  ;;  %v4317_v47 = vsel %vm1134_vm4, %v1716_v35, %v1717_v38  ;;  %v3806_v35 = vld [vmem:[%s4513_s5 + $0x208] sm:$0xff]   ;;  %v3807_v38 = vld [vmem:[%s4513_s5 + $0x210] sm:$0xff]  }
  0x41   : > { %3298 = vmatpush3.bf16.msra.mxu1 %v3758_v41  ;;  %3285 = vmatprep.mubr.bf16.mxu1 %v4109_v39  ;;  %v4236_v6 = vsel %vm1134_vm4, %v1144_v3, %v1145_v4  ;;  %v3785_v41 = vld [vmem:[%s4513_s5 + $0x1b0] sm:$0xff]   ;;  %v2827_v58 = vcombine.low %v525_v51, %v526_v54 }
  0x42   : > { %3299 = vmatprep.subr.bf16.mxu1 %v3760_v57  ;;  %3418 = vmatmul.mubr.bf16.gmra.mrb[12].mxu0 %v4202_v23  ;;  %v3786_v4 = vld [vmem:[%s4513_s5 + $0xb0] sm:$0xff]  }
  0x43   : > { %3434 = vmatpush3.bf16.msra.mxu0 %v3769_v33  ;;  %3437 = vmatprep.mubr.bf16.mxu0 %v4205_v59  ;;  %v3783_v33 = vld [vmem:[%s4513_s5 + $0x1a8] sm:$0xff]   ;;  %v644_v0 = vshll.u32 %v2827_v58, 16 }
  0x44   : > { %3435 = vmatprep.subr.bf16.mxu0 %v3771_v44 }
  0x45   : > { %3300 = vmatpush3.bf16.msra.mxu1 %v3760_v57  ;;  %v3789_v57 = vld [vmem:[%s4513_s5 + $0x1c0] sm:$0xff]  }
  0x46   : > { %3301 = vmatprep.subr.bf16.mxu1 %v3764_v63 }
  0x47   : > { %3436 = vmatpush3.bf16.msra.mxu0 %v3771_v44  ;;  %v3787_v44 = vld [vmem:[%s4513_s5 + $0x1b8] sm:$0xff]  }
  0x48   : > { %3453 = vmatprep.subr.bf16.mxu0 %v3773_v62  ;;  %3286 = vmatmul.mubr.bf16.gmra.mrb[8].mxu1 %v4150_v16 }
  0x49   : > { %3302 = vmatpush3.bf16.msra.mxu1 %v3764_v63  ;;  %3289 = vmatprep.mubr.bf16.mxu1 %v4165_v29  ;;  %v641_v63 = vshrl.u32 %v2827_v58, 16 }
  0x4a   : > { %3303 = vmatprep.subr.bf16.mxu1 %v3766_v5  ;;  %3438 = vmatmul.mubr.bf16.vlgmr.msra.gmra.mrb[0].mxu0 %v4229_v30 }
  0x4b   : > { %3454 = vmatpush3.bf16.msra.mxu0 %v3773_v62  ;;  %3441 = vmatprep.mubr.bf16.mxu0 %v4236_v6  ;;  %v3784_v62 = vld [vmem:[%s4513_s5 + $0xa8] sm:$0xff]   ;;  %v643_v3 = vrot.slane %v641_v63, 7 }
  0x4c   : > { %3455 = vmatprep.subr.bf16.mxu0 %v3775_v52 }
  0x4d   : > { %3304 = vmatpush3.bf16.msra.mxu1 %v3766_v5  ;;  %v1135_v5 = vrot.slane %v4132_v55, 1 }
  0x4e   : > { %3305 = vmatprep.subr.bf16.mxu1 %v3770_v7 }
  0x4f   : > { %3456 = vmatpush3.bf16.msra.mxu0 %v3775_v52  ;;  %v1136_v52 = vrot.slane %v4118_v45, 1 }
  0x50   : > { %3290 = vmatmul.mubr.bf16.gmra.mrb[12].mxu1 %v4194_v50  ;;  %3457 = vmatprep.subr.bf16.mxu0 %v3777_v8 }
  0x51   : > { %3306 = vmatpush3.bf16.msra.mxu1 %v3770_v7  ;;  %3309 = vmatprep.mubr.bf16.mxu1 %v4132_v55  ;;  %v646_v7 = vor.u32 %v644_v0, %v643_v3  ;;  %v3788_v55 = vld [vmem:[%s4513_s5 + $0xb8] sm:$0xff]   ;;  %v1137_v12 = vsel %vm1134_vm4, %v1135_v5, %v1136_v52 }
  0x52   : > { %3307 = vmatprep.subr.bf16.mxu1 %v3772_v15  ;;  %3442 = vmatmul.mubr.bf16.gmra.mrb[4].mxu0 %v4259_v17 }
  0x53   : > { %3458 = vmatpush3.bf16.msra.mxu0 %v3777_v8  ;;  %3445 = vmatprep.mubr.bf16.mxu0 %v4266_v36  ;;  %v4349_v8 = vsel %vm3994_vm3, %v643_v3, 0  ;;  %v4357_v45 = vsel %vm3994_vm3, 0, %v646_v7 }
  0x54   : > { %3459 = vmatprep.subr.bf16.mxu0 %v3779_v2  ;;  %v2270_v11 = vrot.slane %v4349_v8, 1  ;;  %v2269_v13 = vrot.slane %v4357_v45, 1  ;;  %v2077_v32 = vshrl.u32 %v4357_v45, 16 }
  0x55   : > { %3308 = vmatpush3.bf16.msra.mxu1 %v3772_v15  ;;  %v3795_v15 = vld [vmem:[%s4513_s5 + $0x1d8] sm:$0xff]  }
  0x56   : > { %3325 = vmatprep.subr.bf16.mxu1 %v3774_v18  ;;  %v4369_v20 = vsel %vm1134_vm4, %v2269_v13, %v2270_v11 }
  0x57   : > { %3460 = vmatpush3.bf16.msra.mxu0 %v3779_v2  ;;  %v3790_v2 = vld [vmem:[%s4513_s5 + $0xc0] sm:$0xff]  }
  0x58   : > { %3310 = vmatmul.mubr.bf16.vlgmr.msra.gmra.mrb[0].mxu1 %v4018_v28  ;;  %3461 = vmatprep.subr.bf16.mxu0 %v3781_v25 }
  0x59   : > { %3326 = vmatpush3.bf16.msra.mxu1 %v3774_v18  ;;  %3313 = vmatprep.mubr.bf16.mxu1 %v4035_v37  ;;  %v3797_v18 = vld [vmem:[%s4513_s5 + $0x1e0] sm:$0xff]  }
  0x5a   : > { %3327 = vmatprep.subr.bf16.mxu1 %v3776_v31  ;;  %3446 = vmatmul.mubr.bf16.gmra.mrb[8].mxu0 %v4289_v42 }
  0x5b   : > { %3462 = vmatpush3.bf16.msra.mxu0 %v3781_v25  ;;  %3449 = vmatprep.mubr.bf16.mxu0 %v4296_v14  ;;  %v3794_v25 = vld [vmem:[%s4513_s5 + $0xd0] sm:$0xff]  }
  0x5c   : > { %3463 = vmatprep.subr.bf16.mxu0 %v3783_v33 }
  0x5d   : > { %3328 = vmatpush3.bf16.msra.mxu1 %v3776_v31  ;;  %v3798_v31 = vld [vmem:[%s4513_s5 + $0xe0] sm:$0xff]  }
  0x5e   : > { %3329 = vmatprep.subr.bf16.mxu1 %v3778_v34 }
  0x5f   : > { %3464 = vmatpush3.bf16.msra.mxu0 %v3783_v33  ;;  %v3805_v33 = vld [vmem:[%s4513_s5 + $0x200] sm:$0xff]  }
  0x60   : > { %3314 = vmatmul.mubr.bf16.gmra.mrb[4].mxu1 %v4068_v60  ;;  %3465 = vmatprep.subr.bf16.mxu0 %v3785_v41 }
  0x61   : > { %3330 = vmatpush3.bf16.msra.mxu1 %v3778_v34  ;;  %3317 = vmatprep.mubr.bf16.mxu1 %v4087_v9  ;;  %v3800_v34 = vld [vmem:[%s4513_s5 + $0xe8] sm:$0xff]  }
  0x62   : > { %3331 = vmatprep.subr.bf16.mxu1 %v3780_v53  ;;  %3450 = vmatmul.mubr.bf16.gmra.mrb[12].mxu0 %v4317_v47 }
  0x63   : > { %3466 = vmatpush3.bf16.msra.mxu0 %v3785_v41  ;;  %3469 = vmatprep.mubr.bf16.mxu0 %v4035_v37  ;;  %v3804_v41 = vld [vmem:[%s4513_s5 + $0xf8] sm:$0xff]  }
  0x64   : > { %3467 = vmatprep.subr.bf16.mxu0 %v3787_v44 }
  0x65   : > { %3332 = vmatpush3.bf16.msra.mxu1 %v3780_v53  ;;  %v3809_v53 = vld [vmem:[%s4513_s5 + $0x220] sm:$0xff]  }
  0x66   : > { %3333 = vmatprep.subr.bf16.mxu1 %v3782_v48 }
  0x67   : > { %3468 = vmatpush3.bf16.msra.mxu0 %v3787_v44 }
  0x68   : > { %3318 = vmatmul.mubr.bf16.gmra.mrb[8].mxu1 %v4123_v46  ;;  %3485 = vmatprep.subr.bf16.mxu0 %v3789_v57 }
  0x69   : > { %3334 = vmatpush3.bf16.msra.mxu1 %v3782_v48  ;;  %3321 = vmatprep.mubr.bf16.mxu1 %v4136_v56 }
  0x6a   : > { %3335 = vmatprep.subr.bf16.mxu1 %v3784_v62  ;;  %3470 = vmatmul.mubr.bf16.vlgmr.msra.gmra.mrb[0].mxu0 %v4068_v60 }
  0x6b   : > { %3486 = vmatpush3.bf16.msra.mxu0 %v3789_v57  ;;  %3473 = vmatprep.mubr.bf16.mxu0 %v4087_v9 }
  0x6c   : > { %3487 = vmatprep.subr.bf16.mxu0 %v3791_v1 }
  0x6d   : > { %3336 = vmatpush3.bf16.msra.mxu1 %v3784_v62 }
  0x6e   : > { %3337 = vmatprep.subr.bf16.mxu1 %v3786_v4 }
  0x6f   : > { %3488 = vmatpush3.bf16.msra.mxu0 %v3791_v1 }
  0x70   : > { %3322 = vmatmul.mubr.bf16.gmra.mrb[12].mxu1 %v4156_v22  ;;  %3489 = vmatprep.subr.bf16.mxu0 %v3793_v10 }
  0x71   : > { %3338 = vmatpush3.bf16.msra.mxu1 %v3786_v4  ;;  %3341 = vmatprep.mubr.bf16.mxu1 %v1137_v12 }
  0x72   : > { %3339 = vmatprep.subr.bf16.mxu1 %v3788_v55  ;;  %3474 = vmatmul.mubr.bf16.gmra.mrb[4].mxu0 %v4123_v46 }
  0x73   : > { %3490 = vmatpush3.bf16.msra.mxu0 %v3793_v10  ;;  %3477 = vmatprep.mubr.bf16.mxu0 %v4136_v56 }
  0x74   : > { %3491 = vmatprep.subr.bf16.mxu0 %v3795_v15 }
  0x75   : > { %3340 = vmatpush3.bf16.msra.mxu1 %v3788_v55 }
  0x76   : > { %3357 = vmatprep.subr.bf16.mxu1 %v3790_v2 }
  0x77   : > { %3492 = vmatpush3.bf16.msra.mxu0 %v3795_v15 }
  0x78   : > { %3342 = vmatmul.mubr.bf16.vlgmr.msra.gmra.mrb[0].mxu1 %v4205_v59  ;;  %3493 = vmatprep.subr.bf16.mxu0 %v3797_v18  ;;  %v3801_v59 = vld [vmem:[%s4513_s5 + $0x1f0] sm:$0xff]  }
  0x79   : > { %3358 = vmatpush3.bf16.msra.mxu1 %v3790_v2  ;;  %3345 = vmatprep.mubr.bf16.mxu1 %v4229_v30 }
  0x7a   : > { %3359 = vmatprep.subr.bf16.mxu1 %v3792_v21  ;;  %3478 = vmatmul.mubr.bf16.gmra.mrb[8].mxu0 %v4156_v22 }
  0x7b   : > { %3494 = vmatpush3.bf16.msra.mxu0 %v3797_v18  ;;  %3481 = vmatprep.mubr.bf16.mxu0 %v4181_v40 }
  0x7c   : > { %3495 = vmatprep.subr.bf16.mxu0 %v3799_v24 }
  0x7d   : > { %3360 = vmatpush3.bf16.msra.mxu1 %v3792_v21 }
  0x7e   : > { %3361 = vmatprep.subr.bf16.mxu1 %v3794_v25 }
  0x7f   : > { %3496 = vmatpush3.bf16.msra.mxu0 %v3799_v24 }
  0x80   : > { %3346 = vmatmul.mubr.bf16.gmra.mrb[4].mxu1 %v4236_v6  ;;  %3497 = vmatprep.subr.bf16.mxu0 %v3801_v59 }
  0x81   : > { %3362 = vmatpush3.bf16.msra.mxu1 %v3794_v25  ;;  %3349 = vmatprep.mubr.bf16.mxu1 %v4259_v17 }
  0x82   : > { %3363 = vmatprep.subr.bf16.mxu1 %v3796_v26  ;;  %3482 = vmatmul.mubr.bf16.gmra.mrb[12].mxu0 %v4357_v45 }
  0x83   : > { %3498 = vmatpush3.bf16.msra.mxu0 %v3801_v59  ;;  %3501 = vmatprep.mubr.bf16.mxu0 %v4071_v61  ;;  %v3802_v61 = vld [vmem:[%s4513_s5 + $0xf0] sm:$0xff]  }
  0x84   : > { %3499 = vmatprep.subr.bf16.mxu0 %v3803_v27 }
  0x85   : > { %3364 = vmatpush3.bf16.msra.mxu1 %v3796_v26 }
  0x86   : > { %3365 = vmatprep.subr.bf16.mxu1 %v3798_v31 }
  0x87   : > { %3500 = vmatpush3.bf16.msra.mxu0 %v3803_v27 }
  0x88   : > { %3350 = vmatmul.mubr.bf16.gmra.mrb[8].mxu1 %v4266_v36  ;;  %3517 = vmatprep.subr.bf16.mxu0 %v3805_v33 }
  0x89   : > { %3366 = vmatpush3.bf16.msra.mxu1 %v3798_v31  ;;  %3353 = vmatprep.mubr.bf16.mxu1 %v4289_v42 }
  0x8a   : > { %3367 = vmatprep.subr.bf16.mxu1 %v3800_v34  ;;  %3502 = vmatmul.mubr.bf16.vlgmr.msra.gmra.mrb[0].mxu0 %v4094_v19  ;;  %v3808_v19 = vld [vmem:[%s4513_s5 + $0x218] sm:$0xff]  }
  0x8b   : > { %3518 = vmatpush3.bf16.msra.mxu0 %v3805_v33  ;;  %3505 = vmatprep.mubr.bf16.mxu0 %v4109_v39  ;;  %v2079_v39 = vshll.u32 %v4357_v45, 16 }
  0x8c   : > { %3519 = vmatprep.subr.bf16.mxu0 %v3806_v35 }
  0x8d   : > { %3368 = vmatpush3.bf16.msra.mxu1 %v3800_v34  ;;  %v2081_v43 = vrot.slane %v2079_v39, 1 }
  0x8e   : > { %3369 = vmatprep.subr.bf16.mxu1 %v3802_v61 }
  0x8f   : > { %3520 = vmatpush3.bf16.msra.mxu0 %v3806_v35 }
  0x90   : > { %3354 = vmatmul.mubr.bf16.gmra.mrb[12].mxu1 %v4296_v14  ;;  %3521 = vmatprep.subr.bf16.mxu0 %v3807_v38 }
  0x91   : > { %3370 = vmatpush3.bf16.msra.mxu1 %v3802_v61  ;;  %3373 = vmatprep.mubr.bf16.mxu1 %v4018_v28  ;;  %v2084_v28 = vshll.u32 %v4349_v8, 16 }
  0x92   : > { %3371 = vmatprep.subr.bf16.mxu1 %v3804_v41  ;;  %3506 = vmatmul.mubr.bf16.gmra.mrb[4].mxu0 %v4150_v16  ;;  %v3810_v16 = vld [vmem:[%s4513_s5 + $0x228] sm:$0xff]  }
  0x93   : > { %3522 = vmatpush3.bf16.msra.mxu0 %v3807_v38  ;;  %3509 = vmatprep.mubr.bf16.mxu0 %v4165_v29  ;;  %v2082_v29 = vor.u32 %v2081_v43, %v2077_v32  ;;  %v2086_v44 = vrot.slane %v2084_v28, 1 }
  0x94   : > { %3523 = vmatprep.subr.bf16.mxu0 %v3808_v19 }
  0x95   : > { %3372 = vmatpush3.bf16.msra.mxu1 %v3804_v41  ;;  %v2087_v48 = vsel %vm706_vm2, %v2082_v29, %v2086_v44 }
  0x96   : > { %3549 = vmatprep.subr.bf16.mxu1 %v3805_v33 }
  0x97   : > { %3524 = vmatpush3.bf16.msra.mxu0 %v3808_v19 }
  0x98   : > { %3374 = vmatmul.mubr.bf16.vlgmr.msra.gmra.mrb[0].mxu1 %v4035_v37  ;;  %3525 = vmatprep.subr.bf16.mxu0 %v3809_v53  ;;  %v3811_v37 = vld [vmem:[%s4513_s5 + $0x230] sm:$0xff]  }
  0x99   : > { %3557 = vmatpush3.bf16.msra.mxu1 %v3805_v33  ;;  %3377 = vmatprep.mubr.bf16.mxu1 %v4068_v60  ;;  %v3812_v60 = vld [vmem:[%s4513_s5 + $0x238] sm:$0xff]  }
  0x9a   : > { %3550 = vmatprep.subr.bf16.mxu1 %v3806_v35  ;;  %3510 = vmatmul.mubr.bf16.gmra.mrb[8].mxu0 %v4194_v50 }
  0x9b   : > { %3526 = vmatpush3.bf16.msra.mxu0 %v3809_v53  ;;  %3513 = vmatprep.mubr.bf16.mxu0 %v4202_v23 }
  0x9c   : > { %3527 = vmatprep.subr.bf16.mxu0 %v3810_v16 }
  0x9d   : > { %3558 = vmatpush3.bf16.msra.mxu1 %v3806_v35 }
  0x9e   : > { %3551 = vmatprep.subr.bf16.mxu1 %v3807_v38 }
  0x9f   : > { %3528 = vmatpush3.bf16.msra.mxu0 %v3810_v16 }
  0xa0   : > { %3378 = vmatmul.mubr.bf16.gmra.mrb[4].mxu1 %v4087_v9  ;;  %3529 = vmatprep.subr.bf16.mxu0 %v3811_v37 }
  0xa1   : > { %3559 = vmatpush3.bf16.msra.mxu1 %v3807_v38  ;;  %3381 = vmatprep.mubr.bf16.mxu1 %v4123_v46 }
  0xa2   : > { %3552 = vmatprep.subr.bf16.mxu1 %v3808_v19  ;;  %3514 = vmatmul.mubr.bf16.gmra.mrb[12].mxu0 %v2087_v48 }
  0xa3   : > { %3530 = vmatpush3.bf16.msra.mxu0 %v3811_v37  ;;  %3533 = vmatprep.mubr.bf16.mxu0 %v4229_v30 }
  0xa4   : > { %3531 = vmatprep.subr.bf16.mxu0 %v3812_v60 }
  0xa5   : > { %3560 = vmatpush3.bf16.msra.mxu1 %v3808_v19 }
  0xa6   : > { %3553 = vmatprep.subr.bf16.mxu1 %v3809_v53 }
  0xa7   : > { %3532 = vmatpush3.bf16.msra.mxu0 %v3812_v60 }
  0xa8   : > { %3382 = vmatmul.mubr.bf16.gmra.mrb[8].mxu1 %v4136_v56 }
  0xa9   : > { %3561 = vmatpush3.bf16.msra.mxu1 %v3809_v53  ;;  %3385 = vmatprep.mubr.bf16.mxu1 %v4156_v22 }
  0xaa   : > { %3554 = vmatprep.subr.bf16.mxu1 %v3810_v16  ;;  %3534 = vmatmul.mubr.bf16.vlgmr.msra.gmra.mrb[0].mxu0 %v4236_v6 }
  0xab   : > { %3537 = vmatprep.mubr.bf16.mxu0 %v4259_v17 }
  0xad   : > { %3562 = vmatpush3.bf16.msra.mxu1 %v3810_v16 }
  0xae   : > { %3555 = vmatprep.subr.bf16.mxu1 %v3811_v37 }
  0xb0   : > { %3386 = vmatmul.mubr.bf16.gmra.mrb[12].mxu1 %v4181_v40 }
  0xb1   : > { %3563 = vmatpush3.bf16.msra.mxu1 %v3811_v37  ;;  %3541 = vmatprep.mubr.bf16.mxu1 %v4289_v42 }
  0xb2   : > { %3556 = vmatprep.subr.bf16.mxu1 %v3812_v60  ;;  %3538 = vmatmul.mubr.bf16.gmra.mrb[4].mxu0 %v4266_v36 }
  0xb5   : > { %3564 = vmatpush3.bf16.msra.mxu1 %v3812_v60 }
  0xb8   : > { %3542 = vmatmul.mubr.bf16.vlgmr.msra.gmra.mrb[16].mxu1 %v4296_v14 }
  0xb9   : > { %3545 = vmatprep.mubr.bf16.mxu1 %v4317_v47 }
  0xc0   : > { %3546 = vmatmul.mubr.bf16.gmra.mrb[20].mxu1 %v4369_v20 }
 0x16b   : > { %v3375_v9 = vpop.f32.mrb[0].mxu1 }
 0x16c   : > { %v1444_v46 = vpop.f32.mrb[1].mxu1 }
 0x16d   : > { %v3376_v56 = vpop.f32.mrb[2].mxu1  ;;  %v3511_v22 = vpop.f32.mrb[8].mxu0 }
 0x16e   : > { %v1447_v50 = vpop.f32.mrb[3].mxu1  ;;  %v2220_v23 = vpop.f32.mrb[9].mxu0 }
 0x16f   : > { %v3512_v40 = vpop.f32.mrb[10].mxu0 }
 0x170   : > { %v2223_v30 = vpop.f32.mrb[11].mxu0 }
 0x173   : > { %v3379_v6 = vpop.f32.mrb[4].mxu1 }
 0x174   : > { %v1460_v17 = vpop.f32.mrb[5].mxu1 }
 0x175   : > { %v3380_v42 = vpop.f32.mrb[6].mxu1  ;;  %v3515_v49 = vpop.f32.mrb[12].mxu0 }
 0x176   : > { %v1463_v36 = vpop.f32.mrb[7].mxu1  ;;  %v2236_v51 = vpop.f32.mrb[13].mxu0 }
 0x177   : > { %v3516_v54 = vpop.f32.mrb[14].mxu0 }
 0x178   : > { %v2239_v14 = vpop.f32.mrb[15].mxu0 }
 0x17b   : > { %v3383_v47 = vpop.f32.mrb[8].mxu1 }
 0x17c   : > { %v3573_v57 = vadd.f32 %v3511_v22, %v3383_v47  ;;  %v1476_v58 = vpop.f32.mrb[9].mxu1 }
 0x17d   : > { %v3575_v62 = vadd.f32 %v2220_v23, %v1476_v58  ;;  %v3384_v63 = vpop.f32.mrb[10].mxu1  ;;  %v3535_v0 = vpop.f32.mrb[0].mxu0 }
 0x17e   : > { %v3577_v1 = vadd.f32 %v3512_v40, %v3384_v63  ;;  %v1479_v3 = vpop.f32.mrb[11].mxu1  ;;  %v3565_v4 = vadd.f32 %v3535_v0, %v3375_v9  ;;  %v2372_v5 = vpop.f32.mrb[1].mxu0 }
 0x17f   : > { %v3579_v52 = vadd.f32 %v2223_v30, %v1479_v3  ;;  %v3566_v7 = vadd.f32 %v2372_v5, %v1444_v46  ;;  %v3536_v8 = vpop.f32.mrb[2].mxu0 }
 0x180   : > { %v3567_v10 = vadd.f32 %v3536_v8, %v3376_v56  ;;  %v2375_v11 = vpop.f32.mrb[3].mxu0  ;;  %v2554_v59 = vmul.f32 %v3565_v4, %v3565_v4 }
 0x181   : > { %v3568_v45 = vadd.f32 %v2375_v11, %v1447_v50  ;;  %v2552_v13 = vmul.f32 %v3566_v7, %v3566_v7 }
 0x182   : > { %v3078_v55 = vpack.c.bf16 %v3567_v10, %v3565_v4  ;;  %v2555_v35 = vmul.f32 %v3567_v10, %v3567_v10 }
 0x183   : > { %v3387_v12 = vpop.f32.mrb[12].mxu1  ;;  %v3073_v15 = vpack.c.bf16 %v3568_v45, %v3566_v7  ;;  %v2531_v20 = vadd.f32 %v3568_v45, %v3566_v7  ;;  %v2553_v2 = vmul.f32 %v3568_v45, %v3568_v45 }
 0x184   : > { %v3581_v18 = vadd.f32 %v3515_v49, %v3387_v12  ;;  %v1492_v21 = vpop.f32.mrb[13].mxu1  ;;  %3110 = vst [vmem:[%s4475_s16 + $0x8] sm:$0xff] %v3078_v55  }
 0x185   : > { %v3583_v24 = vadd.f32 %v2236_v51, %v1492_v21  ;;  %v3388_v25 = vpop.f32.mrb[14].mxu1  ;;  %3074 = vst [vmem:[%s4475_s16] sm:$0xff] %v3073_v15   ;;  %v2532_v26 = vadd.f32 %v3565_v4, %v2531_v20  ;;  %v2568_v27 = vadd.f32 %v2553_v2, %v2552_v13  ;;  %v3539_v31 = vpop.f32.mrb[4].mxu0 }
 0x186   : > { %v3585_v33 = vadd.f32 %v3516_v54, %v3388_v25  ;;  %v1495_v34 = vpop.f32.mrb[15].mxu1  ;;  %v3569_v61 = vadd.f32 %v3539_v31, %v3379_v6  ;;  %v2388_v38 = vpop.f32.mrb[5].mxu0 }
 0x187   : > { %v3587_v41 = vadd.f32 %v2239_v14, %v1495_v34  ;;  %v2569_v19 = vadd.f32 %v2568_v27, %v2554_v59  ;;  %v3570_v39 = vadd.f32 %v2388_v38, %v1460_v17  ;;  %v2533_v53 = vadd.f32 %v3567_v10, %v2532_v26  ;;  %v3540_v32 = vpop.f32.mrb[6].mxu0 }
 0x188   : > { %v3571_v43 = vadd.f32 %v3540_v32, %v3380_v42  ;;  %v2391_v28 = vpop.f32.mrb[7].mxu0  ;;  %v2558_v6 = vmul.f32 %v3569_v61, %v3569_v61 }
 0x189   : > { %v2534_v16 = vadd.f32 %v3570_v39, %v2533_v53  ;;  %v2556_v29 = vmul.f32 %v3570_v39, %v3570_v39  ;;  %v2570_v44 = vadd.f32 %v2569_v19, %v2555_v35  ;;  %v3572_v37 = vadd.f32 %v2391_v28, %v1463_v36 }
 0x18a   : > { %v3088_v48 = vpack.c.bf16 %v3571_v43, %v3569_v61  ;;  %v2559_v54 = vmul.f32 %v3571_v43, %v3571_v43 }
 0x18b   : > { %v3543_v60 = vpop.f32.mrb[16].mxu1  ;;  %v2571_v9 = vadd.f32 %v2570_v44, %v2556_v29  ;;  %v3083_v46 = vpack.c.bf16 %v3572_v37, %v3570_v39  ;;  %v2535_v56 = vadd.f32 %v3572_v37, %v2534_v16  ;;  %v2557_v22 = vmul.f32 %v3572_v37, %v3572_v37 }
 0x18c   : > { %v3574_v50 = vadd.f32 %v3573_v57, %v3543_v60  ;;  %v2404_v23 = vpop.f32.mrb[17].mxu1  ;;  %3112 = vst [vmem:[%s4475_s16 + $0x18] sm:$0xff] %v3088_v48  }
 0x18d   : > { %v3576_v40 = vadd.f32 %v3575_v62, %v2404_v23  ;;  %v3544_v30 = vpop.f32.mrb[18].mxu1  ;;  %3111 = vst [vmem:[%s4475_s16 + $0x10] sm:$0xff] %v3083_v46   ;;  %v2536_v17 = vadd.f32 %v3569_v61, %v2535_v56  ;;  %v2572_v42 = vadd.f32 %v2571_v9, %v2557_v22 }
 0x18e   : > { %v3578_v49 = vadd.f32 %v3577_v1, %v3544_v30  ;;  %v2407_v51 = vpop.f32.mrb[19].mxu1  ;;  %v2562_v11 = vmul.f32 %v3574_v50, %v3574_v50 }
 0x18f   : > { %v3580_v36 = vadd.f32 %v3579_v52, %v2407_v51  ;;  %v2537_v14 = vadd.f32 %v3571_v43, %v2536_v17  ;;  %v2573_v47 = vadd.f32 %v2572_v42, %v2558_v6  ;;  %v2560_v63 = vmul.f32 %v3576_v40, %v3576_v40 }
 0x190   : > { %v3098_v58 = vpack.c.bf16 %v3578_v49, %v3574_v50  ;;  %v2563_v15 = vmul.f32 %v3578_v49, %v3578_v49 }
 0x191   : > { %v3093_v0 = vpack.c.bf16 %v3580_v36, %v3576_v40  ;;  %v2538_v57 = vadd.f32 %v3576_v40, %v2537_v14  ;;  %v2574_v3 = vadd.f32 %v2573_v47, %v2559_v54  ;;  %v2561_v62 = vmul.f32 %v3580_v36, %v3580_v36 }
 0x192   : > { %3114 = vst [vmem:[%s4475_s16 + $0x28] sm:$0xff] %v3098_v58  }
 0x193   : > { %3113 = vst [vmem:[%s4475_s16 + $0x20] sm:$0xff] %v3093_v0   ;;  %v3547_v4 = vpop.f32.mrb[20].mxu1  ;;  %v2575_v5 = vadd.f32 %v2574_v3, %v2560_v63  ;;  %v2539_v7 = vadd.f32 %v3580_v36, %v2538_v57 }
 0x194   : > { %v3582_v8 = vadd.f32 %v3581_v18, %v3547_v4  ;;  %v2420_v10 = vpop.f32.mrb[21].mxu1 }
 0x195   : > { %v3584_v1 = vadd.f32 %v3583_v24, %v2420_v10  ;;  %v3548_v52 = vpop.f32.mrb[22].mxu1  ;;  %v2540_v45 = vadd.f32 %v3574_v50, %v2539_v7  ;;  %v2576_v55 = vadd.f32 %v2575_v5, %v2561_v62 }
 0x196   : > { %v3586_v12 = vadd.f32 %v3585_v33, %v3548_v52  ;;  %v2423_v13 = vpop.f32.mrb[23].mxu1  ;;  %v2566_v35 = vmul.f32 %v3582_v8, %v3582_v8 }
 0x197   : > { %v3588_v20 = vadd.f32 %v3587_v41, %v2423_v13  ;;  %v2541_v2 = vadd.f32 %v3578_v49, %v2540_v45  ;;  %v2577_v21 = vadd.f32 %v2576_v55, %v2562_v11  ;;  %v2564_v59 = vmul.f32 %v3584_v1, %v3584_v1 }
 0x198   : > { %v3108_v25 = vpack.c.bf16 %v3586_v12, %v3582_v8  ;;  %v2567_v38 = vmul.f32 %v3586_v12, %v3586_v12 }
 0x199   : > { %v3103_v26 = vpack.c.bf16 %v3588_v20, %v3584_v1  ;;  %v2542_v18 = vadd.f32 %v3584_v1, %v2541_v2  ;;  %v2578_v27 = vadd.f32 %v2577_v21, %v2563_v15  ;;  %v2565_v31 = vmul.f32 %v3588_v20, %v3588_v20 }
 0x19a   : > { %3116 = vst [vmem:[%s4475_s16 + $0x38] sm:$0xff] %v3108_v25  }
 0x19b   : > { %3115 = vst [vmem:[%s4475_s16 + $0x30] sm:$0xff] %v3103_v26   ;;  %v2543_v24 = vadd.f32 %v3588_v20, %v2542_v18  ;;  %v2579_v34 = vadd.f32 %v2578_v27, %v2564_v59 }
 0x19d   : > { %v2544_v33 = vadd.f32 %v3582_v8, %v2543_v24  ;;  %v2580_v61 = vadd.f32 %v2579_v34, %v2565_v31 }
 0x19f   : > { %v2545_v41 = vadd.f32 %v3586_v12, %v2544_v33  ;;  %v2581_v19 = vadd.f32 %v2580_v61, %v2566_v35 }
 0x1a1   : > { %v2546_v39 = vrot.slane %v2545_v41, 4  ;;  %v2582_v53 = vadd.f32 %v2581_v19, %v2567_v38 }
 0x1a3   : > { %v2547_v32 = vadd.f32 %v2546_v39, %v2545_v41  ;;  %v2583_v43 = vrot.slane %v2582_v53, 4 }
 0x1a5   : > { %v2548_v28 = vrot.slane %v2547_v32, 2  ;;  %v2584_v16 = vadd.f32 %v2583_v43, %v2582_v53 }
 0x1a7   : > { %v2549_v29 = vadd.f32 %v2548_v28, %v2547_v32  ;;  %v2585_v44 = vrot.slane %v2584_v16, 2 }
 0x1a9   : > { %v2550_v37 = vrot.slane %v2549_v29, 1  ;;  %v2586_v48 = vadd.f32 %v2585_v44, %v2584_v16 }
 0x1ab   : > { %v2587_v60 = vrot.slane %v2586_v48, 1  ;;  %v2551_v9 = vadd.f32 %v2550_v37, %v2549_v29 }
 0x1ad   : > { %v2588_v46 = vadd.f32 %v2587_v60, %v2586_v48 }
 0x1af   : > { %v2590_v56 = vsel %vm667_vm1, %v2551_v9, %v2588_v46 }
 0x1b0   : > { %2591 = vst [vmem:[%s467_s18] sm:$0x3] %v2590_v56 }
 0x1b1 PF: > { %s18_s3 = sadd.s32 1, %s3851_s3   ;;  %s4519_s24 = smov %s3843_s26 }
 0x1b2   : > { %p15_p0 = scmp.ge.s32.totalorder %s18_s3, 6   ;;  %s4520_s25 = smov %s3847_s27 }
 0x1b3   : > { %s4521_s26 = smov %s4524_s4  ;;  %s4522_s27 = smov %s4528_s28 }
 0x1b4   :  { %17 = sbr.rel (!%p15_p0) target bundleno = 3 (0x3), region = 100 }

</bundles_post_ra>
